<compile_context>
chip_gen: v7x
topology: tpu7x:2x2x1
jax: 0.10.0
libtpu: 0.0.40
codegen_flags: <defaults>
</compile_context>

<pallas_src>
import jax
import jax.numpy as jnp
from jax.experimental import pallas as pl
from jax.experimental.pallas import tpu as pltpu

C_PAD = 128        # lane-dense classifier width (pad num classes up to 128 lanes)
NEG_PAD = -1e30    # f32 bias for padded classifier columns -> softmax prob ~ 0


def fused_sent_kernel(emb_ref, mask_ref, w_enc_ref, b_enc_ref,
                      w_sent_ref, b_sent_ref, out_ref, acc_ref):
    """One (batch tile b, sequence tile s) grid step.

    emb_ref   : (b_tile, s_tile, D) bf16  streamed embedding tile
    mask_ref  : (b_tile, s_tile)    f32   attention mask, pre-scaled by 1/count
    w_enc_ref : (D, D)              bf16  stand-in encoder dense weight (resident)
    b_enc_ref : (1, D)              f32   (resident)
    w_sent_ref: (D, C_PAD)          bf16  zero-padded sentiment head (resident)
    b_sent_ref: (1, C_PAD)          f32   bias, padded columns = -1e30 (resident)
    out_ref   : (b_tile, C_PAD)     f32   softmax probabilities (dense 8x128 store)
    acc_ref   : (b_tile, D)         f32   running mean-pool accumulator (scratch)
    """
    s = pl.program_id(1)

    @pl.when(s == 0)
    def _init():
        acc_ref[...] = jnp.zeros_like(acc_ref)

    bt, st, d = emb_ref.shape
    rows = bt * st

    # ---- stand-in encoder dense layer: one bf16 MXU matmul, M = bt*st -------
    # Leading-dim collapse is layout preserving (s_tile is a multiple of the
    # bf16 sublane tile), so this reshape is free.
    emb2 = emb_ref[...].reshape(rows, d)                         # (rows, D) bf16
    hid = jnp.tanh(
        jnp.dot(emb2, w_enc_ref[...], preferred_element_type=jnp.float32)
        + b_enc_ref[...])                                        # (rows, D) f32

    # ---- masked mean-pool accumulation as one MXU matmul ---------------------
    # Block-diagonal selection matrix: sel[b, b*st + s] = mask_scaled[b, s].
    mask = mask_ref[...]                                         # (bt, st) f32
    col = jax.lax.broadcasted_iota(jnp.int32, (bt, rows), 1)
    row = jax.lax.broadcasted_iota(jnp.int32, (bt, rows), 0)
    off = col - row * st
    sel = jnp.where((off >= 0) & (off < st),
                    jnp.tile(mask, (1, bt)), 0.0)                # (bt, rows) f32
    acc_ref[...] += jnp.dot(sel.astype(jnp.bfloat16),
                            hid.astype(jnp.bfloat16),
                            preferred_element_type=jnp.float32)  # (bt, D)

    # ---- finalize: linear head -> softmax (dense (8,128) store) -------------
    @pl.when(s == pl.num_programs(1) - 1)
    def _finalize():
        pooled = acc_ref[...]                                    # already the mean
        logits = jnp.dot(pooled.astype(jnp.bfloat16), w_sent_ref[...],
                         preferred_element_type=jnp.float32) + b_sent_ref[...]
        z = logits - jnp.max(logits, axis=-1, keepdims=True)
        e = jnp.exp(z)
        out_ref[...] = e / jnp.sum(e, axis=-1, keepdims=True)    # exact divide


def wrapped_sent_model(input_ids, attention_mask, params, *,
                       s_tile=256, b_tile=8):
    """JAX forward matching WrappedSentModel.forward (softmax probs over classes)."""
    B, S = input_ids.shape
    D = params["w_enc"].shape[0]
    C = params["w_sent"].shape[1]
    assert C <= C_PAD
    assert s_tile % 128 == 0, "s_tile must be a multiple of 128 (lane dim of mask block)"
    assert b_tile % 8 == 0, "b_tile must be a multiple of 8 (sublane dim of out block)"

    n_b = pl.cdiv(B, b_tile)
    n_s = pl.cdiv(S, s_tile)
    B_pad = n_b * b_tile
    S_pad = n_s * s_tile

    # Pad batch / sequence; zero mask on padded positions keeps pooling exact.
    ids_p = jnp.zeros((B_pad, S_pad), input_ids.dtype).at[:B, :S].set(input_ids)
    mask_p = jnp.zeros((B_pad, S_pad), jnp.float32).at[:B, :S].set(
        attention_mask.astype(jnp.float32))

    # Pre-scale mask by 1/token-count so the in-kernel accumulation is the mean.
    den = jnp.maximum(jnp.sum(mask_p, axis=1, keepdims=True), 1.0)
    mask_scaled = mask_p / den                                   # exact f32 divide

    # Embedding gather stays in plain JAX (data-dependent gather).
    # TODO(synk): move gather in-kernel (scalar-prefetch ids + DMA) to avoid the
    #             (B,S,D) HBM round-trip.
    emb = params["emb"][ids_p].astype(jnp.bfloat16)              # (B_pad, S_pad, D)

    # bf16 weights straight into the MXU; biases stay f32.
    w_enc = params["w_enc"].astype(jnp.bfloat16)
    b_enc = params["b_enc"].reshape(1, D).astype(jnp.float32)
    w_pad = jnp.zeros((D, C_PAD), jnp.bfloat16).at[:, :C].set(
        params["w_sent"].astype(jnp.bfloat16))
    b_pad = jnp.full((1, C_PAD), NEG_PAD, jnp.float32).at[:, :C].set(
        params["b_sent"].reshape(1, -1).astype(jnp.float32))

    # Explicit VMEM budget (double-buffered streamed tiles + resident weights),
    # clamped to [32 MiB, 48 MiB] so it is safe on v5e/v6e (128 MiB) and v7x
    # (64 MiB physical / 32 MiB scoped default).
    bytes_stream = (b_tile * s_tile * D * 2        # emb tile (bf16)
                    + b_tile * s_tile * 4          # mask tile (f32)
                    + b_tile * C_PAD * 4)          # out tile (f32)
    bytes_resident = (D * D * 2 + D * 4            # w_enc + b_enc
                      + D * C_PAD * 2 + C_PAD * 4)  # w_sent + b_sent
    bytes_scratch = b_tile * D * 4
    vmem_needed = 2 * bytes_stream + 2 * bytes_resident + bytes_scratch
    vmem_limit = int(min(max(2 * vmem_needed, 32 * 1024 * 1024),
                         48 * 1024 * 1024))

    out = pl.pallas_call(
        fused_sent_kernel,
        out_shape=jax.ShapeDtypeStruct((B_pad, C_PAD), jnp.float32),
        grid_spec=pltpu.PrefetchScalarGridSpec(
            num_scalar_prefetch=0,
            grid=(n_b, n_s),               # (batch tiles: parallel, seq tiles: reduction)
            in_specs=[
                pl.BlockSpec((b_tile, s_tile, D), lambda b, s: (b, s, 0)),  # emb
                pl.BlockSpec((b_tile, s_tile),    lambda b, s: (b, s)),     # mask
                pl.BlockSpec((D, D),       lambda b, s: (0, 0)),            # w_enc (resident)
                pl.BlockSpec((1, D),       lambda b, s: (0, 0)),            # b_enc (resident)
                pl.BlockSpec((D, C_PAD),   lambda b, s: (0, 0)),            # w_sent (resident)
                pl.BlockSpec((1, C_PAD),   lambda b, s: (0, 0)),            # b_sent (resident)
            ],
            out_specs=pl.BlockSpec((b_tile, C_PAD), lambda b, s: (b, 0)),
            scratch_shapes=[pltpu.VMEM((b_tile, D), jnp.float32)],          # acc
        ),
        compiler_params=pltpu.CompilerParams(
            dimension_semantics=("parallel", "arbitrary"),
            vmem_limit_bytes=vmem_limit,
        ),
    )(emb, mask_scaled, w_enc, b_enc, w_pad, b_pad)

    return out[:B, :C]


def reference_model(input_ids, attention_mask, params):
    """Pure-JAX reference of the same forward pass (for correctness checking)."""
    mask = attention_mask.astype(jnp.float32)
    emb = params["emb"][input_ids].astype(jnp.bfloat16).astype(jnp.float32)
    hid = jnp.tanh(emb @ params["w_enc"] + params["b_enc"])
    num = jnp.einsum("bs,bsd->bd", mask, hid)
    den = jnp.maximum(jnp.sum(mask, axis=1, keepdims=True), 1.0)
    pooled = num / den
    logits = pooled @ params["w_sent"] + params["b_sent"].reshape(1, -1)
    return jax.nn.softmax(logits, axis=-1)


if __name__ == "__main__":
    # Small shapes consistent with the module (batch, seq, d_model, classes).
    # S=600 -> 3 sequence tiles of 256 (exercises init/accumulate/finalize).
    B, S, D = 2, 600, 128
    NUM_SENT = 3
    VOCAB = 256

    key = jax.random.PRNGKey(0)
    k_emb, k_wenc, k_benc, k_ws, k_bs, k_ids = jax.random.split(key, 6)

    params = {
        "emb":    jax.random.normal(k_emb,  (VOCAB, D), jnp.float32) * 0.02,
        "w_enc":  jax.random.normal(k_wenc, (D, D),     jnp.float32) * 0.05,
        "b_enc":  jax.random.normal(k_benc, (D,),       jnp.float32) * 0.01,
        # ABSAHead.sent = nn.Linear(dim, num_cls); stored transposed [D, C].
        "w_sent": jax.random.normal(k_ws,   (D, NUM_SENT), jnp.float32) * 0.05,
        "b_sent": jax.random.normal(k_bs,   (1, NUM_SENT), jnp.float32) * 0.01,
    }

    input_ids = jax.random.randint(k_ids, (B, S), 0, VOCAB, dtype=jnp.int32)
    # attention mask: second example has 37 padded positions
    positions = jnp.arange(S)[None, :]
    lengths = jnp.array([[S], [S - 37]])
    attention_mask = (positions < lengths).astype(jnp.int32)

    probs = wrapped_sent_model(input_ids, attention_mask, params)
    probs = jax.block_until_ready(probs)

    ref = reference_model(input_ids, attention_mask, params)

    assert probs.shape == (B, NUM_SENT)
    # exact-divide softmax: rows sum to 1 up to f32 rounding
    assert bool(jnp.allclose(jnp.sum(probs, axis=-1), 1.0, atol=1e-4))
    # matches the pure-JAX reference (bf16 streamed inputs / bf16 MXU weights)
    assert bool(jnp.allclose(probs, ref, atol=5e-3, rtol=0.0))

    print("KERNEL_OK")
</pallas_src>

<mosaic_0001>
module attributes {stable_mosaic.version = 11 : i64} {
  func.func @fused_sent_kernel(%arg0: i32, %arg1: i32, %arg2: memref<8x256x128xbf16, #tpu.memory_space<vmem>>, %arg3: memref<8x256xf32, #tpu.memory_space<vmem>>, %arg4: memref<128x128xbf16, #tpu.memory_space<vmem>>, %arg5: memref<1x128xf32, #tpu.memory_space<vmem>>, %arg6: memref<128x128xbf16, #tpu.memory_space<vmem>>, %arg7: memref<1x128xf32, #tpu.memory_space<vmem>>, %arg8: memref<8x128xf32, #tpu.memory_space<vmem>>, %arg9: memref<8x128xf32, #tpu.memory_space<vmem>>) attributes {dimension_semantics = [#tpu.dimension_semantics<parallel>, #tpu.dimension_semantics<arbitrary>], iteration_bounds = array<i64: 1, 3>, scalar_prefetch = 0 : i64, scratch_operands = 1 : i64, tpu.core_type = #tpu.core_type<tc>, window_params = [{transform_indices = @transform_0, window_bounds = array<i64: 8, 256, 128>}, {transform_indices = @transform_1, window_bounds = array<i64: 8, 256>}, {pipeline_mode = #tpu.pipeline_mode<synchronous>, transform_indices = @transform_2, window_bounds = array<i64: 128, 128>}, {pipeline_mode = #tpu.pipeline_mode<synchronous>, transform_indices = @transform_3, window_bounds = array<i64: 1, 128>}, {pipeline_mode = #tpu.pipeline_mode<synchronous>, transform_indices = @transform_4, window_bounds = array<i64: 128, 128>}, {pipeline_mode = #tpu.pipeline_mode<synchronous>, transform_indices = @transform_5, window_bounds = array<i64: 1, 128>}, {transform_indices = @transform_6, window_bounds = array<i64: 8, 128>}]} {
    %c0_i32 = arith.constant 0 : i32
    %0 = arith.cmpi eq, %arg1, %c0_i32 : i32
    %1 = arith.extui %0 : i1 to i32
    %c0_i32_0 = arith.constant 0 : i32
    %2 = arith.cmpi ne, %1, %c0_i32_0 : i32
    scf.if %2 {
      %cst_18 = arith.constant 0.000000e+00 : f32
      %34 = vector.broadcast %cst_18 : f32 to vector<8x128xf32>
      %c0_19 = arith.constant 0 : index
      %c0_20 = arith.constant 0 : index
      %35 = vector.load %arg9[%c0_19, %c0_20] : memref<8x128xf32, #tpu.memory_space<vmem>>, vector<8x128xf32>
      tpu.vector_store %arg9[%c0_19, %c0_20], %34 {strides = array<i32>} : memref<8x128xf32, #tpu.memory_space<vmem>>, vector<8x128xf32>,
    } else {
    }
    %c0 = arith.constant 0 : index
    %c0_1 = arith.constant 0 : index
    %c0_2 = arith.constant 0 : index
    %3 = vector.load %arg2[%c0, %c0_1, %c0_2] : memref<8x256x128xbf16, #tpu.memory_space<vmem>>, vector<8x256x128xbf16>
    %4 = vector.shape_cast %3 : vector<8x256x128xbf16> to vector<2048x128xbf16>
    %c0_3 = arith.constant 0 : index
    %c0_4 = arith.constant 0 : index
    %5 = vector.load %arg4[%c0_3, %c0_4] : memref<128x128xbf16, #tpu.memory_space<vmem>>, vector<128x128xbf16>
    %cst = arith.constant dense<0.000000e+00> : vector<2048x128xf32>
    %6 = tpu.matmul %4, %5, %cst {dimension_numbers = #tpu.dot_dimension_numbers<[1], [0], [0], [1], [0, 0, 1, 1], [], []>} : vector<2048x128xbf16>, vector<128x128xbf16>, vector<2048x128xf32> -> vector<2048x128xf32>
    %c0_5 = arith.constant 0 : index
    %c0_6 = arith.constant 0 : index
    %7 = vector.load %arg5[%c0_5, %c0_6] : memref<1x128xf32, #tpu.memory_space<vmem>>, vector<1x128xf32>
    %8 = vector.broadcast %7 : vector<1x128xf32> to vector<2048x128xf32>
    %9 = arith.addf %6, %8 : vector<2048x128xf32>
    %10 = math.tanh %9 : vector<2048x128xf32>
    %c0_7 = arith.constant 0 : index
    %c0_8 = arith.constant 0 : index
    %11 = vector.load %arg3[%c0_7, %c0_8] : memref<8x256xf32, #tpu.memory_space<vmem>>, vector<8x256xf32>
    %12 = tpu.iota {dimensions = array<i32: 1>} : vector<8x2048xi32>
    %13 = tpu.iota {dimensions = array<i32: 0>} : vector<8x2048xi32>
    %c256_i32 = arith.constant 256 : i32
    %14 = vector.broadcast %c256_i32 : i32 to vector<8x2048xi32>
    %15 = arith.muli %13, %14 : vector<8x2048xi32>
    %16 = arith.subi %12, %15 : vector<8x2048xi32>
    %c0_i32_9 = arith.constant 0 : i32
    %17 = vector.broadcast %c0_i32_9 : i32 to vector<8x2048xi32>
    %18 = arith.cmpi sge, %16, %17 : vector<8x2048xi32>
    %c256_i32_10 = arith.constant 256 : i32
    %19 = vector.broadcast %c256_i32_10 : i32 to vector<8x2048xi32>
    %20 = arith.cmpi slt, %16, %19 : vector<8x2048xi32>
    %21 = arith.andi %18, %20 : vector<8x2048xi1>
    %22 = tpu.concatenate %11, %11, %11, %11, %11, %11, %11, %11 in 1 : vector<8x256xf32>, vector<8x256xf32>, vector<8x256xf32>, vector<8x256xf32>, vector<8x256xf32>, vector<8x256xf32>, vector<8x256xf32>, vector<8x256xf32> -> vector<8x2048xf32>
    %cst_11 = arith.constant 0.000000e+00 : f32
    %23 = vector.broadcast %cst_11 : f32 to vector<8x2048xf32>
    %24 = arith.select %21, %22, %23 : vector<8x2048xi1>, vector<8x2048xf32>
    %c0_12 = arith.constant 0 : index
    %c0_13 = arith.constant 0 : index
    %25 = vector.load %arg9[%c0_12, %c0_13] : memref<8x128xf32, #tpu.memory_space<vmem>>, vector<8x128xf32>
    %26 = arith.truncf %24 : vector<8x2048xf32> to vector<8x2048xbf16>
    %27 = arith.truncf %10 : vector<2048x128xf32> to vector<2048x128xbf16>
    %cst_14 = arith.constant dense<0.000000e+00> : vector<8x128xf32>
    %28 = tpu.matmul %26, %27, %cst_14 {dimension_numbers = #tpu.dot_dimension_numbers<[1], [0], [0], [1], [0, 0, 1, 1], [], []>} : vector<8x2048xbf16>, vector<2048x128xbf16>, vector<8x128xf32> -> vector<8x128xf32>
    %29 = arith.addf %25, %28 : vector<8x128xf32>
    %c0_15 = arith.constant 0 : index
    %c0_16 = arith.constant 0 : index
    %30 = vector.load %arg9[%c0_15, %c0_16] : memref<8x128xf32, #tpu.memory_space<vmem>>, vector<8x128xf32>
    tpu.vector_store %arg9[%c0_15, %c0_16], %29 {strides = array<i32>} : memref<8x128xf32, #tpu.memory_space<vmem>>, vector<8x128xf32>,
    %c2_i32 = arith.constant 2 : i32
    %31 = arith.cmpi eq, %arg1, %c2_i32 : i32
    %32 = arith.extui %31 : i1 to i32
    %c0_i32_17 = arith.constant 0 : i32
    %33 = arith.cmpi ne, %32, %c0_i32_17 : i32
    scf.if %33 {
      %c0_18 = arith.constant 0 : index
      %c0_19 = arith.constant 0 : index
      %34 = vector.load %arg9[%c0_18, %c0_19] : memref<8x128xf32, #tpu.memory_space<vmem>>, vector<8x128xf32>
      %35 = arith.truncf %34 : vector<8x128xf32> to vector<8x128xbf16>
      %c0_20 = arith.constant 0 : index
      %c0_21 = arith.constant 0 : index
      %36 = vector.load %arg6[%c0_20, %c0_21] : memref<128x128xbf16, #tpu.memory_space<vmem>>, vector<128x128xbf16>
      %cst_22 = arith.constant dense<0.000000e+00> : vector<8x128xf32>
      %37 = tpu.matmul %35, %36, %cst_22 {dimension_numbers = #tpu.dot_dimension_numbers<[1], [0], [0], [1], [0, 0, 1, 1], [], []>} : vector<8x128xbf16>, vector<128x128xbf16>, vector<8x128xf32> -> vector<8x128xf32>
      %c0_23 = arith.constant 0 : index
      %c0_24 = arith.constant 0 : index
      %38 = vector.load %arg7[%c0_23, %c0_24] : memref<1x128xf32, #tpu.memory_space<vmem>>, vector<1x128xf32>
      %39 = vector.broadcast %38 : vector<1x128xf32> to vector<8x128xf32>
      %40 = arith.addf %37, %39 : vector<8x128xf32>
      %cst_25 = arith.constant dense<0xFF800000> : vector<8xf32>
      %41 = vector.multi_reduction <maximumf>, %40, %cst_25 [1] : vector<8x128xf32> to vector<8xf32>
      %42 = vector.shape_cast %41 : vector<8xf32> to vector<8x1xf32>
      %43 = vector.broadcast %42 : vector<8x1xf32> to vector<8x128xf32>
      %44 = arith.subf %40, %43 : vector<8x128xf32>
      %45 = math.exp %44 : vector<8x128xf32>
      %cst_26 = arith.constant dense<0.000000e+00> : vector<8xf32>
      %46 = vector.multi_reduction <add>, %45, %cst_26 [1] : vector<8x128xf32> to vector<8xf32>
      %47 = vector.shape_cast %46 : vector<8xf32> to vector<8x1xf32>
      %48 = vector.broadcast %47 : vector<8x1xf32> to vector<8x128xf32>
      %49 = arith.divf %45, %48 : vector<8x128xf32>
      %c0_27 = arith.constant 0 : index
      %c0_28 = arith.constant 0 : index
      %50 = vector.load %arg8[%c0_27, %c0_28] : memref<8x128xf32, #tpu.memory_space<vmem>>, vector<8x128xf32>
      tpu.vector_store %arg8[%c0_27, %c0_28], %49 {strides = array<i32>} : memref<8x128xf32, #tpu.memory_space<vmem>>, vector<8x128xf32>,
    } else {
    }
    return
  }
  func.func @transform_0(%arg0: i32, %arg1: i32) -> (i32, i32, i32) {
    %c0_i32 = arith.constant 0 : i32
    %c0_i32_0 = arith.constant 0 : i32
    return %arg0, %arg1, %c0_i32 : i32, i32, i32
  }
  func.func @transform_1(%arg0: i32, %arg1: i32) -> (i32, i32) {
    %c0_i32 = arith.constant 0 : i32
    return %arg0, %arg1 : i32, i32
  }
  func.func @transform_2(%arg0: i32, %arg1: i32) -> (i32, i32) {
    %c0_i32 = arith.constant 0 : i32
    %c0_i32_0 = arith.constant 0 : i32
    %c0_i32_1 = arith.constant 0 : i32
    return %c0_i32, %c0_i32_0 : i32, i32
  }
  func.func @transform_3(%arg0: i32, %arg1: i32) -> (i32, i32) {
    %c0_i32 = arith.constant 0 : i32
    %c0_i32_0 = arith.constant 0 : i32
    %c0_i32_1 = arith.constant 0 : i32
    return %c0_i32, %c0_i32_0 : i32, i32
  }
  func.func @transform_4(%arg0: i32, %arg1: i32) -> (i32, i32) {
    %c0_i32 = arith.constant 0 : i32
    %c0_i32_0 = arith.constant 0 : i32
    %c0_i32_1 = arith.constant 0 : i32
    return %c0_i32, %c0_i32_0 : i32, i32
  }
  func.func @transform_5(%arg0: i32, %arg1: i32) -> (i32, i32) {
    %c0_i32 = arith.constant 0 : i32
    %c0_i32_0 = arith.constant 0 : i32
    %c0_i32_1 = arith.constant 0 : i32
    return %c0_i32, %c0_i32_0 : i32, i32
  }
  func.func @transform_6(%arg0: i32, %arg1: i32) -> (i32, i32) {
    %c0_i32 = arith.constant 0 : i32
    %c0_i32_0 = arith.constant 0 : i32
    return %arg0, %c0_i32 : i32, i32
  }
}

</mosaic_0001>

<bundles_post_ra>
// kernel: tpu_custom_call.1
= control target key start
LH: loop header
LB: loop body
LE: loop exit
PB: predicated region body
PF: predicated region fallthrough
CT: control target
= control target key end

     0   :  { %s7135_s0 = inlined_call_operand.hbm [shape: bf16[8,768,128], index: 0, kind: input, shape index: {}]   ;;  %s7136_s1 = inlined_call_operand.hbm [shape: f32[8,768], index: 1, kind: input, shape index: {}]   ;;  %s7137_s2 = inlined_call_operand.hbm [shape: bf16[128,128], index: 2, kind: input, shape index: {}]   ;;  %s7138_s3 = inlined_call_operand.hbm [shape: f32[1,128], index: 3, kind: input, shape index: {}]   ;;  %s7139_s4 = inlined_call_operand.hbm [shape: bf16[128,128], index: 4, kind: input, shape index: {}]   ;;  %s7140_s5 = inlined_call_operand.hbm [shape: f32[1,128], index: 5, kind: input, shape index: {}]   ;;  %s7141_s6 = inlined_call_operand.hbm [shape: f32[8,128], index: 6, kind: output, shape index: {}]  }
   0x1   :  { %7189 = sst [smem:[#allocation68_spill]] %s7138_s3 }
   0x2   :  { %7190 = sst [smem:[#allocation69_spill]] %s7141_s6 }
   0x3   :  { %11 = vsyncpa [#allocation4], 0 }
   0x4   :  { %13 = vsyncpa [#allocation4 + $0x1], 0 }
   0x5   :  { %14 = vsyncpa [#allocation7], 0 }
   0x6   :  { %16 = vsyncpa [#allocation7 + $0x1], 0 }
   0x7   :  { %17 = vsyncpa [#allocation10], 0 }
   0x8   :  { %18 = vsyncpa [#allocation13], 0 }
   0x9   :  { %19 = vsyncpa [#allocation5], 0  ;;  %s5574_s21 = smov 0   ;;  %s5576_s22 = smov 0  }
   0xa   :  { %s5578_s23 = smov 0   ;;  %s5580_s24 = smov 0  }
   0xb   :  { %s5582_s25 = smov 0   ;;  %s5584_s26 = smov 0  }
   0xc LB: > { %7191 = sst [smem:[#allocation24_spill]] %s5512_s24  ;;  %s5603_s27 = sadd.s32 4294967295, %s5520_s26   ;;  %s5520_s26 = sphi %s5584_s26, %s25_s26   ;;  %s5516_s25 = sphi %s5582_s25, %s7375_s25   ;;  %s5512_s24 = sphi %s5580_s24, %s7374_s24   ;;  %s5508_s23 = sphi %s5578_s23, %s7373_s23   ;;  %s5504_s22 = sphi %s5576_s22, %s7372_s22   ;;  %s5500_s21 = sphi %s5574_s21, %s7371_s21  }
   0xd   : > { %s34_s28 = sadd.s32 1, %s5516_s25  ;;  %s46_s29 = sadd.s32 1, %s5508_s23 }
   0xe   : > { %p35_p0 = scmp.ge.s32.totalorder %s34_s28, 3  ;;  %p53_p1 = scmp.ne.s32.totalorder %s5508_s23, %s5504_s22 }
   0xf   : > { %p54_p2 = scmp.eq.s32.totalorder %s5520_s26, 0  ;;  %p59_p4 = scmp.ne.s32.totalorder %s5504_s22, %s5500_s21 }
  0x10   : > { %s7377_s28 = smov (%p35_p0, %s34_s28), 0  ;;  %p7142_p5 = scmp.eq.s32.totalorder %s5603_s27, 0 }
  0x11   : > { %7192 = sst [smem:[#allocation25_spill]] %s7377_s28  ;;  %p5612_p3 = por %p54_p2, %p53_p1 }
  0x12   : > { %s42_s7 = ssub.s32 %s5516_s25, %s7377_s28  ;;  %p3652_p7 = scmp.ge.s32.totalorder %s5520_s26, 1 }
  0x13   : > { %s7193_s30 = scalar_select %p5612_p3, 1, 0 }
  0x14   : > { %p44_p6 = scmp.eq.s32.totalorder %s42_s7, 0  ;;  %p5623_p8 = por %p7142_p5, %p59_p4 }
  0x15   : > { %p208_p9 = scmp.lt.s32.totalorder %s5520_s26, 4  ;;  %s5522_s11 = smov [#allocation9]  }
  0x16   : > { %s7194_s8 = scalar_select %p5623_p8, 1, 0 }
  0x17   : > { %s5629_s9 = scalar_select %p44_p6, %s5508_s23, %s46_s29  }
  0x18   : > { %p5631_p10 = pnand %p3652_p7, %p208_p9  ;;  %s234_s12 = sshll.u32 %s5522_s11, 4  ;;  %s235_s12 = int_to_ptr.vmem [resolvable:$true] %s234_s12 }
  0x19   : > { %7195 = sst [smem:[#allocation26_spill]] %s5629_s9  ;;  %s5523_s14 = smov [#allocation8]  }
  0x1a   : > { %s7196_s10 = scalar_select %p5631_p10, 1, 0 }
  0x1b   : > { %p4535_p11 = pneg %p5631_p10  ;;  %s220_s15 = sshll.u32 %s5523_s14, 4  ;;  %s5643_s15 = int_to_ptr.vmem [resolvable:$true] %s220_s15 }
  0x1c   : > { %s7198_s3 = sld [smem:[#allocation68_spill]] }
  0x1d   : > { %p5639_p12 = pnand %p4535_p11, %p7142_p5 }
  0x1f   : > { %p5653_p0 = pneg %p5639_p12 }
  0x22   : > { %s5284_s18 = scalar_lea.hbm %s7198_s3, 16 }
  0x23   : > { %p5285_p13 = scmp.ne.s32.totalorder %s7198_s3, %s5284_s18  ;;  %p5291_p4 = scmp.lt.u32.totalorder %s5284_s18, %s7198_s3 }
  0x25   : > { %p5287_p1 = pnand %p5653_p0, %p5285_p13 }
  0x27   : > { %p5288_p2 = pneg %p5287_p1 }
  0x29   : > { %p5293_p6 = pnand %p5291_p4, %p5288_p2 }
  0x2b   : > { %5296 = shalt.err (!%p5293_p6)
}
  0x2c   : > { %s5297_s11 = scalar_lea.vmem %s235_s12, 16  ;;  %s5304_s14 = scalar_lea.vmem %s235_s12, 32 }
  0x2d   : > { %p5298_p7 = scmp.ne.s32.totalorder %s235_s12, %s5297_s11  ;;  %p5305_p5 = scmp.lt.s32.totalorder %s235_s12, %s235_s12 }
  0x2e   : > { %p5306_p8 = scmp.lt.s32.totalorder %s5304_s14, %s5297_s11 }
  0x2f   : > { %p5300_p9 = pnand %p5298_p7, %p5653_p0 }
  0x30   : > { %p5307_p10 = por %p5306_p8, %p5305_p5 }
  0x31   : > { %p5301_p11 = pneg %p5300_p9 }
  0x33   : > { %p5308_p3 = pnand %p5307_p10, %p5301_p11 }
  0x35   : > { %5311 = shalt.err (!%p5308_p3)
}
  0x36   : > { %4541 = dma.hbm_to_vmem [thread:$0]  (!%p5639_p12), %s7198_s3, 16, %s235_s12, [#allocation10]  }
  0x37   : > { %s5312_s20 = scalar_lea.hbm %s7137_s2, 1024 }
  0x38   : > { %p5313_p13 = scmp.ne.s32.totalorder %s7137_s2, %s5312_s20  ;;  %p5319_p3 = scmp.lt.u32.totalorder %s5312_s20, %s7137_s2 }
  0x3a   : > { %p5315_p1 = pnand %p5313_p13, %p5653_p0 }
  0x3c   : > { %p5316_p5 = pneg %p5315_p1 }
  0x3e   : > { %p5321_p8 = pnand %p5319_p3, %p5316_p5 }
  0x40   : > { %5324 = shalt.err (!%p5321_p8)
}
  0x41   : > { %s5325_s12 = scalar_lea.vmem %s5643_s15, 1024  ;;  %p5333_p6 = scmp.lt.s32.totalorder %s5643_s15, %s5643_s15 }
  0x42   : > { %p5326_p10 = scmp.ne.s32.totalorder %s5643_s15, %s5325_s12  ;;  %p5334_p7 = scmp.lt.s32.totalorder %s5325_s12, %s5325_s12 }
  0x44   : > { %p5328_p2 = pnand %p5326_p10, %p5653_p0  ;;  %p5335_p9 = por %p5334_p7, %p5333_p6 }
  0x46   : > { %p5329_p4 = pneg %p5328_p2 }
  0x48   : > { %p5336_p11 = pnand %p5335_p9, %p5329_p4 }
  0x4a   : > { %5339 = shalt.err (!%p5336_p11)
}
  0x4b   : > { %s5524_s16 = smov 64   ;;  %s5525_s17 = smov 4  }
  0x4c   : > { %4538 = dma.hbm_to_vmem [thread:$0]  (!%p5639_p12), %s7137_s2, 1024, %s5643_s15, [#allocation7], %s5524_s16, %s5524_s16, %s5525_s17  }
  0x4d   : > { %s5526_s20 = smov [#allocation11]   ;;  %s5527_s7 = smov [#allocation12]  }
  0x4e   : > { %s244_s29 = sshll.u32 %s5526_s20, 4  ;;  %s258_s11 = sshll.u32 %s5527_s7, 4  ;;  %s245_s29 = int_to_ptr.vmem [resolvable:$true] %s244_s29  ;;  %s259_s11 = int_to_ptr.vmem [resolvable:$true] %s258_s11 }
  0x4f   : > { %s5340_s3 = scalar_lea.hbm %s7139_s4, 1024 }
  0x50   : > { %p5341_p13 = scmp.ne.s32.totalorder %s7139_s4, %s5340_s3  ;;  %p5347_p3 = scmp.lt.u32.totalorder %s5340_s3, %s7139_s4 }
  0x52   : > { %p5343_p1 = pnand %p5341_p13, %p5653_p0 }
  0x54   : > { %p5344_p5 = pneg %p5343_p1 }
  0x56   : > { %p5349_p8 = pnand %p5347_p3, %p5344_p5 }
  0x58   : > { %5352 = shalt.err (!%p5349_p8)
}
  0x59   : > { %s5353_s15 = scalar_lea.vmem %s245_s29, 1024  ;;  %p5361_p6 = scmp.lt.s32.totalorder %s245_s29, %s245_s29 }
  0x5a   : > { %p5354_p10 = scmp.ne.s32.totalorder %s245_s29, %s5353_s15  ;;  %p5362_p7 = scmp.lt.s32.totalorder %s5353_s15, %s5353_s15 }
  0x5c   : > { %p5356_p2 = pnand %p5354_p10, %p5653_p0  ;;  %p5363_p9 = por %p5362_p7, %p5361_p6 }
  0x5e   : > { %p5357_p4 = pneg %p5356_p2 }
  0x60   : > { %p5364_p11 = pnand %p5363_p9, %p5357_p4 }
  0x62   : > { %5367 = shalt.err (!%p5364_p11)
}
  0x63   : > { %4544 = dma.hbm_to_vmem [thread:$0]  (!%p5639_p12), %s7139_s4, 1024, %s245_s29, [#allocation10], %s5524_s16, %s5524_s16, %s5525_s17  }
  0x64   : > { %s5368_s24 = scalar_lea.hbm %s7140_s5, 16 }
  0x65   : > { %p5369_p13 = scmp.ne.s32.totalorder %s7140_s5, %s5368_s24  ;;  %p5375_p3 = scmp.lt.u32.totalorder %s5368_s24, %s7140_s5 }
  0x67   : > { %p5371_p1 = pnand %p5369_p13, %p5653_p0 }
  0x69   : > { %p5372_p5 = pneg %p5371_p1 }
  0x6b   : > { %p5377_p8 = pnand %p5375_p3, %p5372_p5 }
  0x6d   : > { %5380 = shalt.err (!%p5377_p8)
}
  0x6e   : > { %s5381_s14 = scalar_lea.vmem %s259_s11, 16  ;;  %s5388_s16 = scalar_lea.vmem %s259_s11, 32 }
  0x6f   : > { %p5382_p10 = scmp.ne.s32.totalorder %s259_s11, %s5381_s14  ;;  %p5389_p6 = scmp.lt.s32.totalorder %s259_s11, %s259_s11 }
  0x70   : > { %p5390_p7 = scmp.lt.s32.totalorder %s5388_s16, %s5381_s14 }
  0x71   : > { %p5384_p2 = pnand %p5382_p10, %p5653_p0 }
  0x72   : > { %p5391_p9 = por %p5390_p7, %p5389_p6 }
  0x73   : > { %p5385_p4 = pneg %p5384_p2 }
  0x75   : > { %p5392_p11 = pnand %p5391_p9, %p5385_p4 }
  0x77   : > { %5395 = shalt.err (!%p5392_p11)
}
  0x78   : > { %4547 = dma.hbm_to_vmem [thread:$0]  (!%p5639_p12), %s7140_s5, 16, %s259_s11, [#allocation13]  }
  0x79   : > { %p3657_p13 = scmp.ge.s32.totalorder %s5520_s26, 3 }
  0x7b   : > { %265 = sbr.rel (%p3657_p13) target bundleno = 169 (0xa9), region = 32 }
  0x82   : > { %s269_s21 = sand.u32 1, %s5508_s23   ;;  %s3873_s12 = sshll.u32 %s5516_s25, 11 }
  0x83   : > { %s3658_s15 = sshll.u32 %s269_s21, 10  ;;  %s282_s9 = scalar_lea.hbm %s7135_s0, %s3873_s12 }
  0x84   : > { %p7200_p0 = scmp.ne.s32.totalorder %s7193_s30, 0  ;;  %s273_s3 = scalar_lea.vmem [#allocation3], %s3658_s15 }
  0x85   : > { %s295_s6 = sshll.u32 %s273_s3, 4  ;;  %s5528_s18 = smov 6144   ;;  %s296_s6 = int_to_ptr.vmem [resolvable:$true] %s295_s6 }
  0x86   : > { %s4512_s11 = scalar_select %p7200_p0, [#allocation0], [#allocation17] }
  0x87   : > { %4513 = sst [smem:[#allocation16]] (%p7200_p0), %s5528_s18  ;;  %s5529_s19 = smov 2048  }
  0x88   : > { %s287_s24 = sld [smem:[%s4512_s11]]   ;;  %s5530_s20 = smov 32  }
  0x89   : > { %4514 = sst [smem:[#allocation16 + $0x1]] (%p7200_p0), %s5529_s19  ;;  %s5531_s7 = smov 64  }
  0x8a   : > { %4515 = sst [smem:[#allocation16 + $0x2]] (%p7200_p0), %s5530_s20  ;;  %s5532_s16 = smov 4  }
  0x8b   : > { %4516 = sst [smem:[#allocation16 + $0x3]] (%p7200_p0), %s5531_s7  ;;  %s270_s29 = scalar_lea.sflag [#allocation4], %s269_s21 }
  0x8c   : > { %4517 = sst [smem:[#allocation16 + $0x4]] (%p7200_p0), %s5531_s7  ;;  %s5533_s12 = smov [#allocation15]  }
  0x8d   : > { %4518 = sst [smem:[#allocation16 + $0x5]] (%p7200_p0), %s5532_s16  ;;  %s318_s15 = sand.u32 1, %s5520_s26  }
  0x8e   : > { %s3661_s14 = sshll.u32 %s287_s24, 26  ;;  %s3663_s28 = sshll.u32 %s269_s21, 4 }
  0x8f   : > { %s3662_s17 = sadd.s32 134217728, %s3661_s14  ;;  %s3874_s13 = sshll.u32 %s5516_s25, 8 }
  0x90   : > { %4519 = dma.general (%p7200_p0), %s282_s9, 16384, %s296_s6, %s270_s29, %s5533_s12, [#allocation16], %s3662_s17, 0  }
  0x91   : > { %s322_s11 = scalar_lea.vmem [#allocation6], %s3663_s28  ;;  %s5755_s24 = scalar_lea.hbm %s7136_s1, %s3874_s13 }
  0x92   : > { %s332_s3 = sshll.u32 %s322_s11, 4  ;;  %s319_s20 = scalar_lea.sflag [#allocation7], %s318_s15  ;;  %s333_s3 = int_to_ptr.vmem [resolvable:$true] %s332_s3 }
  0x93   : > { %s5396_s9 = scalar_lea.hbm %s5755_s24, 256  ;;  %s5400_s7 = scalar_lea.hbm %s7136_s1, 768 }
  0x94   : > { %p5397_p12 = scmp.ne.s32.totalorder %s5755_s24, %s5396_s9  ;;  %p5401_p3 = scmp.lt.u32.totalorder %s5755_s24, %s7136_s1 }
  0x95   : > { %p5402_p8 = scmp.lt.u32.totalorder %s5400_s7, %s5396_s9  ;;  %p5404_p2 = scmp.lt.u32.totalorder %s5396_s9, %s5755_s24 }
  0x96   : > { %p5398_p1 = pnand %p5397_p12, %p7200_p0 }
  0x97   : > { %p5403_p10 = por %p5402_p8, %p5401_p3 }
  0x98   : > { %p5399_p5 = pneg %p5398_p1 }
  0x99   : > { %p5405_p4 = por %p5404_p2, %p5403_p10 }
  0x9b   : > { %p5406_p6 = pnand %p5405_p4, %p5399_p5 }
  0x9d   : > { %5409 = shalt.err (!%p5406_p6)
}
  0x9e   : > { %s5410_s17 = scalar_lea.vmem %s333_s3, 256  ;;  %s5534_s29 = smov [#allocation6]  }
  0x9f   : > { %p5411_p7 = scmp.ne.s32.totalorder %s333_s3, %s5410_s17  ;;  %s5414_s12 = sshll.u32 %s5534_s29, 4  ;;  %s5415_s12 = int_to_ptr.vmem [resolvable:$false] %s5414_s12 }
  0xa0   : > { %s5416_s15 = scalar_lea.vmem %s5415_s12, 512  ;;  %p5417_p13 = scmp.lt.s32.totalorder %s333_s3, %s5415_s12 }
  0xa1   : > { %p5412_p9 = pnand %p5411_p7, %p7200_p0  ;;  %p5418_p12 = scmp.lt.s32.totalorder %s5416_s15, %s5410_s17 }
  0xa3   : > { %p5413_p11 = pneg %p5412_p9  ;;  %p5419_p1 = por %p5418_p12, %p5417_p13 }
  0xa5   : > { %p5420_p3 = pnand %p5419_p1, %p5413_p11 }
  0xa7   : > { %5423 = shalt.err (!%p5420_p3)
}
  0xa8   : > { %4520 = dma.hbm_to_vmem [thread:$0]  (%p7200_p0), %s5755_s24, 256, %s333_s3, %s319_s20  }
  0xa9 PF: > { %p7201_p5 = scmp.ne.s32.totalorder %s7196_s10, 0 }
  0xab   : > { %341 = sbr.rel (%p7201_p5) target bundleno = 1707 (0x6ab), region = 44 }
  0xb2   : > { %s343_s28 = sand.u32 1, %s5504_s22   ;;  %p7202_p8 = scmp.ne.s32.totalorder %s7194_s8, 0 }
  0xb3   : > { %s3667_s13 = sshll.u32 %s343_s28, 10  ;;  %s344_s11 = scalar_lea.sflag [#allocation4], %s343_s28 }
  0xb4   : > { %s5777_s18 = scalar_lea.vmem [#allocation3], %s3667_s13 }
  0xb5   : > { %5475 = dma.done.wait (%p7202_p8), %s344_s11, 16384  }
  0xb6   : > { %5477 = vsyncadd (%p7202_p8), %s344_s11, 4294950912  ;;  %s352_s30 = sand.u32 1, %s5603_s27   ;;  %s3668_s3 = sshll.u32 %s343_s28, 4 }
  0xb7   : > { %s353_s19 = scalar_lea.sflag [#allocation7], %s352_s30  ;;  %s5784_s24 = scalar_lea.vmem [#allocation6], %s3668_s3 }
  0xb8   : > { %5479 = dma.done.wait (%p7202_p8), %s353_s19, 256  }
  0xb9   : > { %5481 = vsyncadd (%p7202_p8), %s353_s19, 4294967040  ;;  %p7203_p0 = scmp.eq.s32.totalorder %s5603_s27, 0 }
  0xbb   : > { %5483 = dma.done.wait (%p7203_p0), [#allocation7], 1024   ;;  %p7204_p10 = pmov %p7203_p0 }
  0xbc   : > { %p7205_p2 = pmov %p7203_p0 }
  0xbd   : > { %5485 = vsyncadd (%p7204_p10), [#allocation7], 4294966272 }
  0xbe   : > { %5487 = dma.done.wait (%p7205_p2), [#allocation10], 1040   ;;  %p7206_p4 = pmov %p7203_p0 }
  0xbf   : > { %p7207_p6 = pmov %p7203_p0 }
  0xc0   : > { %5489 = vsyncadd (%p7206_p4), [#allocation10], 4294966256 }
  0xc1   : > { %5491 = dma.done.wait (%p7207_p6), [#allocation13], 16   ;;  %p7208_p7 = pmov %p7203_p0 }
  0xc2   : > { %s7209_s8 = sld [smem:[#allocation24_spill]] }
  0xc3   : > { %5493 = vsyncadd (%p7208_p7), [#allocation13], 4294967280 }
  0xc8   : > { %p3673_p9 = scmp.ne.s32.totalorder %s7209_s8, 0 }
  0xc9   : > { %v5535_v0 = vmov (!%p3673_p9), 0.0  }
  0xca   : > { %408 = sbr.rel (%p3673_p9) target bundleno = 209 (0xd1), region = 72  ;;  %409 = vst [vmem:[#allocation2] sm:$0xff] (!%p3673_p9), %v5535_v0 }
  0xd1 PF: > { %v4622_v1 = vld [vmem:[#allocation8] sm:$0xff]   ;;  %v4623_v2 = vld [vmem:[#allocation8 + $0x8] sm:$0xff]   ;;  %v4624_v3 = vld [vmem:[#allocation8 + $0x10] sm:$0xff]   ;;  %s7367_s10 = sld [smem:[#allocation24_spill]] }
  0xd2   : > { %4196 = vmatprep.subr.bf16.mxu0 %v4622_v1  ;;  %4488 = vmatprep.subr.bf16.mxu1 %v4622_v1  ;;  %v4625_v4 = vld [vmem:[#allocation8 + $0x18] sm:$0xff]   ;;  %v4630_v5 = vld [vmem:[%s5777_s18] sm:$0xff]   ;;  %v4627_v7 = vld [vmem:[#allocation8 + $0x28] sm:$0xff]  }
  0xd3   : > { %4197 = vmatpush3.bf16.msra.mxu0 %v4622_v1  ;;  %4496 = vmatpush3.bf16.msra.mxu1 %v4622_v1  ;;  %v4626_v6 = vld [vmem:[#allocation8 + $0x20] sm:$0xff]   ;;  %v4628_v8 = vld [vmem:[#allocation8 + $0x30] sm:$0xff]   ;;  %v4629_v9 = vld [vmem:[#allocation8 + $0x38] sm:$0xff]  }
  0xd4   : > { %4198 = vmatprep.subr.bf16.mxu0 %v4623_v2  ;;  %4489 = vmatprep.subr.bf16.mxu1 %v4623_v2  ;;  %v4631_v10 = vld [vmem:[%s5777_s18 + $0x8] sm:$0xff]   ;;  %v4632_v11 = vld [vmem:[%s5777_s18 + $0x10] sm:$0xff]   ;;  %v4633_v12 = vld [vmem:[%s5777_s18 + $0x18] sm:$0xff]  }
  0xd5   : > { %4212 = vmatprep.mubr.bf16.mxu0 %v4630_v5  ;;  %v4634_v13 = vld [vmem:[%s5777_s18 + $0x20] sm:$0xff]   ;;  %v4635_v14 = vld [vmem:[%s5777_s18 + $0x28] sm:$0xff]   ;;  %v4636_v15 = vld [vmem:[%s5777_s18 + $0x30] sm:$0xff]  }
  0xd6   : > { %v4637_v16 = vld [vmem:[%s5777_s18 + $0x38] sm:$0xff]   ;;  %v4638_v17 = vld [vmem:[%s5777_s18 + $0x40] sm:$0xff]   ;;  %v4639_v18 = vld [vmem:[%s5777_s18 + $0x48] sm:$0xff]  }
  0xd7   : > { %4199 = vmatpush3.bf16.msra.mxu0 %v4623_v2  ;;  %4497 = vmatpush3.bf16.msra.mxu1 %v4623_v2  ;;  %v4640_v19 = vld [vmem:[%s5777_s18 + $0x50] sm:$0xff]   ;;  %v4641_v20 = vld [vmem:[%s5777_s18 + $0x58] sm:$0xff]   ;;  %v4642_v21 = vld [vmem:[%s5777_s18 + $0x60] sm:$0xff]   ;;  %p3859_p11 = scmp.ne.s32.totalorder %s7367_s10, 2 }
  0xd8   : > { %4200 = vmatprep.subr.bf16.mxu0 %v4624_v3  ;;  %4490 = vmatprep.subr.bf16.mxu1 %v4624_v3  ;;  %v4643_v22 = vld [vmem:[%s5777_s18 + $0x68] sm:$0xff]   ;;  %v4644_v23 = vld [vmem:[%s5777_s18 + $0x70] sm:$0xff]   ;;  %v4645_v24 = vld [vmem:[%s5777_s18 + $0x78] sm:$0xff]  }
  0xd9   : > { %v4646_v25 = vld [vmem:[%s5777_s18 + $0x80] sm:$0xff]   ;;  %v4678_v26 = vld [vmem:[%s5777_s18 + $0x2f0] sm:$0xff]   ;;  %v4680_v27 = vld [vmem:[%s5777_s18 + $0x2f8] sm:$0xff]  }
  0xda   : > { %v4647_v28 = vld [vmem:[%s5777_s18 + $0x88] sm:$0xff]   ;;  %4400 = vmatprep.mubr.bf16.mxu1 %v4678_v26  ;;  %v4648_v29 = vld [vmem:[%s5777_s18 + $0x90] sm:$0xff]   ;;  %v4682_v30 = vld [vmem:[%s5777_s18 + $0x300] sm:$0xff]   ;;  %v2820_v26 = vlaneseq }
  0xdb   : > { %4201 = vmatpush3.bf16.msra.mxu0 %v4624_v3  ;;  %4498 = vmatpush3.bf16.msra.mxu1 %v4624_v3  ;;  %v4684_v31 = vld [vmem:[%s5777_s18 + $0x308] sm:$0xff]   ;;  %v4649_v32 = vld [vmem:[%s5777_s18 + $0x98] sm:$0xff]   ;;  %v4650_v33 = vld [vmem:[%s5777_s18 + $0xa0] sm:$0xff]  }
  0xdc   : > { %4202 = vmatprep.subr.bf16.mxu0 %v4625_v4  ;;  %4491 = vmatprep.subr.bf16.mxu1 %v4625_v4  ;;  %v4686_v34 = vld [vmem:[%s5777_s18 + $0x310] sm:$0xff]   ;;  %v4688_v35 = vld [vmem:[%s5777_s18 + $0x318] sm:$0xff]   ;;  %v4651_v36 = vld [vmem:[%s5777_s18 + $0xa8] sm:$0xff]  }
  0xdd   : > { %v4652_v37 = vld [vmem:[%s5777_s18 + $0xb0] sm:$0xff]   ;;  %v4653_v38 = vld [vmem:[%s5777_s18 + $0xb8] sm:$0xff]   ;;  %v4690_v39 = vld [vmem:[%s5777_s18 + $0x320] sm:$0xff]  }
  0xde   : > { %v4654_v40 = vld [vmem:[%s5777_s18 + $0xc0] sm:$0xff]   ;;  %v4692_v41 = vld [vmem:[%s5777_s18 + $0x328] sm:$0xff]   ;;  %v4694_v43 = vld [vmem:[%s5777_s18 + $0x330] sm:$0xff]  }
  0xdf   : > { %4203 = vmatpush3.bf16.msra.mxu0 %v4625_v4  ;;  %4499 = vmatpush3.bf16.msra.mxu1 %v4625_v4  ;;  %v4655_v42 = vld [vmem:[%s5777_s18 + $0xc8] sm:$0xff]   ;;  %v4656_v44 = vld [vmem:[%s5777_s18 + $0xd0] sm:$0xff]   ;;  %v4696_v45 = vld [vmem:[%s5777_s18 + $0x338] sm:$0xff]  }
  0xe0   : > { %4204 = vmatprep.subr.bf16.mxu0 %v4626_v6  ;;  %4492 = vmatprep.subr.bf16.mxu1 %v4626_v6  ;;  %v4657_v46 = vld [vmem:[%s5777_s18 + $0xd8] sm:$0xff]   ;;  %v4698_v47 = vld [vmem:[%s5777_s18 + $0x340] sm:$0xff]   ;;  %v4700_v49 = vld [vmem:[%s5777_s18 + $0x348] sm:$0xff]  }
  0xe1   : > { %v4658_v48 = vld [vmem:[%s5777_s18 + $0xe0] sm:$0xff]   ;;  %v4659_v50 = vld [vmem:[%s5777_s18 + $0xe8] sm:$0xff]   ;;  %v4702_v51 = vld [vmem:[%s5777_s18 + $0x350] sm:$0xff]  }
  0xe2   : > { %v4660_v52 = vld [vmem:[%s5777_s18 + $0xf0] sm:$0xff]   ;;  %v4704_v53 = vld [vmem:[%s5777_s18 + $0x358] sm:$0xff]   ;;  %v4706_v55 = vld [vmem:[%s5777_s18 + $0x360] sm:$0xff]  }
  0xe3   : > { %4205 = vmatpush3.bf16.msra.mxu0 %v4626_v6  ;;  %4500 = vmatpush3.bf16.msra.mxu1 %v4626_v6  ;;  %v4661_v54 = vld [vmem:[%s5777_s18 + $0xf8] sm:$0xff]   ;;  %v4662_v56 = vld [vmem:[%s5777_s18 + $0x100] sm:$0xff]   ;;  %v4708_v57 = vld [vmem:[%s5777_s18 + $0x368] sm:$0xff]  }
  0xe4   : > { %4206 = vmatprep.subr.bf16.mxu0 %v4627_v7  ;;  %4493 = vmatprep.subr.bf16.mxu1 %v4627_v7  ;;  %v4663_v58 = vld [vmem:[%s5777_s18 + $0x108] sm:$0xff]   ;;  %v4710_v59 = vld [vmem:[%s5777_s18 + $0x370] sm:$0xff]   ;;  %v4712_v61 = vld [vmem:[%s5777_s18 + $0x378] sm:$0xff]  }
  0xe5   : > { %v4664_v60 = vld [vmem:[%s5777_s18 + $0x110] sm:$0xff]   ;;  %v4665_v62 = vld [vmem:[%s5777_s18 + $0x118] sm:$0xff]   ;;  %v4714_v63 = vld [vmem:[%s5777_s18 + $0x380] sm:$0xff]  }
  0xe6   : > { %v4666_v0 = vld [vmem:[%s5777_s18 + $0x120] sm:$0xff]   ;;  %v4716_v1 = vld [vmem:[%s5777_s18 + $0x388] sm:$0xff]   ;;  %v4718_v3 = vld [vmem:[%s5777_s18 + $0x390] sm:$0xff]  }
  0xe7   : > { %4207 = vmatpush3.bf16.msra.mxu0 %v4627_v7  ;;  %4501 = vmatpush3.bf16.msra.mxu1 %v4627_v7  ;;  %v4667_v2 = vld [vmem:[%s5777_s18 + $0x128] sm:$0xff]   ;;  %v4668_v4 = vld [vmem:[%s5777_s18 + $0x130] sm:$0xff]   ;;  %v4720_v5 = vld [vmem:[%s5777_s18 + $0x398] sm:$0xff]  }
  0xe8   : > { %4208 = vmatprep.subr.bf16.mxu0 %v4628_v8  ;;  %4494 = vmatprep.subr.bf16.mxu1 %v4628_v8  ;;  %v4669_v6 = vld [vmem:[%s5777_s18 + $0x138] sm:$0xff]   ;;  %v4722_v7 = vld [vmem:[%s5777_s18 + $0x3a0] sm:$0xff]  }
  0xeb   : > { %4209 = vmatpush3.bf16.msra.mxu0 %v4628_v8  ;;  %4502 = vmatpush3.bf16.msra.mxu1 %v4628_v8  ;;  %v4670_v8 = vld [vmem:[%s5777_s18 + $0x140] sm:$0xff]  }
  0xec   : > { %4210 = vmatprep.subr.bf16.mxu0 %v4629_v9  ;;  %4495 = vmatprep.subr.bf16.mxu1 %v4629_v9 }
  0xef   : > { %4211 = vmatpush3.bf16.msra.mxu0 %v4629_v9  ;;  %4503 = vmatpush3.bf16.msra.mxu1 %v4629_v9  ;;  %v4724_v9 = vld [vmem:[%s5777_s18 + $0x3a8] sm:$0xff]  }
  0xf2   : > { %4213 = vmatmul.mubr.bf16.vlgmr.msra.gmra.mrb[0].mxu0 %v4631_v10  ;;  %4401 = vmatmul.mubr.bf16.vlgmr.msra.gmra.mrb[0].mxu1 %v4680_v27  ;;  %v4671_v10 = vld [vmem:[%s5777_s18 + $0x148] sm:$0xff]  }
  0xf3   : > { %4216 = vmatprep.mubr.bf16.mxu0 %v4632_v11  ;;  %4404 = vmatprep.mubr.bf16.mxu1 %v4682_v30  ;;  %v4726_v11 = vld [vmem:[%s5777_s18 + $0x3b0] sm:$0xff]   ;;  %v4681_v27 = vld [vmem:[%s5777_s18 + $0x188] sm:$0xff]   ;;  %v4744_v30 = vld [vmem:[%s5777_s18 + $0x3f8] sm:$0xff]  }
  0xfa   : > { %4217 = vmatmul.mubr.bf16.gmra.mrb[4].mxu0 %v4633_v12  ;;  %4405 = vmatmul.mubr.bf16.gmra.mrb[4].mxu1 %v4684_v31  ;;  %v4672_v12 = vld [vmem:[%s5777_s18 + $0x150] sm:$0xff]   ;;  %v5888_v31 = vand.u32 127, %v2820_v26 }
  0xfb   : > { %4220 = vmatprep.mubr.bf16.mxu0 %v4634_v13  ;;  %4408 = vmatprep.mubr.bf16.mxu1 %v4686_v34  ;;  %v4728_v13 = vld [vmem:[%s5777_s18 + $0x3b8] sm:$0xff]  }
 0x102   : > { %4221 = vmatmul.mubr.bf16.gmra.mrb[8].mxu0 %v4635_v14  ;;  %4409 = vmatmul.mubr.bf16.gmra.mrb[8].mxu1 %v4688_v35  ;;  %v4673_v14 = vld [vmem:[%s5777_s18 + $0x158] sm:$0xff]  }
 0x103   : > { %4224 = vmatprep.mubr.bf16.mxu0 %v4636_v15  ;;  %4412 = vmatprep.mubr.bf16.mxu1 %v4690_v39  ;;  %v4730_v15 = vld [vmem:[%s5777_s18 + $0x3c0] sm:$0xff]  }
 0x104   : > { %v4687_v39 = vld [vmem:[%s5777_s18 + $0x1a0] sm:$0xff]  }
 0x10a   : > { %4225 = vmatmul.mubr.bf16.gmra.mrb[12].mxu0 %v4637_v16  ;;  %4413 = vmatmul.mubr.bf16.gmra.mrb[12].mxu1 %v4692_v41  ;;  %v4674_v16 = vld [vmem:[%s5777_s18 + $0x160] sm:$0xff]   ;;  %v4691_v41 = vld [vmem:[%s5777_s18 + $0x1b0] sm:$0xff]  }
 0x10b   : > { %4228 = vmatprep.mubr.bf16.mxu0 %v4638_v17  ;;  %4416 = vmatprep.mubr.bf16.mxu1 %v4694_v43  ;;  %v4732_v17 = vld [vmem:[%s5777_s18 + $0x3c8] sm:$0xff]  }
 0x112   : > { %4229 = vmatmul.mubr.bf16.gmra.mrb[16].mxu0 %v4639_v18  ;;  %4417 = vmatmul.mubr.bf16.gmra.mrb[16].mxu1 %v4696_v45  ;;  %v4675_v18 = vld [vmem:[%s5777_s18 + $0x168] sm:$0xff]  }
 0x113   : > { %4232 = vmatprep.mubr.bf16.mxu0 %v4640_v19  ;;  %4420 = vmatprep.mubr.bf16.mxu1 %v4698_v47  ;;  %v4734_v19 = vld [vmem:[%s5777_s18 + $0x3d0] sm:$0xff]  }
 0x11a   : > { %4233 = vmatmul.mubr.bf16.gmra.mrb[20].mxu0 %v4641_v20  ;;  %4421 = vmatmul.mubr.bf16.gmra.mrb[20].mxu1 %v4700_v49  ;;  %v4676_v20 = vld [vmem:[%s5777_s18 + $0x170] sm:$0xff]   ;;  %v4695_v49 = vld [vmem:[%s5777_s18 + $0x1c0] sm:$0xff]  }
 0x11b   : > { %4236 = vmatprep.mubr.bf16.mxu0 %v4642_v21  ;;  %4424 = vmatprep.mubr.bf16.mxu1 %v4702_v51  ;;  %v4736_v21 = vld [vmem:[%s5777_s18 + $0x3d8] sm:$0xff]  }
 0x122   : > { %4237 = vmatmul.mubr.bf16.gmra.mrb[24].mxu0 %v4643_v22  ;;  %4425 = vmatmul.mubr.bf16.gmra.mrb[24].mxu1 %v4704_v53  ;;  %v4677_v22 = vld [vmem:[%s5777_s18 + $0x178] sm:$0xff]  }
 0x123   : > { %4240 = vmatprep.mubr.bf16.mxu0 %v4644_v23  ;;  %4428 = vmatprep.mubr.bf16.mxu1 %v4706_v55  ;;  %v4738_v23 = vld [vmem:[%s5777_s18 + $0x3e0] sm:$0xff]  }
 0x12a   : > { %4241 = vmatmul.mubr.bf16.gmra.mrb[28].mxu0 %v4645_v24  ;;  %4429 = vmatmul.mubr.bf16.gmra.mrb[28].mxu1 %v4708_v57  ;;  %v4679_v24 = vld [vmem:[%s5777_s18 + $0x180] sm:$0xff]  }
 0x12b   : > { %4244 = vmatprep.mubr.bf16.mxu0 %v4646_v25  ;;  %4432 = vmatprep.mubr.bf16.mxu1 %v4710_v59  ;;  %v4740_v25 = vld [vmem:[%s5777_s18 + $0x3e8] sm:$0xff]   ;;  %v4699_v59 = vld [vmem:[%s5777_s18 + $0x1d0] sm:$0xff]  }
 0x132   : > { %4245 = vmatmul.mubr.bf16.gmra.mrb[32].mxu0 %v4647_v28  ;;  %4433 = vmatmul.mubr.bf16.gmra.mrb[32].mxu1 %v4712_v61  ;;  %v4742_v28 = vld [vmem:[%s5777_s18 + $0x3f0] sm:$0xff]  }
 0x133   : > { %4248 = vmatprep.mubr.bf16.mxu0 %v4648_v29  ;;  %4436 = vmatprep.mubr.bf16.mxu1 %v4714_v63  ;;  %v4683_v29 = vld [vmem:[%s5777_s18 + $0x190] sm:$0xff]  }
 0x13a   : > { %4249 = vmatmul.mubr.bf16.gmra.mrb[36].mxu0 %v4649_v32  ;;  %4437 = vmatmul.mubr.bf16.gmra.mrb[36].mxu1 %v4716_v1  ;;  %v2838_v32 = vshrl.u32 %v2820_v26, 7 }
 0x13b   : > { %4252 = vmatprep.mubr.bf16.mxu0 %v4650_v33  ;;  %4440 = vmatprep.mubr.bf16.mxu1 %v4718_v3  ;;  %v2822_v33 = vadd.s32 128, %v5888_v31 }
 0x13c   : > { %v5891_v34 = vmul.u32 256, %v2838_v32 }
 0x13e   : > { %v2841_v35 = vsub.s32 %v2822_v33, %v5891_v34 }
 0x140   : > { %vm2857_vm0 = vcmp.ge.s32.totalorder %v2841_v35, 0  ;;  %vm2873_vm1 = vcmp.lt.s32.totalorder %v2841_v35, 256 }
 0x141   : > { %vm2889_vm2 = vmand %vm2857_vm0, %vm2873_vm1 }
 0x142   : > { %4253 = vmatmul.mubr.bf16.gmra.mrb[40].mxu0 %v4651_v36  ;;  %4441 = vmatmul.mubr.bf16.gmra.mrb[40].mxu1 %v4720_v5  ;;  %v2819_v36 = vld [vmem:[%s5784_s24 + $0x8] sm:$0xff]  ;;  %vm3811_vm3 = vmpackc.low %vm2889_vm2, %vm2889_vm2 }
 0x143   : > { %4256 = vmatprep.mubr.bf16.mxu0 %v4652_v37  ;;  %4444 = vmatprep.mubr.bf16.mxu1 %v4722_v7  ;;  %v4685_v37 = vld [vmem:[%s5777_s18 + $0x198] sm:$0xff]  }
 0x144   : > { %v4701_v7 = vld [vmem:[%s5777_s18 + $0x1d8] sm:$0xff]  }
 0x14a   : > { %4257 = vmatmul.mubr.bf16.gmra.mrb[44].mxu0 %v4653_v38  ;;  %4445 = vmatmul.mubr.bf16.gmra.mrb[44].mxu1 %v4724_v9  ;;  %v5896_v38 = vpack.c.bf16 %v2819_v36, %v2819_v36 }
 0x14b   : > { %4260 = vmatprep.mubr.bf16.mxu0 %v4654_v40  ;;  %4448 = vmatprep.mubr.bf16.mxu1 %v4726_v11  ;;  %v4689_v40 = vld [vmem:[%s5777_s18 + $0x1a8] sm:$0xff]   ;;  %v4703_v11 = vld [vmem:[%s5777_s18 + $0x1e0] sm:$0xff]  }
 0x152   : > { %4261 = vmatmul.mubr.bf16.gmra.mrb[48].mxu0 %v4655_v42  ;;  %4449 = vmatmul.mubr.bf16.gmra.mrb[48].mxu1 %v4728_v13  ;;  %v5902_v42 = vld [vmem:[#allocation9] ss:$0 sm:$0xff] }
 0x153   : > { %4264 = vmatprep.mubr.bf16.mxu0 %v4656_v44  ;;  %4452 = vmatprep.mubr.bf16.mxu1 %v4730_v15 }
 0x15a   : > { %4265 = vmatmul.mubr.bf16.gmra.mrb[52].mxu0 %v4657_v46  ;;  %4453 = vmatmul.mubr.bf16.gmra.mrb[52].mxu1 %v4732_v17  ;;  %v4693_v46 = vld [vmem:[%s5777_s18 + $0x1b8] sm:$0xff]  }
 0x15b   : > { %4268 = vmatprep.mubr.bf16.mxu0 %v4658_v48  ;;  %4456 = vmatprep.mubr.bf16.mxu1 %v4734_v19 }
 0x162   : > { %4269 = vmatmul.mubr.bf16.gmra.mrb[56].mxu0 %v4659_v50  ;;  %4457 = vmatmul.mubr.bf16.gmra.mrb[56].mxu1 %v4736_v21 }
 0x163   : > { %4272 = vmatprep.mubr.bf16.mxu0 %v4660_v52  ;;  %4460 = vmatprep.mubr.bf16.mxu1 %v4738_v23  ;;  %v4705_v23 = vld [vmem:[%s5777_s18 + $0x1e8] sm:$0xff]  }
 0x16a   : > { %4273 = vmatmul.mubr.bf16.gmra.mrb[60].mxu0 %v4661_v54  ;;  %4461 = vmatmul.mubr.bf16.gmra.mrb[60].mxu1 %v4740_v25 }
 0x16b   : > { %4276 = vmatprep.mubr.bf16.mxu0 %v4662_v56  ;;  %4464 = vmatprep.mubr.bf16.mxu1 %v4742_v28  ;;  %v4697_v56 = vld [vmem:[%s5777_s18 + $0x1c8] sm:$0xff]  }
 0x172   : > { %4277 = vmatmul.mubr.bf16.gmra.mrb[64].mxu0 %v4663_v58  ;;  %4465 = vmatmul.mubr.bf16.gmra.mrb[64].mxu1 %v4744_v30 }
 0x173   : > { %4280 = vmatprep.mubr.bf16.mxu0 %v4664_v60  ;;  %3813 = vmatprep.mubr.msk.bf16.mxu1 %vm3811_vm3, %v5896_v38 }
 0x17a   : > { %4281 = vmatmul.mubr.bf16.gmra.mrb[68].mxu0 %v4665_v62 }
 0x17b   : > { %4284 = vmatprep.mubr.bf16.mxu0 %v4666_v0 }
 0x182   : > { %4285 = vmatmul.mubr.bf16.gmra.mrb[72].mxu0 %v4667_v2 }
 0x183   : > { %4288 = vmatprep.mubr.bf16.mxu0 %v4668_v4 }
 0x18a   : > { %4289 = vmatmul.mubr.bf16.gmra.mrb[76].mxu0 %v4669_v6 }
 0x18b   : > { %4292 = vmatprep.mubr.bf16.mxu0 %v4670_v8 }
 0x192   : > { %4293 = vmatmul.mubr.bf16.gmra.mrb[80].mxu0 %v4671_v10 }
 0x193   : > { %4296 = vmatprep.mubr.bf16.mxu0 %v4672_v12 }
 0x19a   : > { %4297 = vmatmul.mubr.bf16.gmra.mrb[84].mxu0 %v4673_v14 }
 0x19b   : > { %4300 = vmatprep.mubr.bf16.mxu0 %v4674_v16 }
 0x1a2   : > { %4301 = vmatmul.mubr.bf16.gmra.mrb[88].mxu0 %v4675_v18 }
 0x1a3   : > { %4304 = vmatprep.mubr.bf16.mxu0 %v4676_v20 }
 0x1aa   : > { %4305 = vmatmul.mubr.bf16.gmra.mrb[92].mxu0 %v4677_v22 }
 0x1ab   : > { %4308 = vmatprep.mubr.bf16.mxu0 %v4679_v24 }
 0x1b2   : > { %4309 = vmatmul.mubr.bf16.gmra.mrb[96].mxu0 %v4681_v27  ;;  %v4707_v27 = vld [vmem:[%s5777_s18 + $0x1f0] sm:$0xff]  }
 0x1b3   : > { %4312 = vmatprep.mubr.bf16.mxu0 %v4683_v29 }
 0x1ba   : > { %4313 = vmatmul.mubr.bf16.gmra.mrb[100].mxu0 %v4685_v37 }
 0x1bb   : > { %4316 = vmatprep.mubr.bf16.mxu0 %v4687_v39 }
 0x1c2   : > { %4317 = vmatmul.mubr.bf16.gmra.mrb[104].mxu0 %v4689_v40 }
 0x1c3   : > { %4320 = vmatprep.mubr.bf16.mxu0 %v4691_v41 }
 0x1c5   : > { %v4214_v43 = vpop.f32.mrb[0].mxu0 }
 0x1c6   : > { %v1548_v44 = vadd.f32 %v4214_v43, %v5902_v42  ;;  %v1539_v45 = vpop.f32.mrb[1].mxu0  ;;  %v4709_v43 = vld [vmem:[%s5777_s18 + $0x1f8] sm:$0xff]  }
 0x1c7   : > { %v1540_v47 = vadd.f32 %v5902_v42, %v1539_v45  ;;  %v4215_v48 = vpop.f32.mrb[2].mxu0 }
 0x1c8   : > { %4758 = vtanh.f32 %v1548_v44  ;;  %v1551_v50 = vadd.f32 %v4215_v48, %v5902_v42  ;;  %v1542_v51 = vpop.f32.mrb[3].mxu0 }
 0x1c9   : > { %4760 = vtanh.f32 %v1540_v47  ;;  %v1543_v52 = vadd.f32 %v5902_v42, %v1542_v51  ;;  %v4711_v47 = vld [vmem:[%s5777_s18 + $0x200] sm:$0xff]  }
 0x1ca   : > { %4762 = vtanh.f32 %v1551_v50  ;;  %4321 = vmatmul.mubr.bf16.gmra.mrb[108].mxu0 %v4693_v46 }
 0x1cb   : > { %4764 = vtanh.f32 %v1543_v52  ;;  %4324 = vmatprep.mubr.bf16.mxu0 %v4695_v49 }
 0x1cd   : > { %v4218_v53 = vpop.f32.mrb[4].mxu0 }
 0x1ce   : > { %v1564_v54 = vadd.f32 %v4218_v53, %v5902_v42  ;;  %v1555_v55 = vpop.f32.mrb[5].mxu0 }
 0x1cf   : > { %v1556_v57 = vadd.f32 %v5902_v42, %v1555_v55  ;;  %v4219_v58 = vpop.f32.mrb[6].mxu0 }
 0x1d0   : > { %4766 = vtanh.f32 %v1564_v54  ;;  %v1567_v60 = vadd.f32 %v4219_v58, %v5902_v42  ;;  %v1558_v61 = vpop.f32.mrb[7].mxu0 }
 0x1d1   : > { %4768 = vtanh.f32 %v1556_v57  ;;  %v1559_v62 = vadd.f32 %v5902_v42, %v1558_v61 }
 0x1d2   : > { %v5916_v63 = vpop.eup %4758  ;;  %4770 = vtanh.f32 %v1567_v60  ;;  %4325 = vmatmul.mubr.bf16.gmra.mrb[112].mxu0 %v4697_v56 }
 0x1d3   : > { %v5918_v0 = vpop.eup %4760  ;;  %4772 = vtanh.f32 %v1559_v62  ;;  %4328 = vmatprep.mubr.bf16.mxu0 %v4699_v59  ;;  %v4713_v59 = vld [vmem:[%s5777_s18 + $0x208] sm:$0xff]  }
 0x1d4   : > { %v5920_v1 = vpop.eup %4762 }
 0x1d5   : > { %v5922_v2 = vpop.eup %4764  ;;  %v4222_v3 = vpop.f32.mrb[8].mxu0  ;;  %v2938_v4 = vpack.c.bf16 %v5920_v1, %v5916_v63 }
 0x1d6   : > { %v1580_v5 = vadd.f32 %v4222_v3, %v5902_v42  ;;  %v1571_v6 = vpop.f32.mrb[9].mxu0  ;;  %v2937_v8 = vpack.c.bf16 %v5922_v2, %v5918_v0  ;;  %v4715_v3 = vld [vmem:[%s5777_s18 + $0x210] sm:$0xff]  }
 0x1d7   : > { %v1572_v9 = vadd.f32 %v5902_v42, %v1571_v6  ;;  %v4223_v10 = vpop.f32.mrb[10].mxu0 }
 0x1d8   : > { %4774 = vtanh.f32 %v1580_v5  ;;  %v1583_v12 = vadd.f32 %v4223_v10, %v5902_v42  ;;  %v1574_v13 = vpop.f32.mrb[11].mxu0 }
 0x1d9   : > { %4776 = vtanh.f32 %v1572_v9  ;;  %v1575_v14 = vadd.f32 %v5902_v42, %v1574_v13 }
 0x1da   : > { %v5934_v15 = vpop.eup %4766  ;;  %4778 = vtanh.f32 %v1583_v12  ;;  %4329 = vmatmul.mubr.bf16.gmra.mrb[116].mxu0 %v4701_v7 }
 0x1db   : > { %v5936_v16 = vpop.eup %4768  ;;  %4780 = vtanh.f32 %v1575_v14  ;;  %4332 = vmatprep.mubr.bf16.mxu0 %v4703_v11 }
 0x1dc   : > { %v5938_v17 = vpop.eup %4770 }
 0x1dd   : > { %v5940_v18 = vpop.eup %4772  ;;  %v4226_v19 = vpop.f32.mrb[12].mxu0  ;;  %v2940_v20 = vpack.c.bf16 %v5938_v17, %v5934_v15 }
 0x1de   : > { %v1596_v21 = vadd.f32 %v4226_v19, %v5902_v42  ;;  %v1587_v22 = vpop.f32.mrb[13].mxu0  ;;  %v2939_v24 = vpack.c.bf16 %v5940_v18, %v5936_v16 }
 0x1df   : > { %v1588_v25 = vadd.f32 %v5902_v42, %v1587_v22  ;;  %v4227_v26 = vpop.f32.mrb[14].mxu0 }
 0x1e0   : > { %4782 = vtanh.f32 %v1596_v21  ;;  %v1599_v28 = vadd.f32 %v4227_v26, %v5902_v42  ;;  %v1590_v29 = vpop.f32.mrb[15].mxu0 }
 0x1e1   : > { %4784 = vtanh.f32 %v1588_v25  ;;  %v1591_v30 = vadd.f32 %v5902_v42, %v1590_v29 }
 0x1e2   : > { %v5952_v32 = vpop.eup %4774  ;;  %4786 = vtanh.f32 %v1599_v28  ;;  %4333 = vmatmul.mubr.bf16.gmra.mrb[120].mxu0 %v4705_v23  ;;  %v4717_v23 = vld [vmem:[%s5777_s18 + $0x218] sm:$0xff]  }
 0x1e3   : > { %v5954_v33 = vpop.eup %4776  ;;  %4788 = vtanh.f32 %v1591_v30  ;;  %4336 = vmatprep.mubr.bf16.mxu0 %v4707_v27  ;;  %v4719_v27 = vld [vmem:[%s5777_s18 + $0x220] sm:$0xff]  }
 0x1e4   : > { %v5956_v35 = vpop.eup %4778 }
 0x1e5   : > { %v5958_v36 = vpop.eup %4780  ;;  %v4230_v37 = vpop.f32.mrb[16].mxu0  ;;  %v2942_v39 = vpack.c.bf16 %v5956_v35, %v5952_v32  ;;  %v2818_v35 = vld [vmem:[%s5784_s24] sm:$0xff] }
 0x1e6   : > { %v1612_v40 = vadd.f32 %v4230_v37, %v5902_v42  ;;  %v1603_v41 = vpop.f32.mrb[17].mxu0  ;;  %v2941_v44 = vpack.c.bf16 %v5958_v36, %v5954_v33 }
 0x1e7   : > { %v1604_v45 = vadd.f32 %v5902_v42, %v1603_v41  ;;  %v4231_v46 = vpop.f32.mrb[18].mxu0 }
 0x1e8   : > { %4790 = vtanh.f32 %v1612_v40  ;;  %v1615_v48 = vadd.f32 %v4231_v46, %v5902_v42  ;;  %v1606_v49 = vpop.f32.mrb[19].mxu0 }
 0x1e9   : > { %4792 = vtanh.f32 %v1604_v45  ;;  %v1607_v50 = vadd.f32 %v5902_v42, %v1606_v49 }
 0x1ea   : > { %v5970_v51 = vpop.eup %4782  ;;  %4794 = vtanh.f32 %v1615_v48  ;;  %4337 = vmatmul.mubr.bf16.gmra.mrb[124].mxu0 %v4709_v43 }
 0x1eb   : > { %v5972_v52 = vpop.eup %4784  ;;  %4796 = vtanh.f32 %v1607_v50  ;;  %4340 = vmatprep.mubr.bf16.mxu0 %v4711_v47  ;;  %v4721_v47 = vld [vmem:[%s5777_s18 + $0x228] sm:$0xff]   ;;  %v4723_v50 = vld [vmem:[%s5777_s18 + $0x230] sm:$0xff]  }
 0x1ec   : > { %v5974_v53 = vpop.eup %4786 }
 0x1ed   : > { %v5976_v54 = vpop.eup %4788  ;;  %v4234_v55 = vpop.f32.mrb[20].mxu0  ;;  %v2944_v56 = vpack.c.bf16 %v5974_v53, %v5970_v51 }
 0x1ee   : > { %v1628_v57 = vadd.f32 %v4234_v55, %v5902_v42  ;;  %v1619_v58 = vpop.f32.mrb[21].mxu0  ;;  %v2943_v60 = vpack.c.bf16 %v5976_v54, %v5972_v52 }
 0x1ef   : > { %v1620_v61 = vadd.f32 %v5902_v42, %v1619_v58  ;;  %v4235_v62 = vpop.f32.mrb[22].mxu0 }
 0x1f0   : > { %4798 = vtanh.f32 %v1628_v57  ;;  %v1631_v5 = vadd.f32 %v4235_v62, %v5902_v42  ;;  %v1622_v6 = vpop.f32.mrb[23].mxu0 }
 0x1f1   : > { %4800 = vtanh.f32 %v1620_v61  ;;  %v1623_v7 = vadd.f32 %v5902_v42, %v1622_v6 }
 0x1f2   : > { %v4791_v9 = vpop.eup %4790  ;;  %4802 = vtanh.f32 %v1631_v5  ;;  %4341 = vmatmul.mubr.bf16.gmra.mrb[128].mxu0 %v4713_v59 }
 0x1f3   : > { %v4793_v10 = vpop.eup %4792  ;;  %4804 = vtanh.f32 %v1623_v7  ;;  %4344 = vmatprep.mubr.bf16.mxu0 %v4715_v3  ;;  %v4725_v3 = vld [vmem:[%s5777_s18 + $0x238] sm:$0xff]   ;;  %v4727_v7 = vld [vmem:[%s5777_s18 + $0x240] sm:$0xff]  }
 0x1f4   : > { %v4795_v11 = vpop.eup %4794 }
 0x1f5   : > { %v4797_v12 = vpop.eup %4796  ;;  %v4238_v13 = vpop.f32.mrb[24].mxu0  ;;  %v2946_v14 = vpack.c.bf16 %v4795_v11, %v4791_v9  ;;  %v2824_v11 = vadd.s32 384, %v5888_v31 }
 0x1f6   : > { %v1644_v19 = vadd.f32 %v4238_v13, %v5902_v42  ;;  %v1635_v21 = vpop.f32.mrb[25].mxu0  ;;  %v2945_v22 = vpack.c.bf16 %v4797_v12, %v4793_v10  ;;  %v2840_v12 = vsub.s32 %v5888_v31, %v5891_v34 }
 0x1f7   : > { %v1636_v25 = vadd.f32 %v5902_v42, %v1635_v21  ;;  %v4239_v26 = vpop.f32.mrb[26].mxu0 }
 0x1f8   : > { %4806 = vtanh.f32 %v1644_v19  ;;  %v1647_v28 = vadd.f32 %v4239_v26, %v5902_v42  ;;  %v1638_v29 = vpop.f32.mrb[27].mxu0  ;;  %4011 = vmatprep.subr.bf16.mxu1 %v2945_v22  ;;  %vm2856_vm4 = vcmp.ge.s32.totalorder %v2840_v12, 0  ;;  %vm2872_vm5 = vcmp.lt.s32.totalorder %v2840_v12, 256  ;;  %v4741_v12 = vld [vmem:[%s5777_s18 + $0x278] sm:$0xff]  }
 0x1f9   : > { %4808 = vtanh.f32 %v1636_v25  ;;  %v1639_v30 = vadd.f32 %v5902_v42, %v1638_v29  ;;  %4012 = vmatpush3.bf16.msra.mxu1 %v2937_v8  ;;  %vm6042_vm8 = vmand %vm2856_vm4, %vm2872_vm5 }
 0x1fa   : > { %v4799_v37 = vpop.eup %4798  ;;  %4810 = vtanh.f32 %v1647_v28  ;;  %4345 = vmatmul.mubr.bf16.gmra.mrb[132].mxu0 %v4717_v23  ;;  %4013 = vmatprep.subr.bf16.mxu1 %v2946_v14  ;;  %v2843_v14 = vsub.s32 %v2824_v11, %v5891_v34  ;;  %v4729_v23 = vld [vmem:[%s5777_s18 + $0x248] sm:$0xff]   ;;  %vm3814_vm10 = vmpackc.low %vm6042_vm8, %vm6042_vm8 }
 0x1fb   : > { %v4801_v40 = vpop.eup %4800  ;;  %4812 = vtanh.f32 %v1639_v30  ;;  %4348 = vmatprep.mubr.bf16.mxu0 %v4719_v27  ;;  %v4731_v27 = vld [vmem:[%s5777_s18 + $0x250] sm:$0xff]  }
 0x1fc   : > { %v4803_v41 = vpop.eup %4802  ;;  %vm2859_vm6 = vcmp.ge.s32.totalorder %v2843_v14, 0  ;;  %vm2875_vm7 = vcmp.lt.s32.totalorder %v2843_v14, 256 }
 0x1fd   : > { %v4805_v43 = vpop.eup %4804  ;;  %v4242_v45 = vpop.f32.mrb[28].mxu0  ;;  %4014 = vmatpush3.bf16.msra.mxu1 %v2938_v4  ;;  %v2948_v46 = vpack.c.bf16 %v4803_v41, %v4799_v37  ;;  %vm6048_vm9 = vmand %vm2859_vm6, %vm2875_vm7 }
 0x1fe   : > { %v1660_v0 = vadd.f32 %v4242_v45, %v5902_v42  ;;  %v1651_v2 = vpop.f32.mrb[29].mxu0  ;;  %v2947_v8 = vpack.c.bf16 %v4805_v43, %v4801_v40  ;;  %vm3817_vm11 = vmpackc.low %vm6048_vm9, %vm6048_vm9 }
 0x1ff   : > { %v1652_v48 = vadd.f32 %v5902_v42, %v1651_v2  ;;  %v4243_v49 = vpop.f32.mrb[30].mxu0 }
 0x200   : > { %4814 = vtanh.f32 %v1660_v0  ;;  %v1663_v55 = vadd.f32 %v4243_v49, %v5902_v42  ;;  %v1654_v57 = vpop.f32.mrb[31].mxu0  ;;  %4015 = vmatprep.subr.bf16.mxu1 %v2947_v8  ;;  %v4733_v0 = vld [vmem:[%s5777_s18 + $0x258] sm:$0xff]  }
 0x201   : > { %4816 = vtanh.f32 %v1652_v48  ;;  %v1655_v58 = vadd.f32 %v5902_v42, %v1654_v57  ;;  %4016 = vmatpush3.bf16.msra.mxu1 %v2939_v24 }
 0x202   : > { %v4807_v63 = vpop.eup %4806  ;;  %4818 = vtanh.f32 %v1663_v55  ;;  %4349 = vmatmul.mubr.bf16.gmra.mrb[136].mxu0 %v4721_v47  ;;  %4017 = vmatprep.subr.bf16.mxu1 %v2948_v46 }
 0x203   : > { %v4809_v1 = vpop.eup %4808  ;;  %4820 = vtanh.f32 %v1655_v58  ;;  %4352 = vmatprep.mubr.bf16.mxu0 %v4723_v50 }
 0x204   : > { %v4811_v4 = vpop.eup %4810 }
 0x205   : > { %v4813_v59 = vpop.eup %4812  ;;  %v4246_v61 = vpop.f32.mrb[32].mxu0  ;;  %4018 = vmatpush3.bf16.msra.mxu1 %v2940_v20  ;;  %v2950_v62 = vpack.c.bf16 %v4811_v4, %v4807_v63 }
 0x206   : > { %v1676_v16 = vadd.f32 %v4246_v61, %v5902_v42  ;;  %v1667_v18 = vpop.f32.mrb[33].mxu0  ;;  %v2949_v24 = vpack.c.bf16 %v4813_v59, %v4809_v1  ;;  %v4737_v59 = vld [vmem:[%s5777_s18 + $0x268] sm:$0xff]  }
 0x207   : > { %v1668_v5 = vadd.f32 %v5902_v42, %v1667_v18  ;;  %v4247_v6 = vpop.f32.mrb[34].mxu0  ;;  %v4739_v18 = vld [vmem:[%s5777_s18 + $0x270] sm:$0xff]  }
 0x208   : > { %4822 = vtanh.f32 %v1676_v16  ;;  %v1679_v9 = vadd.f32 %v4247_v6, %v5902_v42  ;;  %v1670_v10 = vpop.f32.mrb[35].mxu0  ;;  %4019 = vmatprep.subr.bf16.mxu1 %v2949_v24 }
 0x209   : > { %4824 = vtanh.f32 %v1668_v5  ;;  %v1671_v15 = vadd.f32 %v5902_v42, %v1670_v10  ;;  %4020 = vmatpush3.bf16.msra.mxu1 %v2941_v44 }
 0x20a   : > { %v4815_v17 = vpop.eup %4814  ;;  %4826 = vtanh.f32 %v1679_v9  ;;  %4353 = vmatmul.mubr.bf16.gmra.mrb[140].mxu0 %v4725_v3  ;;  %4021 = vmatprep.subr.bf16.mxu1 %v2950_v62 }
 0x20b   : > { %v4817_v20 = vpop.eup %4816  ;;  %4828 = vtanh.f32 %v1671_v15  ;;  %4356 = vmatprep.mubr.bf16.mxu0 %v4727_v7 }
 0x20c   : > { %v4819_v13 = vpop.eup %4818 }
 0x20d   : > { %v4821_v19 = vpop.eup %4820  ;;  %v4250_v21 = vpop.f32.mrb[36].mxu0  ;;  %4022 = vmatpush3.bf16.msra.mxu1 %v2942_v39  ;;  %v2952_v33 = vpack.c.bf16 %v4819_v13, %v4815_v17 }
 0x20e   : > { %v1692_v36 = vadd.f32 %v4250_v21, %v5902_v42  ;;  %v1683_v44 = vpop.f32.mrb[37].mxu0  ;;  %v2951_v22 = vpack.c.bf16 %v4821_v19, %v4817_v20  ;;  %v4743_v21 = vld [vmem:[%s5777_s18 + $0x280] sm:$0xff]  }
 0x20f   : > { %v1684_v25 = vadd.f32 %v5902_v42, %v1683_v44  ;;  %v4251_v26 = vpop.f32.mrb[38].mxu0 }
 0x210   : > { %4830 = vtanh.f32 %v1692_v36  ;;  %v1695_v28 = vadd.f32 %v4251_v26, %v5902_v42  ;;  %v1686_v29 = vpop.f32.mrb[39].mxu0  ;;  %4023 = vmatprep.subr.bf16.mxu1 %v2951_v22 }
 0x211   : > { %4832 = vtanh.f32 %v1684_v25  ;;  %v1687_v32 = vadd.f32 %v5902_v42, %v1686_v29  ;;  %4024 = vmatpush3.bf16.msra.mxu1 %v2943_v60  ;;  %v6054_v60 = vpack.c.bf16 %v2818_v35, %v2818_v35  ;;  %v4745_v35 = vld [vmem:[%s5777_s18 + $0x288] sm:$0xff]  }
 0x212   : > { %v6038_v39 = vpop.eup %4822  ;;  %4834 = vtanh.f32 %v1695_v28  ;;  %4357 = vmatmul.mubr.bf16.gmra.mrb[144].mxu0 %v4729_v23  ;;  %4025 = vmatprep.subr.bf16.mxu1 %v2952_v33 }
 0x213   : > { %v6046_v37 = vpop.eup %4824  ;;  %4836 = vtanh.f32 %v1687_v32  ;;  %4360 = vmatprep.mubr.bf16.mxu0 %v4731_v27 }
 0x214   : > { %v6052_v54 = vpop.eup %4826 }
 0x215   : > { %v6056_v40 = vpop.eup %4828  ;;  %v4254_v41 = vpop.f32.mrb[40].mxu0  ;;  %4026 = vmatpush3.bf16.msra.mxu1 %v2944_v56  ;;  %v2954_v43 = vpack.c.bf16 %v6052_v54, %v6038_v39  ;;  %v4735_v56 = vld [vmem:[%s5777_s18 + $0x260] sm:$0xff]  }
 0x216   : > { %v1708_v45 = vadd.f32 %v4254_v41, %v5902_v42  ;;  %v1699_v46 = vpop.f32.mrb[41].mxu0  ;;  %v2953_v2 = vpack.c.bf16 %v6056_v40, %v6046_v37 }
 0x217   : > { %v1700_v51 = vadd.f32 %v5902_v42, %v1699_v46  ;;  %v4255_v53 = vpop.f32.mrb[42].mxu0 }
 0x218   : > { %4838 = vtanh.f32 %v1708_v45  ;;  %v1711_v8 = vadd.f32 %v4255_v53, %v5902_v42  ;;  %v1702_v47 = vpop.f32.mrb[43].mxu0  ;;  %3816 = vmatmul.mubr.msk.bf16.vlgmr.msra.gmra.mrb[68].mxu1 %vm3814_vm10, %v6054_v60  ;;  %v4746_v45 = vld [vmem:[%s5777_s18 + $0x290] sm:$0xff]  }
 0x219   : > { %4840 = vtanh.f32 %v1700_v51  ;;  %v1703_v48 = vadd.f32 %v5902_v42, %v1702_v47  ;;  %3819 = vmatprep.mubr.msk.bf16.mxu1 %vm3817_vm11, %v5896_v38 }
 0x21a   : > { %v6079_v49 = vpop.eup %4830  ;;  %4842 = vtanh.f32 %v1711_v8  ;;  %4361 = vmatmul.mubr.bf16.gmra.mrb[148].mxu0 %v4733_v0 }
 0x21b   : > { %v6081_v50 = vpop.eup %4832  ;;  %4844 = vtanh.f32 %v1703_v48  ;;  %4364 = vmatprep.mubr.bf16.mxu0 %v4735_v56 }
 0x21c   : > { %v6083_v55 = vpop.eup %4834 }
 0x21d   : > { %v6085_v57 = vpop.eup %4836  ;;  %v4258_v58 = vpop.f32.mrb[44].mxu0  ;;  %v2956_v63 = vpack.c.bf16 %v6083_v55, %v6079_v49  ;;  %v2826_v49 = vadd.s32 640, %v5888_v31 }
 0x21e   : > { %v1724_v1 = vadd.f32 %v4258_v58, %v5902_v42  ;;  %v1715_v4 = vpop.f32.mrb[45].mxu0  ;;  %v2955_v61 = vpack.c.bf16 %v6085_v57, %v6081_v50 }
 0x21f   : > { %v1716_v62 = vadd.f32 %v5902_v42, %v1715_v4  ;;  %v4259_v16 = vpop.f32.mrb[46].mxu0 }
 0x220   : > { %4846 = vtanh.f32 %v1724_v1  ;;  %v1727_v24 = vadd.f32 %v4259_v16, %v5902_v42  ;;  %v1718_v3 = vpop.f32.mrb[47].mxu0 }
 0x221   : > { %4848 = vtanh.f32 %v1716_v62  ;;  %v1719_v5 = vadd.f32 %v5902_v42, %v1718_v3  ;;  %v4747_v62 = vld [vmem:[%s5777_s18 + $0x298] sm:$0xff]  }
 0x222   : > { %v6097_v6 = vpop.eup %4838  ;;  %4850 = vtanh.f32 %v1727_v24  ;;  %4365 = vmatmul.mubr.bf16.gmra.mrb[152].mxu0 %v4737_v59  ;;  %v4748_v24 = vld [vmem:[%s5777_s18 + $0x2a0] sm:$0xff]  }
 0x223   : > { %v6099_v7 = vpop.eup %4840  ;;  %4852 = vtanh.f32 %v1719_v5  ;;  %4368 = vmatprep.mubr.bf16.mxu0 %v4739_v18 }
 0x224   : > { %v6101_v9 = vpop.eup %4842 }
 0x225   : > { %v6103_v10 = vpop.eup %4844  ;;  %v4262_v11 = vpop.f32.mrb[48].mxu0  ;;  %v2958_v15 = vpack.c.bf16 %v6101_v9, %v6097_v6 }
 0x226   : > { %v1740_v17 = vadd.f32 %v4262_v11, %v5902_v42  ;;  %v1731_v20 = vpop.f32.mrb[49].mxu0  ;;  %v2957_v13 = vpack.c.bf16 %v6103_v10, %v6099_v7 }
 0x227   : > { %v1732_v14 = vadd.f32 %v5902_v42, %v1731_v20  ;;  %v4263_v19 = vpop.f32.mrb[50].mxu0 }
 0x228   : > { %4854 = vtanh.f32 %v1740_v17  ;;  %v1743_v33 = vadd.f32 %v4263_v19, %v5902_v42  ;;  %v1734_v36 = vpop.f32.mrb[51].mxu0 }
 0x229   : > { %4856 = vtanh.f32 %v1732_v14  ;;  %v1735_v44 = vadd.f32 %v5902_v42, %v1734_v36 }
 0x22a   : > { %v6115_v22 = vpop.eup %4846  ;;  %4858 = vtanh.f32 %v1743_v33  ;;  %4369 = vmatmul.mubr.bf16.gmra.mrb[156].mxu0 %v4741_v12  ;;  %v4749_v33 = vld [vmem:[%s5777_s18 + $0x2a8] sm:$0xff]  }
 0x22b   : > { %v6117_v23 = vpop.eup %4848  ;;  %4860 = vtanh.f32 %v1735_v44  ;;  %4372 = vmatprep.mubr.bf16.mxu0 %v4743_v21 }
 0x22c   : > { %v6119_v25 = vpop.eup %4850 }
 0x22d   : > { %v6121_v26 = vpop.eup %4852  ;;  %v4266_v27 = vpop.f32.mrb[52].mxu0  ;;  %v2960_v28 = vpack.c.bf16 %v6119_v25, %v6115_v22 }
 0x22e   : > { %v1756_v29 = vadd.f32 %v4266_v27, %v5902_v42  ;;  %v1747_v32 = vpop.f32.mrb[53].mxu0  ;;  %v2959_v30 = vpack.c.bf16 %v6121_v26, %v6117_v23  ;;  %v4750_v27 = vld [vmem:[%s5777_s18 + $0x2b0] sm:$0xff]  }
 0x22f   : > { %v1748_v52 = vadd.f32 %v5902_v42, %v1747_v32  ;;  %v4267_v41 = vpop.f32.mrb[54].mxu0 }
 0x230   : > { %4862 = vtanh.f32 %v1756_v29  ;;  %v1759_v46 = vadd.f32 %v4267_v41, %v5902_v42  ;;  %v1750_v0 = vpop.f32.mrb[55].mxu0 }
 0x231   : > { %4864 = vtanh.f32 %v1748_v52  ;;  %v1751_v51 = vadd.f32 %v5902_v42, %v1750_v0 }
 0x232   : > { %v4855_v53 = vpop.eup %4854  ;;  %4866 = vtanh.f32 %v1759_v46  ;;  %4373 = vmatmul.mubr.bf16.gmra.mrb[160].mxu0 %v4745_v35  ;;  %v4751_v46 = vld [vmem:[%s5777_s18 + $0x2b8] sm:$0xff]  }
 0x233   : > { %v4857_v56 = vpop.eup %4856  ;;  %4868 = vtanh.f32 %v1751_v51  ;;  %4376 = vmatprep.mubr.bf16.mxu0 %v4746_v45 }
 0x234   : > { %v4859_v8 = vpop.eup %4858 }
 0x235   : > { %v4861_v47 = vpop.eup %4860  ;;  %v4270_v48 = vpop.f32.mrb[56].mxu0  ;;  %v2962_v58 = vpack.c.bf16 %v4859_v8, %v4855_v53  ;;  %v4752_v53 = vld [vmem:[%s5777_s18 + $0x2c0] sm:$0xff]  }
 0x236   : > { %v1772_v1 = vadd.f32 %v4270_v48, %v5902_v42  ;;  %v1763_v4 = vpop.f32.mrb[57].mxu0  ;;  %v2961_v59 = vpack.c.bf16 %v4861_v47, %v4857_v56  ;;  %v2823_v56 = vadd.s32 256, %v5888_v31 }
 0x237   : > { %v1764_v16 = vadd.f32 %v5902_v42, %v1763_v4  ;;  %v4271_v18 = vpop.f32.mrb[58].mxu0  ;;  %v2845_v4 = vsub.s32 %v2826_v49, %v5891_v34 }
 0x238   : > { %4870 = vtanh.f32 %v1772_v1  ;;  %v1775_v3 = vadd.f32 %v4271_v18, %v5902_v42  ;;  %v1766_v5 = vpop.f32.mrb[59].mxu0  ;;  %4033 = vmatprep.subr.bf16.mxu1 %v2961_v59  ;;  %v4753_v18 = vld [vmem:[%s5777_s18 + $0x2c8] sm:$0xff]  }
 0x239   : > { %4872 = vtanh.f32 %v1764_v16  ;;  %v1767_v11 = vadd.f32 %v5902_v42, %v1766_v5  ;;  %4034 = vmatpush3.bf16.msra.mxu1 %v2953_v2  ;;  %v4754_v5 = vld [vmem:[%s5777_s18 + $0x2d0] sm:$0xff]   ;;  %vm2861_vm14 = vcmp.ge.s32.totalorder %v2845_v4, 0  ;;  %vm2877_vm15 = vcmp.lt.s32.totalorder %v2845_v4, 256 }
 0x23a   : > { %v4863_v17 = vpop.eup %4862  ;;  %4874 = vtanh.f32 %v1775_v3  ;;  %4377 = vmatmul.mubr.bf16.gmra.mrb[164].mxu0 %v4747_v62  ;;  %4035 = vmatprep.subr.bf16.mxu1 %v2962_v58  ;;  %v2842_v58 = vsub.s32 %v2823_v56, %v5891_v34  ;;  %vm6191_vm1 = vmand %vm2861_vm14, %vm2877_vm15 }
 0x23b   : > { %v4865_v20 = vpop.eup %4864  ;;  %4876 = vtanh.f32 %v1767_v11  ;;  %4380 = vmatprep.mubr.bf16.mxu0 %v4748_v24  ;;  %vm3823_vm3 = vmpackc.low %vm6191_vm1, %vm6191_vm1 }
 0x23c   : > { %v4867_v12 = vpop.eup %4866  ;;  %vm2858_vm12 = vcmp.ge.s32.totalorder %v2842_v58, 0  ;;  %vm2874_vm13 = vcmp.lt.s32.totalorder %v2842_v58, 256 }
 0x23d   : > { %v4869_v14 = vpop.eup %4868  ;;  %v4274_v19 = vpop.f32.mrb[60].mxu0  ;;  %4036 = vmatpush3.bf16.msra.mxu1 %v2954_v43  ;;  %v2964_v21 = vpack.c.bf16 %v4867_v12, %v4863_v17  ;;  %vm6185_vm0 = vmand %vm2858_vm12, %vm2874_vm13 }
 0x23e   : > { %v1788_v37 = vadd.f32 %v4274_v19, %v5902_v42  ;;  %v1779_v40 = vpop.f32.mrb[61].mxu0  ;;  %v2963_v2 = vpack.c.bf16 %v4869_v14, %v4865_v20  ;;  %vm3820_vm2 = vmpackc.low %vm6185_vm0, %vm6185_vm0 }
 0x23f   : > { %v1780_v36 = vadd.f32 %v5902_v42, %v1779_v40  ;;  %v4275_v44 = vpop.f32.mrb[62].mxu0 }
 0x240   : > { %4878 = vtanh.f32 %v1788_v37  ;;  %v1791_v29 = vadd.f32 %v4275_v44, %v5902_v42  ;;  %v1782_v32 = vpop.f32.mrb[63].mxu0  ;;  %4037 = vmatprep.subr.bf16.mxu1 %v2963_v2  ;;  %v4755_v37 = vld [vmem:[%s5777_s18 + $0x2d8] sm:$0xff]  }
 0x241   : > { %4880 = vtanh.f32 %v1780_v36  ;;  %v1783_v35 = vadd.f32 %v5902_v42, %v1782_v32  ;;  %4038 = vmatpush3.bf16.msra.mxu1 %v2955_v61 }
 0x242   : > { %v4871_v39 = vpop.eup %4870  ;;  %4882 = vtanh.f32 %v1791_v29  ;;  %4381 = vmatmul.mubr.bf16.gmra.mrb[168].mxu0 %v4749_v33  ;;  %4039 = vmatprep.subr.bf16.mxu1 %v2964_v21 }
 0x243   : > { %v4873_v54 = vpop.eup %4872  ;;  %4884 = vtanh.f32 %v1783_v35  ;;  %4384 = vmatprep.mubr.bf16.mxu0 %v4750_v27 }
 0x244   : > { %v4875_v43 = vpop.eup %4874 }
 0x245   : > { %v4877_v52 = vpop.eup %4876  ;;  %v4278_v41 = vpop.f32.mrb[64].mxu0  ;;  %4040 = vmatpush3.bf16.msra.mxu1 %v2956_v63  ;;  %v2966_v45 = vpack.c.bf16 %v4875_v43, %v4871_v39 }
 0x246   : > { %v1804_v50 = vadd.f32 %v4278_v41, %v5902_v42  ;;  %v1795_v57 = vpop.f32.mrb[65].mxu0  ;;  %v2965_v61 = vpack.c.bf16 %v4877_v52, %v4873_v54  ;;  %v4757_v52 = vld [vmem:[%s5777_s18 + $0x2e8] sm:$0xff]  }
 0x247   : > { %v1796_v0 = vadd.f32 %v5902_v42, %v1795_v57  ;;  %v4279_v51 = vpop.f32.mrb[66].mxu0 }
 0x248   : > { %4886 = vtanh.f32 %v1804_v50  ;;  %v1807_v8 = vadd.f32 %v4279_v51, %v5902_v42  ;;  %v1798_v47 = vpop.f32.mrb[67].mxu0  ;;  %4041 = vmatprep.subr.bf16.mxu1 %v2965_v61 }
 0x249   : > { %4888 = vtanh.f32 %v1796_v0  ;;  %v1799_v55 = vadd.f32 %v5902_v42, %v1798_v47  ;;  %4042 = vmatpush3.bf16.msra.mxu1 %v2957_v13 }
 0x24a   : > { %v4879_v63 = vpop.eup %4878  ;;  %4890 = vtanh.f32 %v1807_v8  ;;  %4385 = vmatmul.mubr.bf16.gmra.mrb[172].mxu0 %v4751_v46  ;;  %4043 = vmatprep.subr.bf16.mxu1 %v2966_v45 }
 0x24b   : > { %v4881_v48 = vpop.eup %4880  ;;  %4892 = vtanh.f32 %v1799_v55  ;;  %4388 = vmatprep.mubr.bf16.mxu0 %v4752_v53 }
 0x24c   : > { %v4883_v1 = vpop.eup %4882 }
 0x24d   : > { %v4885_v59 = vpop.eup %4884  ;;  %v4282_v62 = vpop.f32.mrb[68].mxu0  ;;  %4044 = vmatpush3.bf16.msra.mxu1 %v2958_v15  ;;  %v2968_v7 = vpack.c.bf16 %v4883_v1, %v4879_v63 }
 0x24e   : > { %v1820_v10 = vadd.f32 %v4282_v62, %v5902_v42  ;;  %v1811_v13 = vpop.f32.mrb[69].mxu0  ;;  %v2967_v16 = vpack.c.bf16 %v4885_v59, %v4881_v48 }
 0x24f   : > { %v1812_v24 = vadd.f32 %v5902_v42, %v1811_v13  ;;  %v4283_v3 = vpop.f32.mrb[70].mxu0 }
 0x250   : > { %4894 = vtanh.f32 %v1820_v10  ;;  %v1823_v11 = vadd.f32 %v4283_v3, %v5902_v42  ;;  %v1814_v17 = vpop.f32.mrb[71].mxu0  ;;  %4045 = vmatprep.subr.bf16.mxu1 %v2967_v16 }
 0x251   : > { %4896 = vtanh.f32 %v1812_v24  ;;  %v1815_v6 = vadd.f32 %v5902_v42, %v1814_v17  ;;  %4046 = vmatpush3.bf16.msra.mxu1 %v2959_v30  ;;  %v6263_v24 = vld [vmem:[#allocation9] ss:$0 sm:$0xff] }
 0x252   : > { %v6182_v9 = vpop.eup %4886  ;;  %4898 = vtanh.f32 %v1823_v11  ;;  %4389 = vmatmul.mubr.bf16.gmra.mrb[176].mxu0 %v4753_v18  ;;  %4047 = vmatprep.subr.bf16.mxu1 %v2968_v7 }
 0x253   : > { %v6189_v20 = vpop.eup %4888  ;;  %4900 = vtanh.f32 %v1815_v6  ;;  %4392 = vmatprep.mubr.bf16.mxu0 %v4754_v5 }
 0x254   : > { %v6195_v23 = vpop.eup %4890 }
 0x255   : > { %v6197_v26 = vpop.eup %4892  ;;  %v4286_v30 = vpop.f32.mrb[72].mxu0  ;;  %4048 = vmatpush3.bf16.msra.mxu1 %v2960_v28  ;;  %v2970_v14 = vpack.c.bf16 %v6195_v23, %v6182_v9  ;;  %v4756_v28 = vld [vmem:[%s5777_s18 + $0x2e0] sm:$0xff]  }
 0x256   : > { %v1836_v19 = vadd.f32 %v4286_v30, %v5902_v42  ;;  %v1827_v21 = vpop.f32.mrb[73].mxu0  ;;  %v2969_v40 = vpack.c.bf16 %v6197_v26, %v6189_v20 }
 0x257   : > { %v1828_v22 = vadd.f32 %v5902_v42, %v1827_v21  ;;  %v4287_v25 = vpop.f32.mrb[74].mxu0 }
 0x258   : > { %4902 = vtanh.f32 %v1836_v19  ;;  %v1839_v2 = vadd.f32 %v4287_v25, %v5902_v42  ;;  %v1830_v33 = vpop.f32.mrb[75].mxu0  ;;  %3822 = vmatmul.mubr.msk.bf16.vlgmr.msra.gmra.mrb[72].mxu1 %vm3820_vm2, %v6054_v60 }
 0x259   : > { %4904 = vtanh.f32 %v1828_v22  ;;  %v1831_v36 = vadd.f32 %v5902_v42, %v1830_v33  ;;  %3825 = vmatprep.mubr.msk.bf16.mxu1 %vm3823_vm3, %v5896_v38 }
 0x25a   : > { %v6220_v44 = vpop.eup %4894  ;;  %4906 = vtanh.f32 %v1839_v2  ;;  %4393 = vmatmul.mubr.bf16.gmra.mrb[180].mxu0 %v4755_v37 }
 0x25b   : > { %v6222_v27 = vpop.eup %4896  ;;  %4908 = vtanh.f32 %v1831_v36  ;;  %4396 = vmatprep.mubr.bf16.mxu0 %v4756_v28 }
 0x25c   : > { %v6224_v29 = vpop.eup %4898 }
 0x25d   : > { %v6226_v32 = vpop.eup %4900  ;;  %v4290_v35 = vpop.f32.mrb[76].mxu0  ;;  %v2972_v39 = vpack.c.bf16 %v6224_v29, %v6220_v44  ;;  %v2828_v44 = vadd.s32 896, %v5888_v31 }
 0x25e   : > { %v1852_v54 = vadd.f32 %v4290_v35, %v5902_v42  ;;  %v1843_v43 = vpop.f32.mrb[77].mxu0  ;;  %v2971_v41 = vpack.c.bf16 %v6226_v32, %v6222_v27  ;;  %v2825_v32 = vadd.s32 512, %v5888_v31 }
 0x25f   : > { %v1844_v45 = vadd.f32 %v5902_v42, %v1843_v43  ;;  %v4291_v50 = vpop.f32.mrb[78].mxu0 }
 0x260   : > { %4910 = vtanh.f32 %v1852_v54  ;;  %v1855_v57 = vadd.f32 %v4291_v50, %v5902_v42  ;;  %v1846_v61 = vpop.f32.mrb[79].mxu0  ;;  %v4402_v50 = vpop.f32.mrb[0].mxu1 }
 0x261   : > { %4912 = vtanh.f32 %v1844_v45  ;;  %v1847_v46 = vadd.f32 %v5902_v42, %v1846_v61  ;;  %v2300_v61 = vadd.f32 %v6263_v24, %v4402_v50 }
 0x262   : > { %v6237_v0 = vpop.eup %4902  ;;  %4914 = vtanh.f32 %v1855_v57  ;;  %4397 = vmatmul.mubr.bf16.gmra.mrb[184].mxu0 %v4757_v52 }
 0x263   : > { %v6239_v51 = vpop.eup %4904  ;;  %4916 = vtanh.f32 %v1847_v46  ;;  %v2291_v46 = vpop.f32.mrb[1].mxu1 }
 0x264   : > { %v6241_v53 = vpop.eup %4906 }
 0x265   : > { %v6243_v56 = vpop.eup %4908  ;;  %v4294_v8 = vpop.f32.mrb[80].mxu0  ;;  %v2974_v47 = vpack.c.bf16 %v6241_v53, %v6237_v0 }
 0x266   : > { %v1868_v49 = vadd.f32 %v4294_v8, %v5902_v42  ;;  %v1859_v55 = vpop.f32.mrb[81].mxu0  ;;  %v2973_v63 = vpack.c.bf16 %v6243_v56, %v6239_v51 }
 0x267   : > { %v1860_v48 = vadd.f32 %v5902_v42, %v1859_v55  ;;  %v4295_v58 = vpop.f32.mrb[82].mxu0  ;;  %v4403_v55 = vpop.f32.mrb[2].mxu1 }
 0x268   : > { %4918 = vtanh.f32 %v1868_v49  ;;  %v1871_v1 = vadd.f32 %v4295_v58, %v5902_v42  ;;  %v1862_v4 = vpop.f32.mrb[83].mxu0  ;;  %v2292_v49 = vadd.f32 %v6263_v24, %v2291_v46  ;;  %v2303_v26 = vadd.f32 %v6263_v24, %v4403_v55 }
 0x269   : > { %4920 = vtanh.f32 %v1860_v48  ;;  %v1863_v59 = vadd.f32 %v5902_v42, %v1862_v4 }
 0x26a   : > { %v6253_v62 = vpop.eup %4910  ;;  %4922 = vtanh.f32 %v1871_v1 }
 0x26b   : > { %v6255_v7 = vpop.eup %4912  ;;  %4924 = vtanh.f32 %v1863_v59 }
 0x26c   : > { %v6257_v10 = vpop.eup %4914 }
 0x26d   : > { %v6259_v13 = vpop.eup %4916  ;;  %v4298_v16 = vpop.f32.mrb[84].mxu0  ;;  %v2976_v18 = vpack.c.bf16 %v6257_v10, %v6253_v62 }
 0x26e   : > { %v1884_v3 = vadd.f32 %v6263_v24, %v4298_v16  ;;  %v1875_v5 = vpop.f32.mrb[85].mxu0  ;;  %v2975_v42 = vpack.c.bf16 %v6259_v13, %v6255_v7 }
 0x26f   : > { %v1876_v11 = vadd.f32 %v6263_v24, %v1875_v5  ;;  %v4299_v17 = vpop.f32.mrb[86].mxu0 }
 0x270   : > { %4926 = vtanh.f32 %v1884_v3  ;;  %v1887_v6 = vadd.f32 %v6263_v24, %v4299_v17  ;;  %v1878_v15 = vpop.f32.mrb[87].mxu0 }
 0x271   : > { %4928 = vtanh.f32 %v1876_v11  ;;  %v1879_v12 = vadd.f32 %v6263_v24, %v1878_v15 }
 0x272   : > { %v4919_v30 = vpop.eup %4918  ;;  %4930 = vtanh.f32 %v1887_v6 }
 0x273   : > { %v4921_v19 = vpop.eup %4920  ;;  %4932 = vtanh.f32 %v1879_v12 }
 0x274   : > { %v4923_v21 = vpop.eup %4922 }
 0x275   : > { %v4925_v37 = vpop.eup %4924  ;;  %v4302_v22 = vpop.f32.mrb[88].mxu0  ;;  %v2978_v25 = vpack.c.bf16 %v4923_v21, %v4919_v30 }
 0x276   : > { %v1900_v28 = vadd.f32 %v6263_v24, %v4302_v22  ;;  %v1891_v2 = vpop.f32.mrb[89].mxu0  ;;  %v2977_v33 = vpack.c.bf16 %v4925_v37, %v4921_v19 }
 0x277   : > { %v1892_v36 = vadd.f32 %v6263_v24, %v1891_v2  ;;  %v4303_v35 = vpop.f32.mrb[90].mxu0 }
 0x278   : > { %4934 = vtanh.f32 %v1900_v28  ;;  %v1903_v54 = vadd.f32 %v6263_v24, %v4303_v35  ;;  %v1894_v43 = vpop.f32.mrb[91].mxu0  ;;  %4055 = vmatprep.subr.bf16.mxu1 %v2977_v33 }
 0x279   : > { %4936 = vtanh.f32 %v1892_v36  ;;  %v1895_v52 = vadd.f32 %v6263_v24, %v1894_v43  ;;  %4056 = vmatpush3.bf16.msra.mxu1 %v2969_v40  ;;  %v2294_v40 = vpop.f32.mrb[3].mxu1 }
 0x27a   : > { %v4927_v45 = vpop.eup %4926  ;;  %4938 = vtanh.f32 %v1903_v54  ;;  %4057 = vmatprep.subr.bf16.mxu1 %v2978_v25  ;;  %v2295_v9 = vadd.f32 %v6263_v24, %v2294_v40  ;;  %v4406_v17 = vpop.f32.mrb[4].mxu1 }
 0x27b   : > { %v4929_v57 = vpop.eup %4928  ;;  %4940 = vtanh.f32 %v1895_v52  ;;  %v2316_v15 = vadd.f32 %v6263_v24, %v4406_v17  ;;  %v2307_v12 = vpop.f32.mrb[5].mxu1 }
 0x27c   : > { %v4931_v8 = vpop.eup %4930  ;;  %4942 = vtanh.f32 %v2300_v61  ;;  %v2308_v19 = vadd.f32 %v6263_v24, %v2307_v12  ;;  %v4407_v21 = vpop.f32.mrb[6].mxu1 }
 0x27d   : > { %v4933_v48 = vpop.eup %4932  ;;  %v4306_v58 = vpop.f32.mrb[92].mxu0  ;;  %4058 = vmatpush3.bf16.msra.mxu1 %v2970_v14  ;;  %v2980_v20 = vpack.c.bf16 %v4931_v8, %v4927_v45  ;;  %4944 = vtanh.f32 %v2292_v49  ;;  %v2847_v49 = vsub.s32 %v2828_v44, %v5891_v34 }
 0x27e   : > { %v1916_v1 = vadd.f32 %v6263_v24, %v4306_v58  ;;  %v1907_v4 = vpop.f32.mrb[93].mxu0  ;;  %v2979_v59 = vpack.c.bf16 %v4933_v48, %v4929_v57  ;;  %4946 = vtanh.f32 %v2303_v26  ;;  %v2310_v25 = vpop.f32.mrb[7].mxu1  ;;  %v2844_v57 = vsub.s32 %v2825_v32, %v5891_v34 }
 0x27f   : > { %v1908_v16 = vadd.f32 %v6263_v24, %v1907_v4  ;;  %v4307_v3 = vpop.f32.mrb[94].mxu0  ;;  %v2311_v52 = vadd.f32 %v6263_v24, %v2310_v25  ;;  %v4410_v46 = vpop.f32.mrb[8].mxu1  ;;  %vm2863_vm6 = vcmp.ge.s32.totalorder %v2847_v49, 0  ;;  %vm2879_vm7 = vcmp.lt.s32.totalorder %v2847_v49, 256 }
 0x280   : > { %4948 = vtanh.f32 %v1916_v1  ;;  %v1919_v5 = vadd.f32 %v6263_v24, %v4307_v3  ;;  %v1910_v11 = vpop.f32.mrb[95].mxu0  ;;  %4059 = vmatprep.subr.bf16.mxu1 %v2979_v59  ;;  %v2332_v55 = vadd.f32 %v6263_v24, %v4410_v46  ;;  %v2323_v48 = vpop.f32.mrb[9].mxu1  ;;  %vm2860_vm4 = vcmp.ge.s32.totalorder %v2844_v57, 0  ;;  %vm6353_vm9 = vmand %vm2863_vm6, %vm2879_vm7 }
 0x281   : > { %4950 = vtanh.f32 %v1908_v16  ;;  %v1911_v23 = vadd.f32 %v6263_v24, %v1910_v11  ;;  %4060 = vmatpush3.bf16.msra.mxu1 %v2971_v41  ;;  %v2319_v41 = vadd.f32 %v6263_v24, %v4407_v21  ;;  %v2324_v51 = vadd.f32 %v6263_v24, %v2323_v48  ;;  %v4411_v56 = vpop.f32.mrb[10].mxu1  ;;  %vm3829_vm11 = vmpackc.low %vm6353_vm9, %vm6353_vm9 }
 0x282   : > { %v4935_v14 = vpop.eup %4934  ;;  %4952 = vtanh.f32 %v1919_v5  ;;  %4061 = vmatprep.subr.bf16.mxu1 %v2980_v20  ;;  %v2335_v1 = vadd.f32 %v6263_v24, %v4411_v56  ;;  %v2326_v4 = vpop.f32.mrb[11].mxu1  ;;  %vm2876_vm5 = vcmp.lt.s32.totalorder %v2844_v57, 256 }
 0x283   : > { %v4937_v6 = vpop.eup %4936  ;;  %4954 = vtanh.f32 %v1911_v23  ;;  %v2327_v17 = vadd.f32 %v6263_v24, %v2326_v4  ;;  %vm6346_vm8 = vmand %vm2860_vm4, %vm2876_vm5 }
 0x284   : > { %v4939_v30 = vpop.eup %4938  ;;  %4956 = vtanh.f32 %v2295_v9  ;;  %vm3826_vm10 = vmpackc.low %vm6346_vm8, %vm6346_vm8 }
 0x285   : > { %v4941_v37 = vpop.eup %4940  ;;  %v4310_v22 = vpop.f32.mrb[96].mxu0  ;;  %4062 = vmatpush3.bf16.msra.mxu1 %v2972_v39  ;;  %v2982_v27 = vpack.c.bf16 %v4939_v30, %v4935_v14  ;;  %4958 = vtanh.f32 %v2316_v15 }
 0x286   : > { %v1932_v28 = vadd.f32 %v6263_v24, %v4310_v22  ;;  %v1923_v2 = vpop.f32.mrb[97].mxu0  ;;  %v2981_v33 = vpack.c.bf16 %v4941_v37, %v4937_v6  ;;  %4960 = vtanh.f32 %v2308_v19  ;;  %v6300_v36 = vpop.eup %4942 }
 0x287   : > { %v1924_v35 = vadd.f32 %v6263_v24, %v1923_v2  ;;  %v4311_v54 = vpop.f32.mrb[98].mxu0  ;;  %4962 = vtanh.f32 %v2319_v41  ;;  %v6304_v29 = vpop.eup %4944 }
 0x288   : > { %4964 = vtanh.f32 %v1932_v28  ;;  %v1935_v39 = vadd.f32 %v6263_v24, %v4311_v54  ;;  %v1926_v43 = vpop.f32.mrb[99].mxu0  ;;  %4063 = vmatprep.subr.bf16.mxu1 %v2981_v33  ;;  %v6308_v45 = vpop.eup %4946 }
 0x289   : > { %4966 = vtanh.f32 %v1924_v35  ;;  %v1927_v50 = vadd.f32 %v6263_v24, %v1926_v43  ;;  %4064 = vmatpush3.bf16.msra.mxu1 %v2973_v63  ;;  %v4414_v19 = vpop.f32.mrb[12].mxu1 }
 0x28a   : > { %v4949_v61 = vpop.eup %4948  ;;  %4968 = vtanh.f32 %v1935_v39  ;;  %4065 = vmatprep.subr.bf16.mxu1 %v2982_v27  ;;  %v2348_v7 = vadd.f32 %v6263_v24, %v4414_v19  ;;  %v2339_v13 = vpop.f32.mrb[13].mxu1 }
 0x28b   : > { %v4951_v8 = vpop.eup %4950  ;;  %4970 = vtanh.f32 %v1927_v50  ;;  %v2340_v27 = vadd.f32 %v6263_v24, %v2339_v13  ;;  %v4415_v32 = vpop.f32.mrb[14].mxu1 }
 0x28c   : > { %v4953_v20 = vpop.eup %4952  ;;  %4972 = vtanh.f32 %v2311_v52  ;;  %v2351_v2 = vadd.f32 %v6263_v24, %v4415_v32  ;;  %v2342_v33 = vpop.f32.mrb[15].mxu1 }
 0x28d   : > { %v4955_v63 = vpop.eup %4954  ;;  %v4314_v26 = vpop.f32.mrb[100].mxu0  ;;  %4066 = vmatpush3.bf16.msra.mxu1 %v2974_v47  ;;  %v2984_v40 = vpack.c.bf16 %v4953_v20, %v4949_v61  ;;  %4974 = vtanh.f32 %v2332_v55  ;;  %v2343_v61 = vadd.f32 %v6263_v24, %v2342_v33 }
 0x28e   : > { %v6324_v59 = vpop.eup %4956  ;;  %v1948_v16 = vadd.f32 %v6263_v24, %v4314_v26  ;;  %v1939_v3 = vpop.f32.mrb[101].mxu0  ;;  %v2983_v5 = vpack.c.bf16 %v4955_v63, %v4951_v8  ;;  %4976 = vtanh.f32 %v2324_v51 }
 0x28f   : > { %v6327_v11 = vpop.eup %4958  ;;  %v1940_v9 = vadd.f32 %v6263_v24, %v1939_v3  ;;  %v4315_v0 = vpop.f32.mrb[102].mxu0  ;;  %4978 = vtanh.f32 %v2335_v1 }
 0x290   : > { %v6332_v47 = vpop.eup %4960  ;;  %4980 = vtanh.f32 %v1948_v16  ;;  %v1951_v23 = vadd.f32 %v6263_v24, %v4315_v0  ;;  %v1942_v14 = vpop.f32.mrb[103].mxu0  ;;  %4067 = vmatprep.subr.bf16.mxu1 %v2983_v5 }
 0x291   : > { %v6336_v6 = vpop.eup %4962  ;;  %4982 = vtanh.f32 %v1940_v9  ;;  %v1943_v15 = vadd.f32 %v6263_v24, %v1942_v14  ;;  %4068 = vmatpush3.bf16.msra.mxu1 %v2975_v42  ;;  %v4418_v55 = vpop.f32.mrb[16].mxu1 }
 0x292   : > { %v6342_v12 = vpop.eup %4964  ;;  %4984 = vtanh.f32 %v1951_v23  ;;  %4069 = vmatprep.subr.bf16.mxu1 %v2984_v40  ;;  %v2364_v20 = vadd.f32 %v6263_v24, %v4418_v55  ;;  %v2355_v51 = vpop.f32.mrb[17].mxu1 }
 0x293   : > { %v6350_v21 = vpop.eup %4966  ;;  %4986 = vtanh.f32 %v1943_v15  ;;  %v2356_v26 = vadd.f32 %v6263_v24, %v2355_v51  ;;  %v4419_v40 = vpop.f32.mrb[18].mxu1 }
 0x294   : > { %v6360_v22 = vpop.eup %4968  ;;  %4988 = vtanh.f32 %v2327_v17  ;;  %v2367_v3 = vadd.f32 %v6263_v24, %v4419_v40  ;;  %v2358_v5 = vpop.f32.mrb[19].mxu1 }
 0x295   : > { %v6363_v41 = vpop.eup %4970  ;;  %v4318_v25 = vpop.f32.mrb[104].mxu0  ;;  %4070 = vmatpush3.bf16.msra.mxu1 %v2976_v18  ;;  %v2986_v28 = vpack.c.bf16 %v6360_v22, %v6342_v12  ;;  %4990 = vtanh.f32 %v2348_v7 }
 0x296   : > { %v6374_v35 = vpop.eup %4972  ;;  %v1964_v54 = vadd.f32 %v6263_v24, %v4318_v25  ;;  %v1955_v44 = vpop.f32.mrb[105].mxu0  ;;  %v2985_v62 = vpack.c.bf16 %v6363_v41, %v6350_v21  ;;  %4992 = vtanh.f32 %v2340_v27  ;;  %v2359_v27 = vadd.f32 %v6263_v24, %v2358_v5 }
 0x297   : > { %v6382_v10 = vpop.eup %4974  ;;  %v1956_v18 = vadd.f32 %v6263_v24, %v1955_v44  ;;  %v4319_v39 = vpop.f32.mrb[106].mxu0  ;;  %4994 = vtanh.f32 %v2351_v2 }
 0x298   : > { %v6387_v52 = vpop.eup %4976  ;;  %4996 = vtanh.f32 %v1964_v54  ;;  %v1967_v50 = vadd.f32 %v6263_v24, %v4319_v39  ;;  %v1958_v57 = vpop.f32.mrb[107].mxu0  ;;  %3828 = vmatmul.mubr.msk.bf16.vlgmr.msra.gmra.mrb[76].mxu1 %vm3826_vm10, %v6054_v60 }
 0x299   : > { %v6397_v46 = vpop.eup %4978  ;;  %4998 = vtanh.f32 %v1956_v18  ;;  %v1959_v8 = vadd.f32 %v6263_v24, %v1958_v57  ;;  %3831 = vmatprep.mubr.msk.bf16.mxu1 %vm3829_vm11, %v5896_v38  ;;  %v4422_v33 = vpop.f32.mrb[20].mxu1 }
 0x29a   : > { %v6406_v49 = vpop.eup %4980  ;;  %5000 = vtanh.f32 %v1967_v50  ;;  %v2380_v44 = vadd.f32 %v6263_v24, %v4422_v33  ;;  %v2371_v18 = vpop.f32.mrb[21].mxu1 }
 0x29b   : > { %v6408_v48 = vpop.eup %4982  ;;  %5002 = vtanh.f32 %v1959_v8  ;;  %v2372_v57 = vadd.f32 %v6263_v24, %v2371_v18 }
 0x29c   : > { %v6413_v63 = vpop.eup %4984  ;;  %5004 = vtanh.f32 %v2343_v61  ;;  %v4423_v61 = vpop.f32.mrb[22].mxu1 }
 0x29d   : > { %v6416_v1 = vpop.eup %4986  ;;  %v4322_v4 = vpop.f32.mrb[108].mxu0  ;;  %5006 = vtanh.f32 %v2364_v20  ;;  %v2383_v51 = vadd.f32 %v6263_v24, %v4423_v61 }
 0x29e   : > { %v6421_v9 = vpop.eup %4988  ;;  %v1980_v0 = vadd.f32 %v6263_v24, %v4322_v4  ;;  %v1971_v23 = vpop.f32.mrb[109].mxu0  ;;  %5008 = vtanh.f32 %v2356_v26 }
 0x29f   : > { %v6426_v17 = vpop.eup %4990  ;;  %v1972_v15 = vadd.f32 %v6263_v24, %v1971_v23  ;;  %v4323_v30 = vpop.f32.mrb[110].mxu0  ;;  %5010 = vtanh.f32 %v2367_v3 }
 0x2a0   : > { %7222 = vst [vmem:[#allocation27_spill] sm:$0xff] %v6426_v17  ;;  %v6431_v37 = vpop.eup %4992  ;;  %5012 = vtanh.f32 %v1980_v0  ;;  %v1983_v7 = vadd.f32 %v6263_v24, %v4323_v30  ;;  %v1974_v13 = vpop.f32.mrb[111].mxu0 }
 0x2a1   : > { %7223 = vst [vmem:[#allocation28_spill] sm:$0xff] %v6431_v37  ;;  %v6435_v32 = vpop.eup %4994  ;;  %5014 = vtanh.f32 %v1972_v15  ;;  %v1975_v25 = vadd.f32 %v6263_v24, %v1974_v13  ;;  %v2374_v26 = vpop.f32.mrb[23].mxu1 }
 0x2a2   : > { %7224 = vst [vmem:[#allocation29_spill] sm:$0xff] %v6435_v32  ;;  %v6438_v2 = vpop.eup %4996  ;;  %5016 = vtanh.f32 %v1983_v7 }
 0x2a3   : > { %v6440_v54 = vpop.eup %4998  ;;  %5018 = vtanh.f32 %v1975_v25  ;;  %v2375_v25 = vadd.f32 %v6263_v24, %v2374_v26 }
 0x2a4   : > { %v6445_v50 = vpop.eup %5000  ;;  %5020 = vtanh.f32 %v2359_v27 }
 0x2a5   : > { %v6448_v8 = vpop.eup %5002  ;;  %v4326_v55 = vpop.f32.mrb[112].mxu0  ;;  %5022 = vtanh.f32 %v2380_v44 }
 0x2a6   : > { %v6453_v40 = vpop.eup %5004  ;;  %v1996_v4 = vadd.f32 %v6263_v24, %v4326_v55  ;;  %v1987_v3 = vpop.f32.mrb[113].mxu0  ;;  %5024 = vtanh.f32 %v2372_v57 }
 0x2a7   : > { %7225 = vst [vmem:[#allocation30_spill] sm:$0xff] %v6453_v40  ;;  %v6458_v0 = vpop.eup %5006  ;;  %v1988_v23 = vadd.f32 %v6263_v24, %v1987_v3  ;;  %v4327_v15 = vpop.f32.mrb[114].mxu0  ;;  %5026 = vtanh.f32 %v2383_v51 }
 0x2a8   : > { %7226 = vst [vmem:[#allocation31_spill] sm:$0xff] %v6458_v0  ;;  %v6463_v7 = vpop.eup %5008  ;;  %5028 = vtanh.f32 %v1996_v4  ;;  %v1999_v13 = vadd.f32 %v6263_v24, %v4327_v15  ;;  %v1990_v27 = vpop.f32.mrb[115].mxu0 }
 0x2a9   : > { %7227 = vst [vmem:[#allocation32_spill] sm:$0xff] %v6463_v7  ;;  %v6467_v33 = vpop.eup %5010  ;;  %5030 = vtanh.f32 %v1988_v23  ;;  %v1991_v44 = vadd.f32 %v6263_v24, %v1990_v27  ;;  %v4426_v57 = vpop.f32.mrb[24].mxu1 }
 0x2aa   : > { %7228 = vst [vmem:[#allocation33_spill] sm:$0xff] %v6467_v33  ;;  %v6470_v18 = vpop.eup %5012  ;;  %5032 = vtanh.f32 %v1999_v13  ;;  %v2396_v55 = vadd.f32 %v6263_v24, %v4426_v57  ;;  %v2387_v51 = vpop.f32.mrb[25].mxu1  ;;  %v2830_v33 = vadd.s32 1152, %v5888_v31 }
 0x2ab   : > { %v6472_v61 = vpop.eup %5014  ;;  %5034 = vtanh.f32 %v1991_v44  ;;  %v2388_v26 = vadd.f32 %v6263_v24, %v2387_v51  ;;  %v4427_v23 = vpop.f32.mrb[26].mxu1 }
 0x2ac   : > { %v6477_v3 = vpop.eup %5016  ;;  %5036 = vtanh.f32 %v2375_v25  ;;  %v2399_v44 = vadd.f32 %v6263_v24, %v4427_v23  ;;  %v2390_v57 = vpop.f32.mrb[27].mxu1 }
 0x2ad   : > { %v6480_v15 = vpop.eup %5018  ;;  %v4330_v27 = vpop.f32.mrb[116].mxu0  ;;  %5038 = vtanh.f32 %v2396_v55  ;;  %v2391_v43 = vadd.f32 %v6263_v24, %v2390_v57 }
 0x2ae   : > { %v6485_v39 = vpop.eup %5020  ;;  %v2012_v4 = vadd.f32 %v6263_v24, %v4330_v27  ;;  %v2003_v30 = vpop.f32.mrb[117].mxu0  ;;  %5040 = vtanh.f32 %v2388_v26 }
 0x2af   : > { %7229 = vst [vmem:[#allocation34_spill] sm:$0xff] %v6485_v39  ;;  %v6490_v51 = vpop.eup %5022  ;;  %v2004_v56 = vadd.f32 %v6263_v24, %v2003_v30  ;;  %v4331_v19 = vpop.f32.mrb[118].mxu0  ;;  %5042 = vtanh.f32 %v2399_v44 }
 0x2b0   : > { %v6495_v23 = vpop.eup %5024  ;;  %5044 = vtanh.f32 %v2012_v4  ;;  %v2015_v42 = vadd.f32 %v6263_v24, %v4331_v19  ;;  %v2006_v27 = vpop.f32.mrb[119].mxu0 }
 0x2b1   : > { %v6499_v58 = vpop.eup %5026  ;;  %5046 = vtanh.f32 %v2004_v56  ;;  %v2007_v26 = vadd.f32 %v6263_v24, %v2006_v27  ;;  %v4430_v30 = vpop.f32.mrb[28].mxu1 }
 0x2b2   : > { %v5029_v53 = vpop.eup %5028  ;;  %5048 = vtanh.f32 %v2015_v42  ;;  %v2412_v55 = vadd.f32 %v6263_v24, %v4430_v30  ;;  %v2403_v13 = vpop.f32.mrb[29].mxu1 }
 0x2b3   : > { %v5031_v44 = vpop.eup %5030  ;;  %5050 = vtanh.f32 %v2007_v26  ;;  %v2404_v57 = vadd.f32 %v6263_v24, %v2403_v13  ;;  %v4431_v25 = vpop.f32.mrb[30].mxu1 }
 0x2b4   : > { %v5033_v19 = vpop.eup %5032  ;;  %5052 = vtanh.f32 %v2391_v43  ;;  %v2415_v42 = vadd.f32 %v6263_v24, %v4431_v25  ;;  %v2406_v27 = vpop.f32.mrb[31].mxu1 }
 0x2b5   : > { %v5035_v20 = vpop.eup %5034  ;;  %v4334_v56 = vpop.f32.mrb[120].mxu0  ;;  %v2994_v5 = vpack.c.bf16 %v5033_v19, %v5029_v53  ;;  %5054 = vtanh.f32 %v2412_v55 }
 0x2b6   : > { %v6507_v16 = vpop.eup %5036  ;;  %v2028_v26 = vadd.f32 %v6263_v24, %v4334_v56  ;;  %v2019_v30 = vpop.f32.mrb[121].mxu0  ;;  %v2993_v14 = vpack.c.bf16 %v5035_v20, %v5031_v44  ;;  %5056 = vtanh.f32 %v2404_v57  ;;  %v2407_v56 = vadd.f32 %v6263_v24, %v2406_v27 }
 0x2b7   : > { %v6510_v4 = vpop.eup %5038  ;;  %v2020_v43 = vadd.f32 %v6263_v24, %v2019_v30  ;;  %v4335_v13 = vpop.f32.mrb[122].mxu0  ;;  %5058 = vtanh.f32 %v2415_v42 }
 0x2b8   : > { %v6515_v55 = vpop.eup %5040  ;;  %5060 = vtanh.f32 %v2028_v26  ;;  %v2031_v25 = vadd.f32 %v6263_v24, %v4335_v13  ;;  %v2022_v19 = vpop.f32.mrb[123].mxu0  ;;  %4077 = vmatprep.subr.bf16.mxu1 %v2993_v14 }
 0x2b9   : > { %v6519_v20 = vpop.eup %5042  ;;  %5062 = vtanh.f32 %v2020_v43  ;;  %v2023_v44 = vadd.f32 %v6263_v24, %v2022_v19  ;;  %4078 = vmatpush3.bf16.msra.mxu1 %v2985_v62  ;;  %v4434_v42 = vpop.f32.mrb[32].mxu1 }
 0x2ba   : > { %v5045_v57 = vpop.eup %5044  ;;  %5064 = vtanh.f32 %v2031_v25  ;;  %4079 = vmatprep.subr.bf16.mxu1 %v2994_v5  ;;  %v2428_v30 = vadd.f32 %v6263_v24, %v4434_v42  ;;  %v2419_v14 = vpop.f32.mrb[33].mxu1 }
 0x2bb   : > { %v5047_v26 = vpop.eup %5046  ;;  %5066 = vtanh.f32 %v2023_v44  ;;  %v2420_v43 = vadd.f32 %v6263_v24, %v2419_v14  ;;  %v4435_v19 = vpop.f32.mrb[34].mxu1 }
 0x2bc   : > { %v5049_v13 = vpop.eup %5048  ;;  %5068 = vtanh.f32 %v2407_v56  ;;  %v2431_v62 = vadd.f32 %v6263_v24, %v4435_v19  ;;  %v2422_v5 = vpop.f32.mrb[35].mxu1 }
 0x2bd   : > { %v5051_v53 = vpop.eup %5050  ;;  %v4338_v21 = vpop.f32.mrb[124].mxu0  ;;  %4080 = vmatpush3.bf16.msra.mxu1 %v2986_v28  ;;  %v2996_v41 = vpack.c.bf16 %v5049_v13, %v5045_v57  ;;  %5070 = vtanh.f32 %v2428_v30  ;;  %v2423_v30 = vadd.f32 %v6263_v24, %v2422_v5  ;;  %v7232_v13 = vpack.c.bf16 %v6416_v1, %v6408_v48 }
 0x2be   : > { %v6533_v25 = vpop.eup %5052  ;;  %v2044_v44 = vadd.f32 %v6263_v24, %v4338_v21  ;;  %v2035_v42 = vpop.f32.mrb[125].mxu0  ;;  %v2995_v56 = vpack.c.bf16 %v5051_v53, %v5047_v26  ;;  %5072 = vtanh.f32 %v2420_v43 }
 0x2bf   : > { %v6536_v14 = vpop.eup %5054  ;;  %v2036_v27 = vadd.f32 %v6263_v24, %v2035_v42  ;;  %v4339_v0 = vpop.f32.mrb[126].mxu0  ;;  %5074 = vtanh.f32 %v2431_v62 }
 0x2c0   : > { %7230 = vst [vmem:[#allocation35_spill] sm:$0xff] %v6536_v14  ;;  %v6541_v22 = vpop.eup %5056  ;;  %5076 = vtanh.f32 %v2044_v44  ;;  %v2047_v28 = vadd.f32 %v6263_v24, %v4339_v0  ;;  %v2038_v57 = vpop.f32.mrb[127].mxu0  ;;  %4081 = vmatprep.subr.bf16.mxu1 %v2995_v56 }
 0x2c1   : > { %v6545_v53 = vpop.eup %5058  ;;  %5078 = vtanh.f32 %v2036_v27  ;;  %v2039_v26 = vadd.f32 %v6263_v24, %v2038_v57  ;;  %4082 = vmatpush3.bf16.msra.mxu1 %v7232_v13  ;;  %v4438_v43 = vpop.f32.mrb[36].mxu1 }
 0x2c2   : > { %7231 = vst [vmem:[#allocation36_spill] sm:$0xff] %v6545_v53  ;;  %v5061_v19 = vpop.eup %5060  ;;  %5080 = vtanh.f32 %v2047_v28  ;;  %4083 = vmatprep.subr.bf16.mxu1 %v2996_v41  ;;  %v2444_v21 = vadd.f32 %v6263_v24, %v4438_v43  ;;  %v2435_v0 = vpop.f32.mrb[37].mxu1  ;;  %v7233_v41 = vpack.c.bf16 %v6413_v63, %v6406_v49 }
 0x2c3   : > { %v5063_v62 = vpop.eup %5062  ;;  %5082 = vtanh.f32 %v2039_v26  ;;  %v2436_v5 = vadd.f32 %v6263_v24, %v2435_v0  ;;  %v4439_v44 = vpop.f32.mrb[38].mxu1  ;;  %v2827_v26 = vadd.s32 768, %v5888_v31 }
 0x2c4   : > { %v5065_v42 = vpop.eup %5064  ;;  %5084 = vtanh.f32 %v2423_v30  ;;  %v2447_v48 = vadd.f32 %v6263_v24, %v4439_v44  ;;  %v2438_v1 = vpop.f32.mrb[39].mxu1 }
 0x2c5   : > { %v5067_v56 = vpop.eup %5066  ;;  %v4342_v57 = vpop.f32.mrb[128].mxu0  ;;  %4084 = vmatpush3.bf16.msra.mxu1 %v7233_v41  ;;  %v2998_v28 = vpack.c.bf16 %v5065_v42, %v5061_v19  ;;  %5086 = vtanh.f32 %v2444_v21 }
 0x2c6   : > { %v6560_v13 = vpop.eup %5068  ;;  %v2060_v43 = vadd.f32 %v6263_v24, %v4342_v57  ;;  %v2051_v0 = vpop.f32.mrb[129].mxu0  ;;  %v2997_v27 = vpack.c.bf16 %v5067_v56, %v5063_v62  ;;  %5088 = vtanh.f32 %v2436_v5  ;;  %v2439_v62 = vadd.f32 %v6263_v24, %v2438_v1 }
 0x2c7   : > { %v6563_v30 = vpop.eup %5070  ;;  %v2052_v44 = vadd.f32 %v6263_v24, %v2051_v0  ;;  %v4343_v12 = vpop.f32.mrb[130].mxu0  ;;  %5090 = vtanh.f32 %v2447_v48  ;;  %v7237_v48 = vpack.c.bf16 %v6448_v8, %v6440_v54  ;;  %v2846_v56 = vsub.s32 %v2827_v26, %v5891_v34 }
 0x2c8   : > { %7234 = vst [vmem:[#allocation37_spill] sm:$0xff] %v6563_v30  ;;  %v6569_v63 = vpop.eup %5072  ;;  %5092 = vtanh.f32 %v2060_v43  ;;  %v2063_v19 = vadd.f32 %v6263_v24, %v4343_v12  ;;  %v2054_v21 = vpop.f32.mrb[131].mxu0  ;;  %4085 = vmatprep.subr.bf16.mxu1 %v2997_v27  ;;  %v2849_v1 = vsub.s32 %v2830_v33, %v5891_v34 }
 0x2c9   : > { %7235 = vst [vmem:[#allocation38_spill] sm:$0xff] %v6569_v63  ;;  %v6573_v5 = vpop.eup %5074  ;;  %5094 = vtanh.f32 %v2052_v44  ;;  %v2055_v42 = vadd.f32 %v6263_v24, %v2054_v21  ;;  %4086 = vmatpush3.bf16.msra.mxu1 %v7237_v48  ;;  %v4442_v57 = vpop.f32.mrb[40].mxu1  ;;  %v7238_v48 = vpack.c.bf16 %v6445_v50, %v6438_v2  ;;  %vm2862_vm12 = vcmp.ge.s32.totalorder %v2846_v56, 0 }
 0x2ca   : > { %7236 = vst [vmem:[#allocation39_spill] sm:$0xff] %v6573_v5  ;;  %v5077_v41 = vpop.eup %5076  ;;  %5096 = vtanh.f32 %v2063_v19  ;;  %4087 = vmatprep.subr.bf16.mxu1 %v2998_v28  ;;  %v2460_v12 = vadd.f32 %v6263_v24, %v4442_v57  ;;  %v2451_v27 = vpop.f32.mrb[41].mxu1  ;;  %vm2878_vm13 = vcmp.lt.s32.totalorder %v2846_v56, 256  ;;  %vm2865_vm14 = vcmp.ge.s32.totalorder %v2849_v1, 0 }
 0x2cb   : > { %v5079_v43 = vpop.eup %5078  ;;  %5098 = vtanh.f32 %v2055_v42  ;;  %v2452_v0 = vadd.f32 %v6263_v24, %v2451_v27  ;;  %v4443_v44 = vpop.f32.mrb[42].mxu1  ;;  %vm2881_vm15 = vcmp.lt.s32.totalorder %v2849_v1, 256  ;;  %vm6611_vm0 = vmand %vm2862_vm12, %vm2878_vm13  ;;  %v7248_v1 = vpack.c.bf16 %v6477_v3, %v6470_v18 }
 0x2cc   : > { %v5081_v8 = vpop.eup %5080  ;;  %5100 = vtanh.f32 %v2439_v62  ;;  %v2463_v26 = vadd.f32 %v6263_v24, %v4443_v44  ;;  %v2454_v21 = vpop.f32.mrb[43].mxu1  ;;  %vm6620_vm1 = vmand %vm2865_vm14, %vm2881_vm15 }
 0x2cd   : > { %v5083_v19 = vpop.eup %5082  ;;  %v4346_v28 = vpop.f32.mrb[132].mxu0  ;;  %4088 = vmatpush3.bf16.msra.mxu1 %v7238_v48  ;;  %v3000_v42 = vpack.c.bf16 %v5081_v8, %v5077_v41  ;;  %5102 = vtanh.f32 %v2460_v12  ;;  %vm3832_vm2 = vmpackc.low %vm6611_vm0, %vm6611_vm0 }
 0x2ce   : > { %v6589_v33 = vpop.eup %5084  ;;  %v2076_v57 = vadd.f32 %v6263_v24, %v4346_v28  ;;  %v2067_v27 = vpop.f32.mrb[133].mxu0  ;;  %v2999_v54 = vpack.c.bf16 %v5083_v19, %v5079_v43  ;;  %5104 = vtanh.f32 %v2452_v0  ;;  %v2455_v43 = vadd.f32 %v6263_v24, %v2454_v21  ;;  %vm3835_vm3 = vmpackc.low %vm6620_vm1, %vm6620_vm1 }
 0x2cf   : > { %7239 = vst [vmem:[#allocation40_spill] sm:$0xff] %v6589_v33  ;;  %v6592_v62 = vpop.eup %5086  ;;  %v2068_v44 = vadd.f32 %v6263_v24, %v2067_v27  ;;  %v4347_v49 = vpop.f32.mrb[134].mxu0  ;;  %5106 = vtanh.f32 %v2463_v26  ;;  %v7243_v26 = vpack.c.bf16 %v6480_v15, %v6472_v61 }
 0x2d0   : > { %7240 = vst [vmem:[#allocation41_spill] sm:$0xff] %v6592_v62  ;;  %v6597_v50 = vpop.eup %5088  ;;  %5108 = vtanh.f32 %v2076_v57  ;;  %v2079_v41 = vadd.f32 %v6263_v24, %v4347_v49  ;;  %v2070_v12 = vpop.f32.mrb[135].mxu0  ;;  %4089 = vmatprep.subr.bf16.mxu1 %v2999_v54  ;;  %v6674_v49 = vld [vmem:[#allocation9] ss:$0 sm:$0xff] }
 0x2d1   : > { %7241 = vst [vmem:[#allocation42_spill] sm:$0xff] %v6597_v50  ;;  %v6601_v0 = vpop.eup %5090  ;;  %5110 = vtanh.f32 %v2068_v44  ;;  %v2071_v8 = vadd.f32 %v6263_v24, %v2070_v12  ;;  %4090 = vmatpush3.bf16.msra.mxu1 %v7243_v26  ;;  %v4446_v19 = vpop.f32.mrb[44].mxu1 }
 0x2d2   : > { %7242 = vst [vmem:[#allocation43_spill] sm:$0xff] %v6601_v0  ;;  %v6607_v28 = vpop.eup %5092  ;;  %5112 = vtanh.f32 %v2079_v41  ;;  %4091 = vmatprep.subr.bf16.mxu1 %v3000_v42  ;;  %v2476_v54 = vadd.f32 %v6263_v24, %v4446_v19  ;;  %v2467_v21 = vpop.f32.mrb[45].mxu1 }
 0x2d3   : > { %v6616_v48 = vpop.eup %5094  ;;  %5114 = vtanh.f32 %v2071_v8  ;;  %v2468_v15 = vadd.f32 %v6263_v24, %v2467_v21  ;;  %v4447_v42 = vpop.f32.mrb[46].mxu1 }
 0x2d4   : > { %v6627_v57 = vpop.eup %5096  ;;  %5116 = vtanh.f32 %v2455_v43  ;;  %v2479_v27 = vadd.f32 %v6263_v24, %v4447_v42  ;;  %v2470_v44 = vpop.f32.mrb[47].mxu1 }
 0x2d5   : > { %v6630_v41 = vpop.eup %5098  ;;  %v4350_v12 = vpop.f32.mrb[136].mxu0  ;;  %4092 = vmatpush3.bf16.msra.mxu1 %v7248_v1  ;;  %5118 = vtanh.f32 %v2476_v54 }
 0x2d6   : > { %v6640_v26 = vpop.eup %5100  ;;  %v2092_v43 = vadd.f32 %v6263_v24, %v4350_v12  ;;  %v2083_v19 = vpop.f32.mrb[137].mxu0  ;;  %5120 = vtanh.f32 %v2468_v15  ;;  %v2471_v15 = vadd.f32 %v6263_v24, %v2470_v44 }
 0x2d7   : > { %7249 = vst [vmem:[#allocation44_spill] sm:$0xff] %v6640_v26  ;;  %v6648_v18 = vpop.eup %5102  ;;  %v2084_v3 = vadd.f32 %v6263_v24, %v2083_v19  ;;  %v4351_v42 = vpop.f32.mrb[138].mxu0  ;;  %5122 = vtanh.f32 %v2479_v27 }
 0x2d8   : > { %7250 = vst [vmem:[#allocation45_spill] sm:$0xff] %v6648_v18  ;;  %v6653_v1 = vpop.eup %5104  ;;  %5124 = vtanh.f32 %v2092_v43  ;;  %v2095_v12 = vadd.f32 %v6263_v24, %v4351_v42  ;;  %v2086_v56 = vpop.f32.mrb[139].mxu0  ;;  %3834 = vmatmul.mubr.msk.bf16.vlgmr.msra.gmra.mrb[80].mxu1 %vm3832_vm2, %v6054_v60 }
 0x2d9   : > { %7251 = vst [vmem:[#allocation46_spill] sm:$0xff] %v6653_v1  ;;  %v6663_v19 = vpop.eup %5106  ;;  %5126 = vtanh.f32 %v2084_v3  ;;  %v2087_v27 = vadd.f32 %v6263_v24, %v2086_v56  ;;  %3837 = vmatprep.mubr.msk.bf16.mxu1 %vm3835_vm3, %v5896_v38  ;;  %v4450_v43 = vpop.f32.mrb[48].mxu1 }
 0x2da   : > { %7252 = vst [vmem:[#allocation47_spill] sm:$0xff] %v6663_v19  ;;  %v6672_v42 = vpop.eup %5108  ;;  %5128 = vtanh.f32 %v2095_v12  ;;  %v2492_v44 = vadd.f32 %v6674_v49, %v4450_v43  ;;  %v2483_v54 = vpop.f32.mrb[49].mxu1 }
 0x2db   : > { %v6677_v2 = vpop.eup %5110  ;;  %5130 = vtanh.f32 %v2087_v27  ;;  %v2484_v24 = vadd.f32 %v6674_v49, %v2483_v54  ;;  %v4451_v56 = vpop.f32.mrb[50].mxu1 }
 0x2dc   : > { %v6682_v3 = vpop.eup %5112  ;;  %5132 = vtanh.f32 %v2471_v15  ;;  %v2495_v8 = vadd.f32 %v6674_v49, %v4451_v56  ;;  %v2486_v12 = vpop.f32.mrb[51].mxu1 }
 0x2dd   : > { %v6685_v21 = vpop.eup %5114  ;;  %v4354_v62 = vpop.f32.mrb[140].mxu0  ;;  %5134 = vtanh.f32 %v2492_v44  ;;  %v2487_v50 = vadd.f32 %v6674_v49, %v2486_v12 }
 0x2de   : > { %v6689_v27 = vpop.eup %5116  ;;  %v2108_v54 = vadd.f32 %v6674_v49, %v4354_v62  ;;  %v2099_v0 = vpop.f32.mrb[141].mxu0  ;;  %5136 = vtanh.f32 %v2484_v24 }
 0x2df   : > { %7253 = vst [vmem:[#allocation48_spill] sm:$0xff] %v6689_v27  ;;  %v6694_v15 = vpop.eup %5118  ;;  %v2100_v56 = vadd.f32 %v6674_v49, %v2099_v0  ;;  %v4355_v18 = vpop.f32.mrb[142].mxu0  ;;  %5138 = vtanh.f32 %v2495_v8 }
 0x2e0   : > { %7254 = vst [vmem:[#allocation49_spill] sm:$0xff] %v6694_v15  ;;  %v6699_v43 = vpop.eup %5120  ;;  %5140 = vtanh.f32 %v2108_v54  ;;  %v2111_v44 = vadd.f32 %v6674_v49, %v4355_v18  ;;  %v2102_v62 = vpop.f32.mrb[143].mxu0 }
 0x2e1   : > { %7255 = vst [vmem:[#allocation50_spill] sm:$0xff] %v6699_v43  ;;  %v6703_v26 = vpop.eup %5122  ;;  %5142 = vtanh.f32 %v2100_v56  ;;  %v2103_v24 = vadd.f32 %v6674_v49, %v2102_v62  ;;  %v4454_v61 = vpop.f32.mrb[52].mxu1 }
 0x2e2   : > { %7256 = vst [vmem:[#allocation51_spill] sm:$0xff] %v6703_v26  ;;  %v6706_v0 = vpop.eup %5124  ;;  %5144 = vtanh.f32 %v2111_v44  ;;  %v2508_v8 = vadd.f32 %v6674_v49, %v4454_v61  ;;  %v2499_v19 = vpop.f32.mrb[53].mxu1 }
 0x2e3   : > { %v6709_v1 = vpop.eup %5126  ;;  %5146 = vtanh.f32 %v2103_v24  ;;  %v2500_v18 = vadd.f32 %v6674_v49, %v2499_v19  ;;  %v4455_v54 = vpop.f32.mrb[54].mxu1 }
 0x2e4   : > { %v6714_v27 = vpop.eup %5128  ;;  %5148 = vtanh.f32 %v2487_v50  ;;  %v2511_v56 = vadd.f32 %v6674_v49, %v4455_v54  ;;  %v2502_v62 = vpop.f32.mrb[55].mxu1 }
 0x2e5   : > { %v6717_v30 = vpop.eup %5130  ;;  %v4358_v44 = vpop.f32.mrb[144].mxu0  ;;  %5150 = vtanh.f32 %v2508_v8  ;;  %v2503_v7 = vadd.f32 %v6674_v49, %v2502_v62 }
 0x2e6   : > { %v6721_v24 = vpop.eup %5132  ;;  %v2124_v19 = vadd.f32 %v6674_v49, %v4358_v44  ;;  %v2115_v5 = vpop.f32.mrb[145].mxu0  ;;  %5152 = vtanh.f32 %v2500_v18 }
 0x2e7   : > { %7257 = vst [vmem:[#allocation52_spill] sm:$0xff] %v6721_v24  ;;  %v6726_v50 = vpop.eup %5134  ;;  %v2116_v54 = vadd.f32 %v6674_v49, %v2115_v5  ;;  %v4359_v15 = vpop.f32.mrb[146].mxu0  ;;  %5154 = vtanh.f32 %v2511_v56 }
 0x2e8   : > { %7258 = vst [vmem:[#allocation53_spill] sm:$0xff] %v6726_v50  ;;  %v6731_v61 = vpop.eup %5136  ;;  %5156 = vtanh.f32 %v2124_v19  ;;  %v2127_v8 = vadd.f32 %v6674_v49, %v4359_v15  ;;  %v2118_v44 = vpop.f32.mrb[147].mxu0 }
 0x2e9   : > { %7259 = vst [vmem:[#allocation54_spill] sm:$0xff] %v6731_v61  ;;  %v6735_v39 = vpop.eup %5138  ;;  %5158 = vtanh.f32 %v2116_v54  ;;  %v2119_v18 = vadd.f32 %v6674_v49, %v2118_v44  ;;  %v4458_v12 = vpop.f32.mrb[56].mxu1 }
 0x2ea   : > { %7260 = vst [vmem:[#allocation55_spill] sm:$0xff] %v6735_v39  ;;  %v6738_v5 = vpop.eup %5140  ;;  %5160 = vtanh.f32 %v2127_v8  ;;  %v2524_v56 = vadd.f32 %v6674_v49, %v4458_v12  ;;  %v2515_v26 = vpop.f32.mrb[57].mxu1 }
 0x2eb   : > { %v6741_v43 = vpop.eup %5142  ;;  %5162 = vtanh.f32 %v2119_v18  ;;  %v2516_v15 = vadd.f32 %v6674_v49, %v2515_v26  ;;  %v4459_v19 = vpop.f32.mrb[58].mxu1 }
 0x2ec   : > { %v6746_v24 = vpop.eup %5144  ;;  %5164 = vtanh.f32 %v2503_v7  ;;  %v2527_v54 = vadd.f32 %v6674_v49, %v4459_v19  ;;  %v2518_v44 = vpop.f32.mrb[59].mxu1 }
 0x2ed   : > { %v6749_v63 = vpop.eup %5146  ;;  %v4362_v8 = vpop.f32.mrb[148].mxu0  ;;  %5166 = vtanh.f32 %v2524_v56  ;;  %v2519_v17 = vadd.f32 %v6674_v49, %v2518_v44 }
 0x2ee   : > { %v6753_v18 = vpop.eup %5148  ;;  %v2140_v26 = vadd.f32 %v6674_v49, %v4362_v8  ;;  %v2131_v33 = vpop.f32.mrb[149].mxu0  ;;  %5168 = vtanh.f32 %v2516_v15 }
 0x2ef   : > { %7261 = vst [vmem:[#allocation56_spill] sm:$0xff] %v6753_v18  ;;  %v6758_v7 = vpop.eup %5150  ;;  %v2132_v19 = vadd.f32 %v6674_v49, %v2131_v33  ;;  %v4363_v50 = vpop.f32.mrb[150].mxu0  ;;  %5170 = vtanh.f32 %v2527_v54 }
 0x2f0   : > { %7262 = vst [vmem:[#allocation57_spill] sm:$0xff] %v6758_v7  ;;  %v6763_v12 = vpop.eup %5152  ;;  %5172 = vtanh.f32 %v2140_v26  ;;  %v2143_v56 = vadd.f32 %v6674_v49, %v4363_v50  ;;  %v2134_v8 = vpop.f32.mrb[151].mxu0 }
 0x2f1   : > { %v6767_v32 = vpop.eup %5154  ;;  %5174 = vtanh.f32 %v2132_v19  ;;  %v2135_v15 = vadd.f32 %v6674_v49, %v2134_v8  ;;  %v4462_v62 = vpop.f32.mrb[60].mxu1 }
 0x2f2   : > { %7263 = vst [vmem:[#allocation58_spill] sm:$0xff] %v6767_v32  ;;  %v5157_v33 = vpop.eup %5156  ;;  %5176 = vtanh.f32 %v2143_v56  ;;  %v2540_v54 = vadd.f32 %v6674_v49, %v4462_v62  ;;  %v2531_v14 = vpop.f32.mrb[61].mxu1 }
 0x2f3   : > { %v5159_v39 = vpop.eup %5158  ;;  %5178 = vtanh.f32 %v2135_v15  ;;  %v2532_v26 = vadd.f32 %v6674_v49, %v2531_v14  ;;  %v4463_v61 = vpop.f32.mrb[62].mxu1 }
 0x2f4   : > { %v5161_v44 = vpop.eup %5160  ;;  %5180 = vtanh.f32 %v2519_v17  ;;  %v2543_v19 = vadd.f32 %v6674_v49, %v4463_v61  ;;  %v2534_v18 = vpop.f32.mrb[63].mxu1 }
 0x2f5   : > { %v5163_v8 = vpop.eup %5162  ;;  %v4366_v53 = vpop.f32.mrb[152].mxu0  ;;  %v3010_v37 = vpack.c.bf16 %v5161_v44, %v5157_v33  ;;  %5182 = vtanh.f32 %v2540_v54  ;;  %v7265_v44 = vpack.c.bf16 %v6630_v41, %v6616_v48 }
 0x2f6   : > { %v6775_v56 = vpop.eup %5164  ;;  %v2156_v62 = vadd.f32 %v6674_v49, %v4366_v53  ;;  %v2147_v15 = vpop.f32.mrb[153].mxu0  ;;  %v3009_v40 = vpack.c.bf16 %v5163_v8, %v5159_v39  ;;  %5184 = vtanh.f32 %v2532_v26  ;;  %v2535_v53 = vadd.f32 %v6674_v49, %v2534_v18 }
 0x2f7   : > { %v6778_v14 = vpop.eup %5166  ;;  %v2148_v50 = vadd.f32 %v6674_v49, %v2147_v15  ;;  %v4367_v7 = vpop.f32.mrb[154].mxu0  ;;  %5186 = vtanh.f32 %v2543_v19 }
 0x2f8   : > { %7264 = vst [vmem:[#allocation59_spill] sm:$0xff] %v6778_v14  ;;  %v6783_v61 = vpop.eup %5168  ;;  %5188 = vtanh.f32 %v2156_v62  ;;  %v2159_v33 = vadd.f32 %v6674_v49, %v4367_v7  ;;  %v2150_v54 = vpop.f32.mrb[155].mxu0  ;;  %4099 = vmatprep.subr.bf16.mxu1 %v3009_v40  ;;  %v2829_v14 = vadd.s32 1024, %v5888_v31 }
 0x2f9   : > { %v6787_v39 = vpop.eup %5170  ;;  %5190 = vtanh.f32 %v2148_v50  ;;  %v2151_v26 = vadd.f32 %v6674_v49, %v2150_v54  ;;  %4100 = vmatpush3.bf16.msra.mxu1 %v7265_v44  ;;  %v4466_v19 = vpop.f32.mrb[64].mxu1 }
 0x2fa   : > { %v5173_v8 = vpop.eup %5172  ;;  %5192 = vtanh.f32 %v2159_v33  ;;  %4101 = vmatprep.subr.bf16.mxu1 %v3010_v37  ;;  %v2556_v62 = vadd.f32 %v6674_v49, %v4466_v19  ;;  %v2547_v7 = vpop.f32.mrb[65].mxu1  ;;  %v7266_v37 = vpack.c.bf16 %v6627_v57, %v6607_v28 }
 0x2fb   : > { %v5175_v15 = vpop.eup %5174  ;;  %5194 = vtanh.f32 %v2151_v26  ;;  %v2548_v40 = vadd.f32 %v6674_v49, %v2547_v7  ;;  %v4467_v18 = vpop.f32.mrb[66].mxu1 }
 0x2fc   : > { %v5177_v54 = vpop.eup %5176  ;;  %5196 = vtanh.f32 %v2535_v53  ;;  %v2559_v48 = vadd.f32 %v6674_v49, %v4467_v18  ;;  %v2550_v41 = vpop.f32.mrb[67].mxu1 }
 0x2fd   : > { %v5179_v44 = vpop.eup %5178  ;;  %v4370_v17 = vpop.f32.mrb[156].mxu0  ;;  %4102 = vmatpush3.bf16.msra.mxu1 %v7266_v37  ;;  %v3012_v33 = vpack.c.bf16 %v5177_v54, %v5173_v8  ;;  %5198 = vtanh.f32 %v2556_v62 }
 0x2fe   : > { %v6801_v26 = vpop.eup %5180  ;;  %v2172_v19 = vadd.f32 %v6674_v49, %v4370_v17  ;;  %v2163_v7 = vpop.f32.mrb[157].mxu0  ;;  %v3011_v32 = vpack.c.bf16 %v5179_v44, %v5175_v15  ;;  %5200 = vtanh.f32 %v2548_v40  ;;  %v2551_v17 = vadd.f32 %v6674_v49, %v2550_v41 }
 0x2ff   : > { %v6804_v50 = vpop.eup %5182  ;;  %v2164_v53 = vadd.f32 %v6674_v49, %v2163_v7  ;;  %v4371_v18 = vpop.f32.mrb[158].mxu0  ;;  %5202 = vtanh.f32 %v2559_v48  ;;  %v7270_v40 = vpack.c.bf16 %v6685_v21, %v6677_v2  ;;  %v7271_v7 = vpack.c.bf16 %v6682_v3, %v6672_v42 }
 0x300   : > { %7267 = vst [vmem:[#allocation60_spill] sm:$0xff] %v6804_v50  ;;  %v6809_v28 = vpop.eup %5184  ;;  %5204 = vtanh.f32 %v2172_v19  ;;  %v2175_v57 = vadd.f32 %v6674_v49, %v4371_v18  ;;  %v2166_v8 = vpop.f32.mrb[159].mxu0  ;;  %4103 = vmatprep.subr.bf16.mxu1 %v3011_v32 }
 0x301   : > { %7268 = vst [vmem:[#allocation61_spill] sm:$0xff] %v6809_v28  ;;  %v6813_v62 = vpop.eup %5186  ;;  %5206 = vtanh.f32 %v2164_v53  ;;  %v2167_v15 = vadd.f32 %v6674_v49, %v2166_v8  ;;  %4104 = vmatpush3.bf16.msra.mxu1 %v7270_v40  ;;  %v4027_v48 = vpop.f32.mrb[68].mxu1 }
 0x302   : > { %7269 = vst [vmem:[#allocation62_spill] sm:$0xff] %v6813_v62  ;;  %v5189_v54 = vpop.eup %5188  ;;  %5208 = vtanh.f32 %v2175_v57  ;;  %4105 = vmatprep.subr.bf16.mxu1 %v3012_v33  ;;  %v4028_v2 = vpop.f32.mrb[69].mxu1 }
 0x303   : > { %v5191_v44 = vpop.eup %5190  ;;  %5210 = vtanh.f32 %v2167_v15  ;;  %v6827_v8 = vadd.f32 %v4028_v2, %v4027_v48  ;;  %v4030_v15 = vpop.f32.mrb[70].mxu1  ;;  %v2832_v48 = vadd.s32 1408, %v5888_v31 }
 0x304   : > { %v5193_v37 = vpop.eup %5192  ;;  %5212 = vtanh.f32 %v2551_v17  ;;  %v4031_v3 = vpop.f32.mrb[71].mxu1 }
 0x305   : > { %v5195_v41 = vpop.eup %5194  ;;  %v4374_v19 = vpop.f32.mrb[160].mxu0  ;;  %4106 = vmatpush3.bf16.msra.mxu1 %v7271_v7  ;;  %v3014_v53 = vpack.c.bf16 %v5193_v37, %v5189_v54  ;;  %v7276_v7 = vpack.c.bf16 %v6717_v30, %v6709_v1  ;;  %v2851_v15 = vsub.s32 %v2832_v48, %v5891_v34 }
 0x306   : > { %v6824_v21 = vpop.eup %5196  ;;  %v2188_v33 = vadd.f32 %v6674_v49, %v4374_v19  ;;  %v2179_v18 = vpop.f32.mrb[161].mxu0  ;;  %v3013_v57 = vpack.c.bf16 %v5195_v41, %v5191_v44 }
 0x307   : > { %7272 = vst [vmem:[#allocation63_spill] sm:$0xff] %v6824_v21  ;;  %v6829_v40 = vpop.eup %5198  ;;  %v2180_v17 = vadd.f32 %v6674_v49, %v2179_v18  ;;  %v4375_v32 = vpop.f32.mrb[162].mxu0  ;;  %vm2867_vm6 = vcmp.ge.s32.totalorder %v2851_v15, 0  ;;  %vm2883_vm7 = vcmp.lt.s32.totalorder %v2851_v15, 256 }
 0x308   : > { %7273 = vst [vmem:[#allocation64_spill] sm:$0xff] %v6829_v40  ;;  %v6835_v54 = vpop.eup %5200  ;;  %5214 = vtanh.f32 %v2188_v33  ;;  %v2191_v37 = vadd.f32 %v6674_v49, %v4375_v32  ;;  %v2182_v44 = vpop.f32.mrb[163].mxu0  ;;  %4107 = vmatprep.subr.bf16.mxu1 %v3013_v57  ;;  %v2848_v32 = vsub.s32 %v2829_v14, %v5891_v34  ;;  %vm6872_vm9 = vmand %vm2867_vm6, %vm2883_vm7 }
 0x309   : > { %7274 = vst [vmem:[#allocation65_spill] sm:$0xff] %v6835_v54  ;;  %v6839_v41 = vpop.eup %5202  ;;  %5216 = vtanh.f32 %v2180_v17  ;;  %v2183_v19 = vadd.f32 %v6674_v49, %v2182_v44  ;;  %4108 = vmatpush3.bf16.msra.mxu1 %v7276_v7  ;;  %v7277_v44 = vpack.c.bf16 %v6714_v27, %v6706_v0  ;;  %vm3841_vm11 = vmpackc.low %vm6872_vm9, %vm6872_vm9 }
 0x30a   : > { %7275 = vst [vmem:[#allocation66_spill] sm:$0xff] %v6839_v41  ;;  %v5205_v2 = vpop.eup %5204  ;;  %5218 = vtanh.f32 %v2191_v37  ;;  %4109 = vmatprep.subr.bf16.mxu1 %v3014_v53  ;;  %vm2864_vm4 = vcmp.ge.s32.totalorder %v2848_v32, 0  ;;  %vm2880_vm5 = vcmp.lt.s32.totalorder %v2848_v32, 256 }
 0x30b   : > { %v5207_v18 = vpop.eup %5206  ;;  %5220 = vtanh.f32 %v2183_v19  ;;  %vm6866_vm8 = vmand %vm2864_vm4, %vm2880_vm5 }
 0x30c   : > { %v5209_v57 = vpop.eup %5208  ;;  %vm3838_vm10 = vmpackc.low %vm6866_vm8, %vm6866_vm8 }
 0x30d   : > { %v5211_v17 = vpop.eup %5210  ;;  %v4378_v3 = vpop.f32.mrb[164].mxu0  ;;  %4110 = vmatpush3.bf16.msra.mxu1 %v7277_v44  ;;  %v3016_v30 = vpack.c.bf16 %v5209_v57, %v5205_v2  ;;  %v7279_v2 = vpack.c.bf16 %v6749_v63, %v6741_v43 }
 0x30e   : > { %v6852_v1 = vpop.eup %5212  ;;  %v2204_v53 = vadd.f32 %v6674_v49, %v4378_v3  ;;  %v2195_v37 = vpop.f32.mrb[165].mxu0  ;;  %v3015_v19 = vpack.c.bf16 %v5211_v17, %v5207_v18 }
 0x30f   : > { %7278 = vst [vmem:[#allocation67_spill] sm:$0xff] %v6852_v1  ;;  %v2196_v14 = vadd.f32 %v6674_v49, %v2195_v37  ;;  %v4379_v7 = vpop.f32.mrb[166].mxu0 }
 0x310   : > { %5222 = vtanh.f32 %v2204_v53  ;;  %v2207_v33 = vadd.f32 %v6674_v49, %v4379_v7  ;;  %v2198_v27 = vpop.f32.mrb[167].mxu0  ;;  %4111 = vmatprep.subr.bf16.mxu1 %v3015_v19 }
 0x311   : > { %5224 = vtanh.f32 %v2196_v14  ;;  %v2199_v0 = vadd.f32 %v6674_v49, %v2198_v27  ;;  %4112 = vmatpush3.bf16.msra.mxu1 %v7279_v2 }
 0x312   : > { %v6863_v18 = vpop.eup %5214  ;;  %5226 = vtanh.f32 %v2207_v33  ;;  %4113 = vmatprep.subr.bf16.mxu1 %v3016_v30  ;;  %v7284_v33 = vpack.c.bf16 %v6746_v24, %v6738_v5 }
 0x313   : > { %v6870_v17 = vpop.eup %5216  ;;  %5228 = vtanh.f32 %v2199_v0 }
 0x314   : > { %v6876_v3 = vpop.eup %5218 }
 0x315   : > { %v6878_v63 = vpop.eup %5220  ;;  %v4382_v43 = vpop.f32.mrb[168].mxu0  ;;  %4114 = vmatpush3.bf16.msra.mxu1 %v7284_v33 }
 0x316   : > { %v2220_v44 = vadd.f32 %v6674_v49, %v4382_v43  ;;  %v2211_v30 = vpop.f32.mrb[169].mxu0 }
 0x317   : > { %v2212_v24 = vadd.f32 %v6674_v49, %v2211_v30  ;;  %v4383_v5 = vpop.f32.mrb[170].mxu0 }
 0x318   : > { %5230 = vtanh.f32 %v2220_v44  ;;  %v2223_v37 = vadd.f32 %v6674_v49, %v4383_v5  ;;  %v2214_v19 = vpop.f32.mrb[171].mxu0  ;;  %3840 = vmatmul.mubr.msk.bf16.vlgmr.msra.gmra.mrb[84].mxu1 %vm3838_vm10, %v6054_v60 }
 0x319   : > { %5232 = vtanh.f32 %v2212_v24  ;;  %v2215_v14 = vadd.f32 %v6674_v49, %v2214_v19  ;;  %3843 = vmatprep.mubr.msk.bf16.mxu1 %vm3841_vm11, %v5896_v38 }
 0x31a   : > { %v6899_v7 = vpop.eup %5222  ;;  %5234 = vtanh.f32 %v2223_v37 }
 0x31b   : > { %v6901_v27 = vpop.eup %5224  ;;  %5236 = vtanh.f32 %v2215_v14 }
 0x31c   : > { %v6903_v0 = vpop.eup %5226 }
 0x31d   : > { %v6905_v2 = vpop.eup %5228  ;;  %v4386_v57 = vpop.f32.mrb[172].mxu0 }
 0x31e   : > { %v2236_v43 = vadd.f32 %v6674_v49, %v4386_v57  ;;  %v2227_v33 = vpop.f32.mrb[173].mxu0 }
 0x31f   : > { %v2228_v30 = vadd.f32 %v6674_v49, %v2227_v33  ;;  %v4387_v24 = vpop.f32.mrb[174].mxu0 }
 0x320   : > { %5238 = vtanh.f32 %v2236_v43  ;;  %v2239_v5 = vadd.f32 %v6674_v49, %v4387_v24  ;;  %v2230_v37 = vpop.f32.mrb[175].mxu0 }
 0x321   : > { %5240 = vtanh.f32 %v2228_v30  ;;  %v2231_v19 = vadd.f32 %v6674_v49, %v2230_v37 }
 0x322   : > { %v6915_v14 = vpop.eup %5230  ;;  %5242 = vtanh.f32 %v2239_v5 }
 0x323   : > { %v6917_v48 = vpop.eup %5232  ;;  %5244 = vtanh.f32 %v2231_v19 }
 0x324   : > { %v6919_v57 = vpop.eup %5234 }
 0x325   : > { %v6921_v42 = vpop.eup %5236  ;;  %v4390_v15 = vpop.f32.mrb[176].mxu0 }
 0x326   : > { %v2252_v33 = vadd.f32 %v6674_v49, %v4390_v15  ;;  %v2243_v24 = vpop.f32.mrb[177].mxu0 }
 0x327   : > { %v2244_v37 = vadd.f32 %v6674_v49, %v2243_v24  ;;  %v4391_v5 = vpop.f32.mrb[178].mxu0 }
 0x328   : > { %5246 = vtanh.f32 %v2252_v33  ;;  %v2255_v19 = vadd.f32 %v6674_v49, %v4391_v5  ;;  %v2246_v44 = vpop.f32.mrb[179].mxu0 }
 0x329   : > { %5248 = vtanh.f32 %v2244_v37  ;;  %v2247_v32 = vadd.f32 %v6674_v49, %v2246_v44 }
 0x32a   : > { %v6931_v53 = vpop.eup %5238  ;;  %5250 = vtanh.f32 %v2255_v19 }
 0x32b   : > { %v6933_v43 = vpop.eup %5240  ;;  %5252 = vtanh.f32 %v2247_v32  ;;  %v4049_v15 = vpop.f32.mrb[72].mxu1 }
 0x32c   : > { %v6935_v40 = vpop.eup %5242  ;;  %v4050_v30 = vpop.f32.mrb[73].mxu1 }
 0x32d   : > { %v6937_v41 = vpop.eup %5244  ;;  %v4394_v24 = vpop.f32.mrb[180].mxu0  ;;  %v4051_v5 = vadd.f32 %v4050_v30, %v4049_v15 }
 0x32e   : > { %v4052_v37 = vpop.f32.mrb[74].mxu1  ;;  %v2268_v44 = vadd.f32 %v6674_v49, %v4394_v24  ;;  %v2259_v54 = vpop.f32.mrb[181].mxu0  ;;  %v3023_v19 = vpack.c.bf16 %v6937_v41, %v6933_v43 }
 0x32f   : > { %v4053_v1 = vpop.f32.mrb[75].mxu1  ;;  %v2260_v32 = vadd.f32 %v6674_v49, %v2259_v54  ;;  %v4395_v50 = vpop.f32.mrb[182].mxu0  ;;  %v6946_v62 = vadd.f32 %v4051_v5, %v6827_v8 }
 0x330   : > { %5254 = vtanh.f32 %v2268_v44  ;;  %v2271_v28 = vadd.f32 %v6674_v49, %v4395_v50  ;;  %v2262_v21 = vpop.f32.mrb[183].mxu0 }
 0x331   : > { %5256 = vtanh.f32 %v2260_v32  ;;  %v2263_v30 = vadd.f32 %v6674_v49, %v2262_v21  ;;  %v7285_v21 = vpack.c.bf16 %v6878_v63, %v6870_v17 }
 0x332   : > { %v5247_v15 = vpop.eup %5246  ;;  %5258 = vtanh.f32 %v2271_v28 }
 0x333   : > { %v5249_v24 = vpop.eup %5248  ;;  %5260 = vtanh.f32 %v2263_v30 }
 0x334   : > { %v5251_v37 = vpop.eup %5250 }
 0x335   : > { %v5253_v41 = vpop.eup %5252  ;;  %v4398_v1 = vpop.f32.mrb[184].mxu0  ;;  %v3026_v43 = vpack.c.bf16 %v5251_v37, %v5247_v15  ;;  %v7286_v37 = vpack.c.bf16 %v6876_v3, %v6863_v18  ;;  %v2831_v18 = vadd.s32 1280, %v5888_v31  ;;  %v2834_v3 = vadd.s32 1664, %v5888_v31 }
 0x336   : > { %v2284_v54 = vadd.f32 %v6674_v49, %v4398_v1  ;;  %v2275_v33 = vpop.f32.mrb[185].mxu0  ;;  %v3025_v8 = vpack.c.bf16 %v5253_v41, %v5249_v24 }
 0x337   : > { %v2276_v5 = vadd.f32 %v6674_v49, %v2275_v33  ;;  %v4399_v44 = vpop.f32.mrb[186].mxu0 }
 0x338   : > { %5262 = vtanh.f32 %v2284_v54  ;;  %v2287_v50 = vadd.f32 %v6674_v49, %v4399_v44  ;;  %v2278_v32 = vpop.f32.mrb[187].mxu0  ;;  %4121 = vmatprep.subr.bf16.mxu1 %v3025_v8  ;;  %v7288_v8 = vpack.c.bf16 %v6903_v0, %v6899_v7  ;;  %v7290_v7 = vpack.c.bf16 %v6919_v57, %v6915_v14 }
 0x339   : > { %5264 = vtanh.f32 %v2276_v5  ;;  %v2279_v28 = vadd.f32 %v6674_v49, %v2278_v32  ;;  %4122 = vmatpush3.bf16.msra.mxu1 %v7285_v21  ;;  %v7287_v49 = vpack.c.bf16 %v6905_v2, %v6901_v27  ;;  %v7289_v27 = vpack.c.bf16 %v6921_v42, %v6917_v48  ;;  %v7313_v32 = vld [vmem:[#allocation38_spill] sm:$0xff] }
 0x33a   : > { %v5255_v30 = vpop.eup %5254  ;;  %5266 = vtanh.f32 %v2287_v50  ;;  %4123 = vmatprep.subr.bf16.mxu1 %v3026_v43  ;;  %v2850_v2 = vsub.s32 %v2831_v18, %v5891_v34  ;;  %v2853_v50 = vsub.s32 %v2834_v3, %v5891_v34  ;;  %v7291_v0 = vpack.c.bf16 %v6324_v59, %v6304_v29  ;;  %v7331_v3 = vld [vmem:[#allocation43_spill] sm:$0xff] }
 0x33b   : > { %v5257_v15 = vpop.eup %5256  ;;  %5268 = vtanh.f32 %v2279_v28  ;;  %v7292_v42 = vpack.c.bf16 %v6308_v45, %v6300_v36  ;;  %v7293_v48 = vpack.c.bf16 %v6935_v40, %v6931_v53  ;;  %v7294_v29 = vpack.c.bf16 %v6507_v16, %v6495_v23 }
 0x33c   : > { %v5259_v24 = vpop.eup %5258  ;;  %vm2866_vm12 = vcmp.ge.s32.totalorder %v2850_v2, 0  ;;  %vm2882_vm13 = vcmp.lt.s32.totalorder %v2850_v2, 256  ;;  %vm2869_vm14 = vcmp.ge.s32.totalorder %v2853_v50, 0  ;;  %vm2885_vm15 = vcmp.lt.s32.totalorder %v2853_v50, 256  ;;  %v7336_v50 = vld [vmem:[#allocation46_spill] sm:$0xff] }
 0x33d   : > { %v5261_v33 = vpop.eup %5260  ;;  %4124 = vmatpush3.bf16.msra.mxu1 %v7286_v37  ;;  %v3028_v41 = vpack.c.bf16 %v5259_v24, %v5255_v30  ;;  %vm2898_vm0 = vmand %vm2866_vm12, %vm2882_vm13  ;;  %v7295_v59 = vpack.c.bf16 %v6374_v35, %v6332_v47  ;;  %v7296_v36 = vpack.c.bf16 %v6499_v58, %v6490_v51  ;;  %v7297_v45 = vpack.c.bf16 %v6336_v6, %v6327_v11  ;;  %v7303_v51 = vld [vmem:[#allocation30_spill] sm:$0xff]  ;;  %v7316_v24 = vld [vmem:[#allocation32_spill] sm:$0xff] }
 0x33e   : > { %v3027_v1 = vpack.c.bf16 %v5261_v33, %v5257_v15  ;;  %vm2901_vm1 = vmand %vm2869_vm14, %vm2885_vm15  ;;  %v7298_v16 = vpack.c.bf16 %v6533_v25, %v6515_v55  ;;  %v7299_v23 = vpack.c.bf16 %v6421_v9, %v6387_v52  ;;  %v7300_v47 = vpack.c.bf16 %v6519_v20, %v6510_v4  ;;  %v7304_v55 = vld [vmem:[#allocation28_spill] sm:$0xff]  ;;  %v7307_v25 = vld [vmem:[#allocation35_spill] sm:$0xff] }
 0x33f   : > { %vm3844_vm2 = vmpackc.low %vm2898_vm0, %vm2898_vm0  ;;  %v7301_v58 = vpack.c.bf16 %v6397_v46, %v6382_v10  ;;  %v7302_v11 = vpack.c.bf16 %v6560_v13, %v6541_v22  ;;  %v2833_v6 = vadd.s32 1536, %v5888_v31  ;;  %v2836_v35 = vadd.s32 1920, %v5888_v31  ;;  %v7306_v9 = vld [vmem:[#allocation36_spill] sm:$0xff]  ;;  %v7309_v22 = vld [vmem:[#allocation29_spill] sm:$0xff] }
 0x340   : > { %4125 = vmatprep.subr.bf16.mxu1 %v3027_v1  ;;  %vm3847_vm3 = vmpackc.low %vm2901_vm1, %vm2901_vm1  ;;  %v7305_v52 = vpack.c.bf16 %v7303_v51, %v7304_v55  ;;  %v7308_v4 = vpack.c.bf16 %v7306_v9, %v7307_v25  ;;  %v7310_v13 = vld [vmem:[#allocation27_spill] sm:$0xff]  ;;  %v7315_v15 = vld [vmem:[#allocation34_spill] sm:$0xff]  ;;  %vm5537_vm0 = vmmov (!%p3859_p11), 0  }
 0x341   : > { %4126 = vmatpush3.bf16.msra.mxu1 %v7287_v49  ;;  %v2852_v20 = vsub.s32 %v2833_v6, %v5891_v34  ;;  %v2855_v40 = vsub.s32 %v2836_v35, %v5891_v34  ;;  %v7311_v53 = vpack.c.bf16 %v7309_v22, %v7310_v13  ;;  %v7317_v33 = vpack.c.bf16 %v7315_v15, %v7316_v24  ;;  %v7318_v37 = vld [vmem:[#allocation39_spill] sm:$0xff]  ;;  %v7321_v49 = vld [vmem:[#allocation33_spill] sm:$0xff]  ;;  %v7359_v25 = vld [vmem:[#allocation54_spill] sm:$0xff] }
 0x342   : > { %v5263_v17 = vpop.eup %5262  ;;  %4127 = vmatprep.subr.bf16.mxu1 %v3028_v41  ;;  %v7319_v41 = vld [vmem:[#allocation37_spill] sm:$0xff]  ;;  %v7352_v6 = vld [vmem:[#allocation51_spill] sm:$0xff] }
 0x343   : > { %v5265_v63 = vpop.eup %5264  ;;  %vm2868_vm4 = vcmp.ge.s32.totalorder %v2852_v20, 0  ;;  %vm2884_vm5 = vcmp.lt.s32.totalorder %v2852_v20, 256  ;;  %vm2871_vm6 = vcmp.ge.s32.totalorder %v2855_v40, 0  ;;  %vm2887_vm7 = vcmp.lt.s32.totalorder %v2855_v40, 256  ;;  %v7353_v35 = vld [vmem:[#allocation49_spill] sm:$0xff]  ;;  %v7355_v55 = vld [vmem:[#allocation67_spill] sm:$0xff] }
 0x344   : > { %v5267_v54 = vpop.eup %5266  ;;  %v7320_v1 = vpack.c.bf16 %v7318_v37, %v7319_v41  ;;  %vm2900_vm8 = vmand %vm2868_vm4, %vm2884_vm5  ;;  %v7354_v51 = vpack.c.bf16 %v7352_v6, %v7353_v35  ;;  %v7361_v20 = vld [vmem:[#allocation66_spill] sm:$0xff]  ;;  %v7365_v40 = vld [vmem:[#allocation53_spill] sm:$0xff] }
 0x345   : > { %v5269_v43 = vpop.eup %5268  ;;  %4128 = vmatpush3.bf16.msra.mxu1 %v7288_v8  ;;  %v3030_v5 = vpack.c.bf16 %v5267_v54, %v5263_v17  ;;  %vm2903_vm9 = vmand %vm2871_vm6, %vm2887_vm7  ;;  %v7322_v17 = vld [vmem:[#allocation31_spill] sm:$0xff]  ;;  %v7325_v54 = vld [vmem:[#allocation44_spill] sm:$0xff] }
 0x346   : > { %v3029_v44 = vpack.c.bf16 %v5269_v43, %v5265_v63  ;;  %v7323_v63 = vpack.c.bf16 %v7321_v49, %v7322_v17  ;;  %vm3850_vm10 = vmpackc.low %vm2900_vm8, %vm2900_vm8  ;;  %v7326_v43 = vld [vmem:[#allocation42_spill] sm:$0xff] }
 0x347   : > { %vm3853_vm11 = vmpackc.low %vm2903_vm9, %vm2903_vm9  ;;  %v7327_v8 = vpack.c.bf16 %v7325_v54, %v7326_v43 }
 0x348   : > { %4129 = vmatprep.subr.bf16.mxu1 %v3029_v44  ;;  %v7329_v44 = vld [vmem:[#allocation57_spill] sm:$0xff] }
 0x349   : > { %4130 = vmatpush3.bf16.msra.mxu1 %v7289_v27  ;;  %v7332_v27 = vld [vmem:[#allocation41_spill] sm:$0xff] }
 0x34a   : > { %4131 = vmatprep.subr.bf16.mxu1 %v3030_v5  ;;  %v7328_v5 = vld [vmem:[#allocation58_spill] sm:$0xff]  ;;  %v7333_v2 = vpack.c.bf16 %v7331_v3, %v7332_v27 }
 0x34b   : > { %v7330_v18 = vpack.c.bf16 %v7328_v5, %v7329_v44 }
 0x34d   : > { %4132 = vmatpush3.bf16.msra.mxu1 %v7290_v7 }
 0x34e   : > { %4133 = vmatprep.subr.bf16.mxu1 %v7291_v0  ;;  %v7338_v0 = vld [vmem:[#allocation59_spill] sm:$0xff] }
 0x351   : > { %4134 = vmatpush3.bf16.msra.mxu1 %v3023_v19  ;;  %v7312_v19 = vld [vmem:[#allocation40_spill] sm:$0xff] }
 0x352   : > { %4135 = vmatprep.subr.bf16.mxu1 %v7292_v42  ;;  %v7314_v28 = vpack.c.bf16 %v7312_v19, %v7313_v32  ;;  %v7339_v42 = vpack.c.bf16 %v6787_v39, %v7338_v0  ;;  %v5536_v0 = vmov (!%p3859_p11), 0.0  }
 0x353   : > { %4468 = vmatprep.subr.bf16.mxu0 (!%p3859_p11), %v5536_v0  ;;  %4484 = vmatprep.mubr.msk.bf16.mxu0 (!%p3859_p11), %vm5537_vm0, %v5536_v0 }
 0x355   : > { %4136 = vmatpush3.bf16.msra.mxu1 %v7293_v48  ;;  %v7341_v48 = vld [vmem:[#allocation45_spill] sm:$0xff] }
 0x356   : > { %4143 = vmatprep.subr.bf16.mxu1 %v7294_v29 }
 0x358   : > { %3846 = vmatmul.mubr.msk.bf16.vlgmr.msra.gmra.mrb[88].mxu1 %vm3844_vm2, %v6054_v60 }
 0x359   : > { %4144 = vmatpush3.bf16.msra.mxu1 %v7295_v59  ;;  %3849 = vmatprep.mubr.msk.bf16.mxu1 %vm3847_vm3, %v5896_v38  ;;  %v7343_v59 = vld [vmem:[#allocation63_spill] sm:$0xff] }
 0x35a   : > { %4145 = vmatprep.subr.bf16.mxu1 %v7296_v36  ;;  %v7344_v36 = vld [vmem:[#allocation61_spill] sm:$0xff] }
 0x35d   : > { %4146 = vmatpush3.bf16.msra.mxu1 %v7297_v45  ;;  %v7345_v45 = vpack.c.bf16 %v7343_v59, %v7344_v36  ;;  %v5277_v59 = vld [vmem:[#allocation11 + $0x28] sm:$0xff] (!%p3859_p11)   ;;  %v5278_v36 = vld [vmem:[#allocation11 + $0x30] sm:$0xff] (!%p3859_p11)  }
 0x35e   : > { %4147 = vmatprep.subr.bf16.mxu1 %v7298_v16  ;;  %v2835_v16 = vadd.s32 1792, %v5888_v31  ;;  %v7358_v31 = vld [vmem:[#allocation56_spill] sm:$0xff] }
 0x360   : > { %v2854_v39 = vsub.s32 %v2835_v16, %v5891_v34  ;;  %v7364_v34 = vld [vmem:[#allocation55_spill] sm:$0xff] }
 0x361   : > { %4148 = vmatpush3.bf16.msra.mxu1 %v7299_v23  ;;  %v7366_v22 = vpack.c.bf16 %v7364_v34, %v7365_v40 }
 0x362   : > { %4149 = vmatprep.subr.bf16.mxu1 %v7300_v47  ;;  %v7349_v47 = vld [vmem:[#allocation62_spill] sm:$0xff]  ;;  %vm2870_vm12 = vcmp.ge.s32.totalorder %v2854_v39, 0  ;;  %vm2886_vm13 = vcmp.lt.s32.totalorder %v2854_v39, 256 }
 0x363   : > { %vm2902_vm14 = vmand %vm2870_vm12, %vm2886_vm13 }
 0x364   : > { %vm3856_vm15 = vmpackc.low %vm2902_vm14, %vm2902_vm14 }
 0x365   : > { %4150 = vmatpush3.bf16.msra.mxu1 %v7301_v58  ;;  %v7350_v58 = vld [vmem:[#allocation60_spill] sm:$0xff] }
 0x366   : > { %4151 = vmatprep.subr.bf16.mxu1 %v7302_v11  ;;  %v7351_v11 = vpack.c.bf16 %v7349_v47, %v7350_v58 }
 0x369   : > { %4152 = vmatpush3.bf16.msra.mxu1 %v7305_v52  ;;  %v7356_v52 = vld [vmem:[#allocation65_spill] sm:$0xff] }
 0x36a   : > { %4153 = vmatprep.subr.bf16.mxu1 %v7308_v4  ;;  %v7357_v9 = vpack.c.bf16 %v7355_v55, %v7356_v52  ;;  %v7360_v4 = vpack.c.bf16 %v7358_v31, %v7359_v25 }
 0x36b   : > { %v4071_v10 = vpop.f32.mrb[76].mxu1 }
 0x36c   : > { %v4072_v46 = vpop.f32.mrb[77].mxu1 }
 0x36d   : > { %4154 = vmatpush3.bf16.msra.mxu1 %v7311_v53  ;;  %v4073_v14 = vadd.f32 %v4072_v46, %v4071_v10  ;;  %v4074_v57 = vpop.f32.mrb[78].mxu1  ;;  %v7362_v10 = vld [vmem:[#allocation64_spill] sm:$0xff] }
 0x36e   : > { %4155 = vmatprep.subr.bf16.mxu1 %v7314_v28  ;;  %v4075_v21 = vpop.f32.mrb[79].mxu1  ;;  %v7363_v46 = vpack.c.bf16 %v7361_v20, %v7362_v10 }
 0x36f   : > { %v3180_v30 = vadd.f32 %v4073_v14, %v6946_v62  ;;  %v7324_v62 = vpack.c.bf16 %v6775_v56, %v6763_v12  ;;  %v7334_v12 = vpack.c.bf16 %v6801_v26, %v6783_v61  ;;  %v7335_v56 = vld [vmem:[#allocation48_spill] sm:$0xff]  ;;  %v7347_v26 = vld [vmem:[#allocation50_spill] sm:$0xff] }
 0x370   : > { %v7337_v7 = vpack.c.bf16 %v7335_v56, %v7336_v50  ;;  %v7346_v61 = vld [vmem:[#allocation52_spill] sm:$0xff] }
 0x371   : > { %4156 = vmatpush3.bf16.msra.mxu1 %v7317_v33  ;;  %v7348_v23 = vpack.c.bf16 %v7346_v61, %v7347_v26  ;;  %v3860_v26 = vld [vmem:[#allocation12] ss:$0 sm:$0xff] (!%p3859_p11) }
 0x372   : > { %4157 = vmatprep.subr.bf16.mxu1 %v7320_v1 }
 0x375   : > { %4158 = vmatpush3.bf16.msra.mxu1 %v7323_v63 }
 0x376   : > { %4165 = vmatprep.subr.bf16.mxu1 %v7324_v62 }
 0x378   : > { %3852 = vmatmul.mubr.msk.bf16.vlgmr.msra.gmra.mrb[92].mxu1 %vm3850_vm10, %v6054_v60 }
 0x379   : > { %4166 = vmatpush3.bf16.msra.mxu1 %v7327_v8  ;;  %3855 = vmatprep.mubr.msk.bf16.mxu1 %vm3853_vm11, %v5896_v38  ;;  %v7340_v38 = vld [vmem:[#allocation47_spill] sm:$0xff] }
 0x37a   : > { %4167 = vmatprep.subr.bf16.mxu1 %v7330_v18  ;;  %v7342_v29 = vpack.c.bf16 %v7340_v38, %v7341_v48  ;;  %v5274_v38 = vld [vmem:[#allocation11 + $0x10] sm:$0xff] (!%p3859_p11)   ;;  %v5275_v48 = vld [vmem:[#allocation11 + $0x18] sm:$0xff] (!%p3859_p11)  }
 0x37d   : > { %4168 = vmatpush3.bf16.msra.mxu1 %v7333_v2  ;;  %v2920_v2 = vld [vmem:[#allocation2] sm:$0xff] }
 0x37e   : > { %4169 = vmatprep.subr.bf16.mxu1 %v7334_v12 }
 0x381   : > { %4170 = vmatpush3.bf16.msra.mxu1 %v7337_v7  ;;  %v5272_v7 = vld [vmem:[#allocation11] sm:$0xff] (!%p3859_p11)  }
 0x382   : > { %4171 = vmatprep.subr.bf16.mxu1 %v7339_v42  ;;  %4469 = vmatpush3.bf16.msra.mxu0 (!%p3859_p11), %v5272_v7  ;;  %v5273_v42 = vld [vmem:[#allocation11 + $0x8] sm:$0xff] (!%p3859_p11)  }
 0x383   : > { %4470 = vmatprep.subr.bf16.mxu0 (!%p3859_p11), %v5536_v0 }
 0x385   : > { %4172 = vmatpush3.bf16.msra.mxu1 %v7342_v29  ;;  %v5276_v29 = vld [vmem:[#allocation11 + $0x20] sm:$0xff] (!%p3859_p11)  }
 0x386   : > { %4173 = vmatprep.subr.bf16.mxu1 %v7345_v45  ;;  %4471 = vmatpush3.bf16.msra.mxu0 (!%p3859_p11), %v5273_v42  ;;  %v5279_v45 = vld [vmem:[#allocation11 + $0x38] sm:$0xff] (!%p3859_p11)  }
 0x387   : > { %4472 = vmatprep.subr.bf16.mxu0 (!%p3859_p11), %v5536_v0 }
 0x389   : > { %4174 = vmatpush3.bf16.msra.mxu1 %v7348_v23 }
 0x38a   : > { %4175 = vmatprep.subr.bf16.mxu1 %v7351_v11  ;;  %4473 = vmatpush3.bf16.msra.mxu0 (!%p3859_p11), %v5274_v38 }
 0x38b   : > { %4474 = vmatprep.subr.bf16.mxu0 (!%p3859_p11), %v5536_v0 }
 0x38d   : > { %4176 = vmatpush3.bf16.msra.mxu1 %v7354_v51 }
 0x38e   : > { %4177 = vmatprep.subr.bf16.mxu1 %v7357_v9  ;;  %4475 = vmatpush3.bf16.msra.mxu0 (!%p3859_p11), %v5275_v48 }
 0x38f   : > { %4476 = vmatprep.subr.bf16.mxu0 (!%p3859_p11), %v5536_v0 }
 0x391   : > { %4178 = vmatpush3.bf16.msra.mxu1 %v7360_v4 }
 0x392   : > { %4179 = vmatprep.subr.bf16.mxu1 %v7363_v46  ;;  %4477 = vmatpush3.bf16.msra.mxu0 (!%p3859_p11), %v5276_v29 }
 0x393   : > { %4478 = vmatprep.subr.bf16.mxu0 (!%p3859_p11), %v5536_v0 }
 0x395   : > { %4180 = vmatpush3.bf16.msra.mxu1 %v7366_v22 }
 0x396   : > { %4479 = vmatpush3.bf16.msra.mxu0 (!%p3859_p11), %v5277_v59 }
 0x397   : > { %4480 = vmatprep.subr.bf16.mxu0 (!%p3859_p11), %v5536_v0 }
 0x398   : > { %3858 = vmatmul.mubr.msk.bf16.vlgmr.msra.gmra.mrb[96].mxu1 %vm3856_vm15, %v6054_v60 }
 0x39a   : > { %4481 = vmatpush3.bf16.msra.mxu0 (!%p3859_p11), %v5278_v36 }
 0x39b   : > { %4482 = vmatprep.subr.bf16.mxu0 (!%p3859_p11), %v5536_v0 }
 0x39e   : > { %4483 = vmatpush3.bf16.msra.mxu0 (!%p3859_p11), %v5279_v45 }
 0x3ab   : > { %v4093_v13 = vpop.f32.mrb[80].mxu1 }
 0x3ac   : > { %v4094_v53 = vpop.f32.mrb[81].mxu1 }
 0x3ad   : > { %v4095_v14 = vadd.f32 %v4094_v53, %v4093_v13  ;;  %v4096_v57 = vpop.f32.mrb[82].mxu1 }
 0x3ae   : > { %v4097_v19 = vpop.f32.mrb[83].mxu1 }
 0x3af   : > { %v3220_v32 = vadd.f32 %v4095_v14, %v3180_v30 }
 0x3eb   : > { %v4115_v28 = vpop.f32.mrb[84].mxu1 }
 0x3ec   : > { %v4116_v21 = vpop.f32.mrb[85].mxu1 }
 0x3ed   : > { %v4117_v15 = vadd.f32 %v4116_v21, %v4115_v28  ;;  %v4118_v24 = vpop.f32.mrb[86].mxu1 }
 0x3ee   : > { %v4119_v33 = vpop.f32.mrb[87].mxu1 }
 0x3ef   : > { %v3260_v37 = vadd.f32 %v4117_v15, %v3220_v32 }
 0x42b   : > { %v4137_v41 = vpop.f32.mrb[88].mxu1 }
 0x42c   : > { %v4138_v1 = vpop.f32.mrb[89].mxu1 }
 0x42d   : > { %v4139_v49 = vadd.f32 %v4138_v1, %v4137_v41  ;;  %v4140_v17 = vpop.f32.mrb[90].mxu1 }
 0x42e   : > { %v4141_v63 = vpop.f32.mrb[91].mxu1 }
 0x42f   : > { %v3300_v62 = vadd.f32 %v4139_v49, %v3260_v37 }
 0x44b   : > { %v4159_v54 = vpop.f32.mrb[92].mxu1 }
 0x44c   : > { %v4160_v60 = vpop.f32.mrb[93].mxu1 }
 0x44d   : > { %v4161_v43 = vadd.f32 %v4160_v60, %v4159_v54  ;;  %v4162_v8 = vpop.f32.mrb[94].mxu1 }
 0x44e   : > { %v4163_v5 = vpop.f32.mrb[95].mxu1 }
 0x44f   : > { %v3340_v44 = vadd.f32 %v4161_v43, %v3300_v62 }
 0x46b   : > { %v4181_v18 = vpop.f32.mrb[96].mxu1 }
 0x46c   : > { %v4182_v30 = vpop.f32.mrb[97].mxu1 }
 0x46d   : > { %v4183_v3 = vadd.f32 %v4182_v30, %v4181_v18  ;;  %v4184_v27 = vpop.f32.mrb[98].mxu1  ;;  %3390 = sbr.rel (%p3859_p11) target bundleno = 1676 (0x68c), region = 76 }
 0x46e   : > { %v4185_v12 = vpop.f32.mrb[99].mxu1 }
 0x46f   : > { %v3380_v56 = vadd.f32 %v4183_v3, %v3340_v44 }
 0x471   : > { %v3385_v50 = vadd.f32 %v3380_v56, %v2920_v2 }
 0x473   : > { %3386 = vst [vmem:[#allocation2] sm:$0xff] %v3385_v50 }
 0x47a   : > { %v3391_v16 = vld [vmem:[#allocation2] sm:$0xff] }
 0x47b   : > { %v3392_v61 = vpack.c.bf16 %v3391_v16, %v3391_v16 }
 0x47d   : > { %4485 = vmatmul.mubr.bf16.vlgmr.msra.gmra.mrb[0].mxu0 %v3392_v61 }
 0x550   : > { %v3498_v23 = vpop.f32.mrb[0].mxu0 }
 0x551   : > { %v3499_v47 = vadd.f32 %v3860_v26, %v3498_v23  ;;  %v4486_v58 = vpop.f32.mrb[1].mxu0 }
 0x552   : > { %v3501_v11 = vpop.f32.mrb[2].mxu0 }
 0x553   : > { %3504 = vmax.xlane.f32.xlu0 %v3499_v47  ;;  %v4487_v39 = vpop.f32.mrb[3].mxu0 }
 0x5e0   : > { %v3505_v6 = vpop.xlane.xlu0 %3504 }
 0x5e1   : > { %v3506_v35 = vsub.f32 %v3499_v47, %v3505_v6 }
 0x5e3   : > { %v3507_v51 = vmul.f32 1.442695, %v3506_v35 }
 0x5e5   : > { %5280 = vpow2.f32 %v3507_v51 }
 0x5ef   : > { %v5281_v55 = vpop.eup %5280 }
 0x5f0   : > { %3509 = vadd.xlane.f32.xlu0 %v5281_v55 }
 0x67d   : > { %v3510_v52 = vpop.xlane.xlu0 %3509 }
 0x67e   : > { %5282 = vrcp.f32 %v3510_v52 }
 0x688   : > { %v5283_v9 = vpop.eup %5282 }
 0x689   : > { %v3512_v31 = vmul.f32 %v5283_v9, %v5281_v55 }
 0x68b   : > { %3513 = vst [vmem:[#allocation14] sm:$0xff] %v3512_v31 }
 0x68c PF: > { %p4556_p13 = scmp.eq.s32.totalorder %s5603_s27, 2  ;;  %s5538_s20 = smov [#allocation14]  }
 0x68d   : > { %s3523_s9 = sshll.u32 %s5538_s20, 4  ;;  %s3524_s9 = int_to_ptr.vmem [resolvable:$true] %s3523_s9 }
 0x68e   : > { %s5424_s21 = scalar_lea.vmem %s3524_s9, 128  ;;  %p5431_p5 = scmp.lt.s32.totalorder %s3524_s9, %s3524_s9 }
 0x68f   : > { %p5425_p12 = scmp.ne.s32.totalorder %s3524_s9, %s5424_s21  ;;  %p5432_p8 = scmp.lt.s32.totalorder %s5424_s21, %s5424_s21 }
 0x691   : > { %p5426_p1 = pnand %p5425_p12, %p4556_p13  ;;  %p5433_p0 = por %p5432_p8, %p5431_p5 }
 0x693   : > { %p5427_p3 = pneg %p5426_p1 }
 0x695   : > { %p5434_p10 = pnand %p5433_p0, %p5427_p3 }
 0x697   : > { %5437 = shalt.err (!%p5434_p10)
}
 0x698   : > { %s7368_s14 = sld [smem:[#allocation69_spill]] }
 0x69e   : > { %s5438_s16 = scalar_lea.hbm %s7368_s14, 128 }
 0x69f   : > { %p5439_p2 = scmp.ne.s32.totalorder %s7368_s14, %s5438_s16  ;;  %p5444_p7 = scmp.lt.u32.totalorder %s5438_s16, %s7368_s14 }
 0x6a1   : > { %p5440_p4 = pnand %p5439_p2, %p4556_p13 }
 0x6a3   : > { %p5441_p6 = pneg %p5440_p4 }
 0x6a5   : > { %p5446_p9 = pnand %p5444_p7, %p5441_p6 }
 0x6a7   : > { %5449 = shalt.err (!%p5446_p9)
}
 0x6a8   : > { %4532 = dma.vmem_to_hbm [thread:$0]  (%p4556_p13), %s3524_s9, 128, %s7368_s14, [#allocation5]  }
 0x6a9   : > { %5495 = dma.done.wait (%p4556_p13), [#allocation5], 128  }
 0x6aa   : > { %5497 = vsyncadd (%p4556_p13), [#allocation5], 4294967168 }
 0x6ab PF: > { %s25_s26 = sadd.s32 1, %s5520_s26   ;;  %s7369_s11 = sld [smem:[#allocation26_spill]] }
 0x6ac   : > { %p22_p11 = scmp.ge.s32.totalorder %s25_s26, 5   ;;  %s7370_s18 = sld [smem:[#allocation25_spill]] }
 0x6ad   : > { %s7371_s21 = smov %s5504_s22  ;;  %s7372_s22 = smov %s5508_s23 }
 0x6ae   : > { %s7374_s24 = smov %s5516_s25  ;;  %24 = sbr.rel (!%p22_p11) target bundleno = 12 (0xc), region = 124 }
 0x6b1   : > { %s7373_s23 = smov %s7369_s11 }
 0x6b2   : > { %s7375_s25 = smov %s7370_s18 }
 0x6b5   :  { %3536 = vsyncpa [#allocation4], 1 }
 0x6b6   :  { %3538 = vsyncpa [#allocation4 + $0x1], 1 }
 0x6b7   :  { %3539 = vsyncpa [#allocation7], 1 }
 0x6b8   :  { %3541 = vsyncpa [#allocation7 + $0x1], 1 }
 0x6b9   :  { %3542 = vsyncpa [#allocation10], 1 }
 0x6ba   :  { %3543 = vsyncpa [#allocation13], 1 }
 0x6bb   :  { %3544 = vsyncpa [#allocation5], 1 }
 0x6bc   :  { %3546 = vsyncpa [#allocation5 + $0x1], 1 }

</bundles_post_ra>
